<compile_context>
chip_gen: v6e
topology: v6e:2x2x1
jax: 0.10.0
libtpu: 0.0.40
codegen_flags: <defaults>
</compile_context>

<pallas_src>
import numpy as np
import jax
import jax.numpy as jnp
from jax.experimental import pallas as pl
from jax.experimental.pallas import tpu as pltpu

NB = 8  # images per grid block (one sublane tile)


# ----------------------------- Pallas kernel --------------------------------

def _net_kernel(x_ref, b1k_ref, bias1_ref, b2k_ref, bias2_ref,
                wfc1_ref, bfc1_ref, wfc2_ref, bfc2_ref, o_ref):
    # x_ref: (28, NB, 28) = (H, n, W) for one block of NB images (C == 1).
    f32 = jnp.float32

    # ------------- stage 1: conv1(1->10, k=5) -> maxpool2 -> relu -------------
    # Parity-split the 28 input rows into two (14*NB, 28) slabs so that the
    # stride-2 row selections needed by the fused pooling become plain aligned
    # slices (no strided vector loads).
    xe = jnp.concatenate([x_ref[2 * a] for a in range(14)], axis=0)      # rows 0,2,..,26
    xo = jnp.concatenate([x_ref[2 * a + 1] for a in range(14)], axis=0)  # rows 1,3,..,27

    def xrows(s):  # image rows {s, s+2, ..., s+22} -> (12*NB, 28); row = ip*NB + n
        a = s // 2
        src = xe if s % 2 == 0 else xo
        return src[a * NB:(a + 12) * NB, :]

    cands = []
    for di in range(2):
        for dj in range(2):
            acc = jnp.dot(xrows(di), b1k_ref[0, dj], preferred_element_type=f32)
            for kh in range(1, 5):
                acc = acc + jnp.dot(xrows(di + kh), b1k_ref[kh, dj],
                                    preferred_element_type=f32)
            cands.append(acc)                                    # (12*NB, 120)
    pooled = jnp.maximum(jnp.maximum(cands[0], cands[1]),
                         jnp.maximum(cands[2], cands[3]))
    # bias-add commutes with max-pool (per-channel constant); relu after pooling
    # matches F.relu(F.max_pool2d(conv1(x), 2)).
    h1 = jnp.maximum(pooled + bias1_ref[...], 0.0)               # (12*NB, 120)
    # h1[(ip*NB + n), jp*10 + c]  ==  relu(pool(conv1(x)))[n, c, ip, jp]

    # ------------- stage 2: conv2(10->20, k=5) -> maxpool2 -> relu ------------
    # TODO(synk): nn.Dropout2d between conv2 and pooling is identity in eval
    # mode; train-time stochastic channel masking is not implemented.
    he = jnp.concatenate([h1[(2 * a) * NB:(2 * a + 1) * NB, :] for a in range(6)],
                         axis=0)                                 # ip = 0,2,..,10
    ho = jnp.concatenate([h1[(2 * a + 1) * NB:(2 * a + 2) * NB, :] for a in range(6)],
                         axis=0)                                 # ip = 1,3,..,11

    def hrows(s):  # h1 rows ip in {s, s+2, s+4, s+6} -> (4*NB, 120)
        a = s // 2
        src = he if s % 2 == 0 else ho
        return src[a * NB:(a + 4) * NB, :]

    cands2 = []
    for di in range(2):
        for dj in range(2):
            acc = jnp.dot(hrows(di), b2k_ref[0, dj], preferred_element_type=f32)
            for kh in range(1, 5):
                acc = acc + jnp.dot(hrows(di + kh), b2k_ref[kh, dj],
                                    preferred_element_type=f32)
            cands2.append(acc)                                   # (4*NB, 80)
    pooled2 = jnp.maximum(jnp.maximum(cands2[0], cands2[1]),
                          jnp.maximum(cands2[2], cands2[3]))
    h2 = jnp.maximum(pooled2 + bias2_ref[...], 0.0)              # (4*NB, 80)
    # h2[(ip*NB + n), jp*20 + c]  ==  relu(pool(conv2(h1)))[n, c, ip, jp]

    # ------- head: fc1 -> relu -> (dropout = identity) -> fc2 -> log_softmax ---
    # fc1 weights were pre-permuted on the host into this (ip, jp, c) layout, so
    # the PyTorch NCHW flatten needs no in-kernel transpose.
    z = jnp.dot(h2[0:NB, :], wfc1_ref[0], preferred_element_type=f32)
    for ip in range(1, 4):
        z = z + jnp.dot(h2[ip * NB:(ip + 1) * NB, :], wfc1_ref[ip],
                        preferred_element_type=f32)
    z = jnp.maximum(z + bfc1_ref[...], 0.0)                      # (NB, 50)
    # TODO(synk): F.dropout after fc1 is identity at inference (training=False).
    logits = jnp.dot(z, wfc2_ref[...], preferred_element_type=f32) + bfc2_ref[...]
    m = jnp.max(logits, axis=-1, keepdims=True)
    lse = m + jnp.log(jnp.sum(jnp.exp(logits - m), axis=-1, keepdims=True))
    o_ref[...] = logits - lse                                    # log_softmax(dim=1)


# --------------------------- host-side weight pack ---------------------------

def pack_params(params):
    """One-time host repack of PyTorch-layout weights into the banded/permuted
    matrices consumed by the fused kernel (identical numerics)."""
    w1 = np.asarray(params['conv1_w'], np.float32)   # (10, 1, 5, 5)  OIHW
    b1 = np.asarray(params['conv1_b'], np.float32)   # (10,)
    w2 = np.asarray(params['conv2_w'], np.float32)   # (20, 10, 5, 5)
    b2 = np.asarray(params['conv2_b'], np.float32)   # (20,)
    fw1 = np.asarray(params['fc1_w'], np.float32)    # (320, 50)  (in, out)
    fb1 = np.asarray(params['fc1_b'], np.float32)
    fw2 = np.asarray(params['fc2_w'], np.float32)    # (50, 10)
    fb2 = np.asarray(params['fc2_b'], np.float32)

    # stage-1 banded weights: b1k[kh, dj, w_in, jp*10 + co]
    #   = w1[co, 0, kh, w_in - (2*jp + dj)]   (zero outside the 5-tap window)
    b1k = np.zeros((5, 2, 28, 120), np.float32)
    for kh in range(5):
        for dj in range(2):
            for jp in range(12):
                for kw in range(5):
                    b1k[kh, dj, 2 * jp + dj + kw,
                        jp * 10:(jp + 1) * 10] = w1[:, 0, kh, kw]
    bias1 = np.tile(b1, 12)[None, :]                 # (1, 120)

    # stage-2 banded weights: b2k[kh, dj, j*10 + ci, jp*20 + co]
    #   = w2[co, ci, kh, j - (2*jp + dj)]
    b2k = np.zeros((5, 2, 120, 80), np.float32)
    for kh in range(5):
        for dj in range(2):
            for jp in range(4):
                for kw in range(5):
                    j = 2 * jp + dj + kw
                    b2k[kh, dj, j * 10:(j + 1) * 10,
                        jp * 20:(jp + 1) * 20] = w2[:, :, kh, kw].T
    bias2 = np.tile(b2, 4)[None, :]                  # (1, 80)

    # fc1: permute rows from PyTorch NCHW-flatten order (c*16 + ip*4 + jp) into
    # the kernel's (ip, jp, c) layout, split by ip -> (4, 80, 50).
    perm = np.empty((320,), np.int64)
    for ip in range(4):
        for jp in range(4):
            for c in range(20):
                perm[ip * 80 + jp * 20 + c] = c * 16 + ip * 4 + jp
    wfc1 = fw1[perm, :].reshape(4, 80, 50)

    return {
        'b1k': jnp.asarray(b1k), 'bias1': jnp.asarray(bias1),
        'b2k': jnp.asarray(b2k), 'bias2': jnp.asarray(bias2),
        'wfc1': jnp.asarray(wfc1), 'bfc1': jnp.asarray(fb1[None, :]),
        'wfc2': jnp.asarray(fw2), 'bfc2': jnp.asarray(fb2[None, :]),
    }


# ------------------------------- forward pass --------------------------------

@jax.jit
def net_forward(x_nchw, kp):
    n = x_nchw.shape[0]
    npad = ((n + NB - 1) // NB) * NB
    x = x_nchw[:, 0, :, :]                               # (N, 28, 28), C == 1
    if npad != n:
        x = jnp.pad(x, ((0, npad - n), (0, 0), (0, 0)))
    xt = jnp.transpose(x, (1, 0, 2))                     # (28, Npad, 28) = (H, n, W)

    out = pl.pallas_call(
        _net_kernel,
        out_shape=jax.ShapeDtypeStruct((npad, 10), jnp.float32),
        grid_spec=pltpu.PrefetchScalarGridSpec(
            num_scalar_prefetch=0,
            grid=(npad // NB,),
            in_specs=[
                # batch-tiled input block
                pl.BlockSpec((28, NB, 28), lambda b: (0, b, 0)),
                # weights: constant block index -> DMA'd once, resident in VMEM
                pl.BlockSpec((5, 2, 28, 120), lambda b: (0, 0, 0, 0)),
                pl.BlockSpec((1, 120), lambda b: (0, 0)),
                pl.BlockSpec((5, 2, 120, 80), lambda b: (0, 0, 0, 0)),
                pl.BlockSpec((1, 80), lambda b: (0, 0)),
                pl.BlockSpec((4, 80, 50), lambda b: (0, 0, 0)),
                pl.BlockSpec((1, 50), lambda b: (0, 0)),
                pl.BlockSpec((50, 10), lambda b: (0, 0)),
                pl.BlockSpec((1, 10), lambda b: (0, 0)),
            ],
            out_specs=pl.BlockSpec((NB, 10), lambda b: (b, 0)),
        ),
        compiler_params=pltpu.CompilerParams(
            dimension_semantics=("parallel",)),
    )(xt, kp['b1k'], kp['bias1'], kp['b2k'], kp['bias2'],
      kp['wfc1'], kp['bfc1'], kp['wfc2'], kp['bfc2'])
    return out[:n]


# --------------------- pure-JAX reference (for checking) ---------------------

def net_forward_ref(x_nchw, params):
    y = jax.lax.conv_general_dilated(
        x_nchw, params['conv1_w'], (1, 1), 'VALID',
        dimension_numbers=('NCHW', 'OIHW', 'NCHW'))
    y = y + params['conv1_b'][None, :, None, None]
    y = jax.lax.reduce_window(y, -jnp.inf, jax.lax.max,
                              (1, 1, 2, 2), (1, 1, 2, 2), 'VALID')
    y = jnp.maximum(y, 0.0)
    y = jax.lax.conv_general_dilated(
        y, params['conv2_w'], (1, 1), 'VALID',
        dimension_numbers=('NCHW', 'OIHW', 'NCHW'))
    y = y + params['conv2_b'][None, :, None, None]
    y = jax.lax.reduce_window(y, -jnp.inf, jax.lax.max,
                              (1, 1, 2, 2), (1, 1, 2, 2), 'VALID')
    y = jnp.maximum(y, 0.0)
    y = y.reshape(y.shape[0], -1)
    y = jnp.maximum(y @ params['fc1_w'] + params['fc1_b'], 0.0)
    y = y @ params['fc2_w'] + params['fc2_b']
    return jax.nn.log_softmax(y, axis=1)


# -------------------------------- params init --------------------------------

def init_params(key):
    ks = jax.random.split(key, 8)

    def u(k, shape, fan_in):
        bound = 1.0 / float(np.sqrt(fan_in))
        return jax.random.uniform(k, shape, jnp.float32, -bound, bound)

    return {
        'conv1_w': u(ks[0], (10, 1, 5, 5), 1 * 25),    # OIHW, like nn.Conv2d
        'conv1_b': u(ks[1], (10,), 1 * 25),
        'conv2_w': u(ks[2], (20, 10, 5, 5), 10 * 25),
        'conv2_b': u(ks[3], (20,), 10 * 25),
        'fc1_w': u(ks[4], (320, 50), 320),             # stored as W.T (in, out)
        'fc1_b': u(ks[5], (50,), 320),
        'fc2_w': u(ks[6], (50, 10), 50),
        'fc2_b': u(ks[7], (50,), 50)[:10] * 0 + u(ks[7], (10,), 50),
    }


if __name__ == "__main__":
    key = jax.random.PRNGKey(0)
    kx, kparam = jax.random.split(key)
    # the architecture forces 28x28 single-channel input (fc1 expects 320 = 20*4*4);
    # batch=10 exercises both the batch grid (2 blocks) and the tail-padding path.
    batch = 10
    x = jax.random.normal(kx, (batch, 1, 28, 28), jnp.float32)
    params = init_params(kparam)
    kparams = pack_params(params)

    out = jax.block_until_ready(net_forward(x, kparams))
    assert out.shape == (batch, 10), out.shape

    ref = net_forward_ref(x, params)
    assert bool(jnp.allclose(out, ref, atol=1e-2, rtol=1e-2)), "mismatch vs reference"

    print("KERNEL_OK")
</pallas_src>

<mosaic_0001>
module attributes {stable_mosaic.version = 11 : i64} {
  func.func @_net_kernel(%arg0: i32, %arg1: memref<28x8x28xf32, #tpu.memory_space<vmem>>, %arg2: memref<5x2x28x120xf32, #tpu.memory_space<vmem>>, %arg3: memref<1x120xf32, #tpu.memory_space<vmem>>, %arg4: memref<5x2x120x80xf32, #tpu.memory_space<vmem>>, %arg5: memref<1x80xf32, #tpu.memory_space<vmem>>, %arg6: memref<4x80x50xf32, #tpu.memory_space<vmem>>, %arg7: memref<1x50xf32, #tpu.memory_space<vmem>>, %arg8: memref<50x10xf32, #tpu.memory_space<vmem>>, %arg9: memref<1x10xf32, #tpu.memory_space<vmem>>, %arg10: memref<8x10xf32, #tpu.memory_space<vmem>>) attributes {dimension_semantics = [#tpu.dimension_semantics<parallel>], iteration_bounds = array<i64: 2>, scalar_prefetch = 0 : i64, scratch_operands = 0 : i64, tpu.core_type = #tpu.core_type<tc>, window_params = [{transform_indices = @transform_0, window_bounds = array<i64: 28, 8, 28>}, {pipeline_mode = #tpu.pipeline_mode<synchronous>, transform_indices = @transform_1, window_bounds = array<i64: 5, 2, 28, 120>}, {pipeline_mode = #tpu.pipeline_mode<synchronous>, transform_indices = @transform_2, window_bounds = array<i64: 1, 120>}, {pipeline_mode = #tpu.pipeline_mode<synchronous>, transform_indices = @transform_3, window_bounds = array<i64: 5, 2, 120, 80>}, {pipeline_mode = #tpu.pipeline_mode<synchronous>, transform_indices = @transform_4, window_bounds = array<i64: 1, 80>}, {pipeline_mode = #tpu.pipeline_mode<synchronous>, transform_indices = @transform_5, window_bounds = array<i64: 4, 80, 50>}, {pipeline_mode = #tpu.pipeline_mode<synchronous>, transform_indices = @transform_6, window_bounds = array<i64: 1, 50>}, {pipeline_mode = #tpu.pipeline_mode<synchronous>, transform_indices = @transform_7, window_bounds = array<i64: 50, 10>}, {pipeline_mode = #tpu.pipeline_mode<synchronous>, transform_indices = @transform_8, window_bounds = array<i64: 1, 10>}, {transform_indices = @transform_9, window_bounds = array<i64: 8, 10>}]} {
    %c0 = arith.constant 0 : index
    %c0_0 = arith.constant 0 : index
    %c0_1 = arith.constant 0 : index
    %0 = vector.load %arg1[%c0, %c0_0, %c0_1] : memref<28x8x28xf32, #tpu.memory_space<vmem>>, vector<1x8x28xf32>
    %1 = vector.shape_cast %0 : vector<1x8x28xf32> to vector<8x28xf32>
    %c2 = arith.constant 2 : index
    %c0_2 = arith.constant 0 : index
    %c0_3 = arith.constant 0 : index
    %2 = vector.load %arg1[%c2, %c0_2, %c0_3] : memref<28x8x28xf32, #tpu.memory_space<vmem>>, vector<1x8x28xf32>
    %3 = vector.shape_cast %2 : vector<1x8x28xf32> to vector<8x28xf32>
    %c4 = arith.constant 4 : index
    %c0_4 = arith.constant 0 : index
    %c0_5 = arith.constant 0 : index
    %4 = vector.load %arg1[%c4, %c0_4, %c0_5] : memref<28x8x28xf32, #tpu.memory_space<vmem>>, vector<1x8x28xf32>
    %5 = vector.shape_cast %4 : vector<1x8x28xf32> to vector<8x28xf32>
    %c6 = arith.constant 6 : index
    %c0_6 = arith.constant 0 : index
    %c0_7 = arith.constant 0 : index
    %6 = vector.load %arg1[%c6, %c0_6, %c0_7] : memref<28x8x28xf32, #tpu.memory_space<vmem>>, vector<1x8x28xf32>
    %7 = vector.shape_cast %6 : vector<1x8x28xf32> to vector<8x28xf32>
    %c8 = arith.constant 8 : index
    %c0_8 = arith.constant 0 : index
    %c0_9 = arith.constant 0 : index
    %8 = vector.load %arg1[%c8, %c0_8, %c0_9] : memref<28x8x28xf32, #tpu.memory_space<vmem>>, vector<1x8x28xf32>
    %9 = vector.shape_cast %8 : vector<1x8x28xf32> to vector<8x28xf32>
    %c10 = arith.constant 10 : index
    %c0_10 = arith.constant 0 : index
    %c0_11 = arith.constant 0 : index
    %10 = vector.load %arg1[%c10, %c0_10, %c0_11] : memref<28x8x28xf32, #tpu.memory_space<vmem>>, vector<1x8x28xf32>
    %11 = vector.shape_cast %10 : vector<1x8x28xf32> to vector<8x28xf32>
    %c12 = arith.constant 12 : index
    %c0_12 = arith.constant 0 : index
    %c0_13 = arith.constant 0 : index
    %12 = vector.load %arg1[%c12, %c0_12, %c0_13] : memref<28x8x28xf32, #tpu.memory_space<vmem>>, vector<1x8x28xf32>
    %13 = vector.shape_cast %12 : vector<1x8x28xf32> to vector<8x28xf32>
    %c14 = arith.constant 14 : index
    %c0_14 = arith.constant 0 : index
    %c0_15 = arith.constant 0 : index
    %14 = vector.load %arg1[%c14, %c0_14, %c0_15] : memref<28x8x28xf32, #tpu.memory_space<vmem>>, vector<1x8x28xf32>
    %15 = vector.shape_cast %14 : vector<1x8x28xf32> to vector<8x28xf32>
    %c16 = arith.constant 16 : index
    %c0_16 = arith.constant 0 : index
    %c0_17 = arith.constant 0 : index
    %16 = vector.load %arg1[%c16, %c0_16, %c0_17] : memref<28x8x28xf32, #tpu.memory_space<vmem>>, vector<1x8x28xf32>
    %17 = vector.shape_cast %16 : vector<1x8x28xf32> to vector<8x28xf32>
    %c18 = arith.constant 18 : index
    %c0_18 = arith.constant 0 : index
    %c0_19 = arith.constant 0 : index
    %18 = vector.load %arg1[%c18, %c0_18, %c0_19] : memref<28x8x28xf32, #tpu.memory_space<vmem>>, vector<1x8x28xf32>
    %19 = vector.shape_cast %18 : vector<1x8x28xf32> to vector<8x28xf32>
    %c20 = arith.constant 20 : index
    %c0_20 = arith.constant 0 : index
    %c0_21 = arith.constant 0 : index
    %20 = vector.load %arg1[%c20, %c0_20, %c0_21] : memref<28x8x28xf32, #tpu.memory_space<vmem>>, vector<1x8x28xf32>
    %21 = vector.shape_cast %20 : vector<1x8x28xf32> to vector<8x28xf32>
    %c22 = arith.constant 22 : index
    %c0_22 = arith.constant 0 : index
    %c0_23 = arith.constant 0 : index
    %22 = vector.load %arg1[%c22, %c0_22, %c0_23] : memref<28x8x28xf32, #tpu.memory_space<vmem>>, vector<1x8x28xf32>
    %23 = vector.shape_cast %22 : vector<1x8x28xf32> to vector<8x28xf32>
    %c24 = arith.constant 24 : index
    %c0_24 = arith.constant 0 : index
    %c0_25 = arith.constant 0 : index
    %24 = vector.load %arg1[%c24, %c0_24, %c0_25] : memref<28x8x28xf32, #tpu.memory_space<vmem>>, vector<1x8x28xf32>
    %25 = vector.shape_cast %24 : vector<1x8x28xf32> to vector<8x28xf32>
    %c26 = arith.constant 26 : index
    %c0_26 = arith.constant 0 : index
    %c0_27 = arith.constant 0 : index
    %26 = vector.load %arg1[%c26, %c0_26, %c0_27] : memref<28x8x28xf32, #tpu.memory_space<vmem>>, vector<1x8x28xf32>
    %27 = vector.shape_cast %26 : vector<1x8x28xf32> to vector<8x28xf32>
    %28 = tpu.concatenate %1, %3, %5, %7, %9, %11, %13, %15, %17, %19, %21, %23, %25, %27 in 0 : vector<8x28xf32>, vector<8x28xf32>, vector<8x28xf32>, vector<8x28xf32>, vector<8x28xf32>, vector<8x28xf32>, vector<8x28xf32>, vector<8x28xf32>, vector<8x28xf32>, vector<8x28xf32>, vector<8x28xf32>, vector<8x28xf32>, vector<8x28xf32>, vector<8x28xf32> -> vector<112x28xf32>
    %c1 = arith.constant 1 : index
    %c0_28 = arith.constant 0 : index
    %c0_29 = arith.constant 0 : index
    %29 = vector.load %arg1[%c1, %c0_28, %c0_29] : memref<28x8x28xf32, #tpu.memory_space<vmem>>, vector<1x8x28xf32>
    %30 = vector.shape_cast %29 : vector<1x8x28xf32> to vector<8x28xf32>
    %c3 = arith.constant 3 : index
    %c0_30 = arith.constant 0 : index
    %c0_31 = arith.constant 0 : index
    %31 = vector.load %arg1[%c3, %c0_30, %c0_31] : memref<28x8x28xf32, #tpu.memory_space<vmem>>, vector<1x8x28xf32>
    %32 = vector.shape_cast %31 : vector<1x8x28xf32> to vector<8x28xf32>
    %c5 = arith.constant 5 : index
    %c0_32 = arith.constant 0 : index
    %c0_33 = arith.constant 0 : index
    %33 = vector.load %arg1[%c5, %c0_32, %c0_33] : memref<28x8x28xf32, #tpu.memory_space<vmem>>, vector<1x8x28xf32>
    %34 = vector.shape_cast %33 : vector<1x8x28xf32> to vector<8x28xf32>
    %c7 = arith.constant 7 : index
    %c0_34 = arith.constant 0 : index
    %c0_35 = arith.constant 0 : index
    %35 = vector.load %arg1[%c7, %c0_34, %c0_35] : memref<28x8x28xf32, #tpu.memory_space<vmem>>, vector<1x8x28xf32>
    %36 = vector.shape_cast %35 : vector<1x8x28xf32> to vector<8x28xf32>
    %c9 = arith.constant 9 : index
    %c0_36 = arith.constant 0 : index
    %c0_37 = arith.constant 0 : index
    %37 = vector.load %arg1[%c9, %c0_36, %c0_37] : memref<28x8x28xf32, #tpu.memory_space<vmem>>, vector<1x8x28xf32>
    %38 = vector.shape_cast %37 : vector<1x8x28xf32> to vector<8x28xf32>
    %c11 = arith.constant 11 : index
    %c0_38 = arith.constant 0 : index
    %c0_39 = arith.constant 0 : index
    %39 = vector.load %arg1[%c11, %c0_38, %c0_39] : memref<28x8x28xf32, #tpu.memory_space<vmem>>, vector<1x8x28xf32>
    %40 = vector.shape_cast %39 : vector<1x8x28xf32> to vector<8x28xf32>
    %c13 = arith.constant 13 : index
    %c0_40 = arith.constant 0 : index
    %c0_41 = arith.constant 0 : index
    %41 = vector.load %arg1[%c13, %c0_40, %c0_41] : memref<28x8x28xf32, #tpu.memory_space<vmem>>, vector<1x8x28xf32>
    %42 = vector.shape_cast %41 : vector<1x8x28xf32> to vector<8x28xf32>
    %c15 = arith.constant 15 : index
    %c0_42 = arith.constant 0 : index
    %c0_43 = arith.constant 0 : index
    %43 = vector.load %arg1[%c15, %c0_42, %c0_43] : memref<28x8x28xf32, #tpu.memory_space<vmem>>, vector<1x8x28xf32>
    %44 = vector.shape_cast %43 : vector<1x8x28xf32> to vector<8x28xf32>
    %c17 = arith.constant 17 : index
    %c0_44 = arith.constant 0 : index
    %c0_45 = arith.constant 0 : index
    %45 = vector.load %arg1[%c17, %c0_44, %c0_45] : memref<28x8x28xf32, #tpu.memory_space<vmem>>, vector<1x8x28xf32>
    %46 = vector.shape_cast %45 : vector<1x8x28xf32> to vector<8x28xf32>
    %c19 = arith.constant 19 : index
    %c0_46 = arith.constant 0 : index
    %c0_47 = arith.constant 0 : index
    %47 = vector.load %arg1[%c19, %c0_46, %c0_47] : memref<28x8x28xf32, #tpu.memory_space<vmem>>, vector<1x8x28xf32>
    %48 = vector.shape_cast %47 : vector<1x8x28xf32> to vector<8x28xf32>
    %c21 = arith.constant 21 : index
    %c0_48 = arith.constant 0 : index
    %c0_49 = arith.constant 0 : index
    %49 = vector.load %arg1[%c21, %c0_48, %c0_49] : memref<28x8x28xf32, #tpu.memory_space<vmem>>, vector<1x8x28xf32>
    %50 = vector.shape_cast %49 : vector<1x8x28xf32> to vector<8x28xf32>
    %c23 = arith.constant 23 : index
    %c0_50 = arith.constant 0 : index
    %c0_51 = arith.constant 0 : index
    %51 = vector.load %arg1[%c23, %c0_50, %c0_51] : memref<28x8x28xf32, #tpu.memory_space<vmem>>, vector<1x8x28xf32>
    %52 = vector.shape_cast %51 : vector<1x8x28xf32> to vector<8x28xf32>
    %c25 = arith.constant 25 : index
    %c0_52 = arith.constant 0 : index
    %c0_53 = arith.constant 0 : index
    %53 = vector.load %arg1[%c25, %c0_52, %c0_53] : memref<28x8x28xf32, #tpu.memory_space<vmem>>, vector<1x8x28xf32>
    %54 = vector.shape_cast %53 : vector<1x8x28xf32> to vector<8x28xf32>
    %c27 = arith.constant 27 : index
    %c0_54 = arith.constant 0 : index
    %c0_55 = arith.constant 0 : index
    %55 = vector.load %arg1[%c27, %c0_54, %c0_55] : memref<28x8x28xf32, #tpu.memory_space<vmem>>, vector<1x8x28xf32>
    %56 = vector.shape_cast %55 : vector<1x8x28xf32> to vector<8x28xf32>
    %57 = tpu.concatenate %30, %32, %34, %36, %38, %40, %42, %44, %46, %48, %50, %52, %54, %56 in 0 : vector<8x28xf32>, vector<8x28xf32>, vector<8x28xf32>, vector<8x28xf32>, vector<8x28xf32>, vector<8x28xf32>, vector<8x28xf32>, vector<8x28xf32>, vector<8x28xf32>, vector<8x28xf32>, vector<8x28xf32>, vector<8x28xf32>, vector<8x28xf32>, vector<8x28xf32> -> vector<112x28xf32>
    %58 = vector.extract_strided_slice %28 {offsets = [0, 0], sizes = [96, 28], strides = [1, 1]} : vector<112x28xf32> to vector<96x28xf32>
    %c0_56 = arith.constant 0 : index
    %c0_57 = arith.constant 0 : index
    %c0_58 = arith.constant 0 : index
    %c0_59 = arith.constant 0 : index
    %59 = vector.load %arg2[%c0_56, %c0_57, %c0_58, %c0_59] : memref<5x2x28x120xf32, #tpu.memory_space<vmem>>, vector<1x1x28x120xf32>
    %60 = vector.shape_cast %59 : vector<1x1x28x120xf32> to vector<28x120xf32>
    %cst = arith.constant dense<0.000000e+00> : vector<96x120xf32>
    %61 = tpu.matmul %58, %60, %cst {dimension_numbers = #tpu.dot_dimension_numbers<[1], [0], [0], [1], [0, 0, 1, 1], [], []>} : vector<96x28xf32>, vector<28x120xf32>, vector<96x120xf32> -> vector<96x120xf32>
    %62 = vector.extract_strided_slice %57 {offsets = [0, 0], sizes = [96, 28], strides = [1, 1]} : vector<112x28xf32> to vector<96x28xf32>
    %c1_60 = arith.constant 1 : index
    %c0_61 = arith.constant 0 : index
    %c0_62 = arith.constant 0 : index
    %c0_63 = arith.constant 0 : index
    %63 = vector.load %arg2[%c1_60, %c0_61, %c0_62, %c0_63] : memref<5x2x28x120xf32, #tpu.memory_space<vmem>>, vector<1x1x28x120xf32>
    %64 = vector.shape_cast %63 : vector<1x1x28x120xf32> to vector<28x120xf32>
    %cst_64 = arith.constant dense<0.000000e+00> : vector<96x120xf32>
    %65 = tpu.matmul %62, %64, %cst_64 {dimension_numbers = #tpu.dot_dimension_numbers<[1], [0], [0], [1], [0, 0, 1, 1], [], []>} : vector<96x28xf32>, vector<28x120xf32>, vector<96x120xf32> -> vector<96x120xf32>
    %66 = arith.addf %61, %65 : vector<96x120xf32>
    %67 = vector.extract_strided_slice %28 {offsets = [8, 0], sizes = [96, 28], strides = [1, 1]} : vector<112x28xf32> to vector<96x28xf32>
    %c2_65 = arith.constant 2 : index
    %c0_66 = arith.constant 0 : index
    %c0_67 = arith.constant 0 : index
    %c0_68 = arith.constant 0 : index
    %68 = vector.load %arg2[%c2_65, %c0_66, %c0_67, %c0_68] : memref<5x2x28x120xf32, #tpu.memory_space<vmem>>, vector<1x1x28x120xf32>
    %69 = vector.shape_cast %68 : vector<1x1x28x120xf32> to vector<28x120xf32>
    %cst_69 = arith.constant dense<0.000000e+00> : vector<96x120xf32>
    %70 = tpu.matmul %67, %69, %cst_69 {dimension_numbers = #tpu.dot_dimension_numbers<[1], [0], [0], [1], [0, 0, 1, 1], [], []>} : vector<96x28xf32>, vector<28x120xf32>, vector<96x120xf32> -> vector<96x120xf32>
    %71 = arith.addf %66, %70 : vector<96x120xf32>
    %72 = vector.extract_strided_slice %57 {offsets = [8, 0], sizes = [96, 28], strides = [1, 1]} : vector<112x28xf32> to vector<96x28xf32>
    %c3_70 = arith.constant 3 : index
    %c0_71 = arith.constant 0 : index
    %c0_72 = arith.constant 0 : index
    %c0_73 = arith.constant 0 : index
    %73 = vector.load %arg2[%c3_70, %c0_71, %c0_72, %c0_73] : memref<5x2x28x120xf32, #tpu.memory_space<vmem>>, vector<1x1x28x120xf32>
    %74 = vector.shape_cast %73 : vector<1x1x28x120xf32> to vector<28x120xf32>
    %cst_74 = arith.constant dense<0.000000e+00> : vector<96x120xf32>
    %75 = tpu.matmul %72, %74, %cst_74 {dimension_numbers = #tpu.dot_dimension_numbers<[1], [0], [0], [1], [0, 0, 1, 1], [], []>} : vector<96x28xf32>, vector<28x120xf32>, vector<96x120xf32> -> vector<96x120xf32>
    %76 = arith.addf %71, %75 : vector<96x120xf32>
    %77 = vector.extract_strided_slice %28 {offsets = [16, 0], sizes = [96, 28], strides = [1, 1]} : vector<112x28xf32> to vector<96x28xf32>
    %c4_75 = arith.constant 4 : index
    %c0_76 = arith.constant 0 : index
    %c0_77 = arith.constant 0 : index
    %c0_78 = arith.constant 0 : index
    %78 = vector.load %arg2[%c4_75, %c0_76, %c0_77, %c0_78] : memref<5x2x28x120xf32, #tpu.memory_space<vmem>>, vector<1x1x28x120xf32>
    %79 = vector.shape_cast %78 : vector<1x1x28x120xf32> to vector<28x120xf32>
    %cst_79 = arith.constant dense<0.000000e+00> : vector<96x120xf32>
    %80 = tpu.matmul %77, %79, %cst_79 {dimension_numbers = #tpu.dot_dimension_numbers<[1], [0], [0], [1], [0, 0, 1, 1], [], []>} : vector<96x28xf32>, vector<28x120xf32>, vector<96x120xf32> -> vector<96x120xf32>
    %81 = arith.addf %76, %80 : vector<96x120xf32>
    %82 = vector.extract_strided_slice %28 {offsets = [0, 0], sizes = [96, 28], strides = [1, 1]} : vector<112x28xf32> to vector<96x28xf32>
    %c0_80 = arith.constant 0 : index
    %c1_81 = arith.constant 1 : index
    %c0_82 = arith.constant 0 : index
    %c0_83 = arith.constant 0 : index
    %83 = vector.load %arg2[%c0_80, %c1_81, %c0_82, %c0_83] : memref<5x2x28x120xf32, #tpu.memory_space<vmem>>, vector<1x1x28x120xf32>
    %84 = vector.shape_cast %83 : vector<1x1x28x120xf32> to vector<28x120xf32>
    %cst_84 = arith.constant dense<0.000000e+00> : vector<96x120xf32>
    %85 = tpu.matmul %82, %84, %cst_84 {dimension_numbers = #tpu.dot_dimension_numbers<[1], [0], [0], [1], [0, 0, 1, 1], [], []>} : vector<96x28xf32>, vector<28x120xf32>, vector<96x120xf32> -> vector<96x120xf32>
    %86 = vector.extract_strided_slice %57 {offsets = [0, 0], sizes = [96, 28], strides = [1, 1]} : vector<112x28xf32> to vector<96x28xf32>
    %c1_85 = arith.constant 1 : index
    %c1_86 = arith.constant 1 : index
    %c0_87 = arith.constant 0 : index
    %c0_88 = arith.constant 0 : index
    %87 = vector.load %arg2[%c1_85, %c1_86, %c0_87, %c0_88] : memref<5x2x28x120xf32, #tpu.memory_space<vmem>>, vector<1x1x28x120xf32>
    %88 = vector.shape_cast %87 : vector<1x1x28x120xf32> to vector<28x120xf32>
    %cst_89 = arith.constant dense<0.000000e+00> : vector<96x120xf32>
    %89 = tpu.matmul %86, %88, %cst_89 {dimension_numbers = #tpu.dot_dimension_numbers<[1], [0], [0], [1], [0, 0, 1, 1], [], []>} : vector<96x28xf32>, vector<28x120xf32>, vector<96x120xf32> -> vector<96x120xf32>
    %90 = arith.addf %85, %89 : vector<96x120xf32>
    %91 = vector.extract_strided_slice %28 {offsets = [8, 0], sizes = [96, 28], strides = [1, 1]} : vector<112x28xf32> to vector<96x28xf32>
    %c2_90 = arith.constant 2 : index
    %c1_91 = arith.constant 1 : index
    %c0_92 = arith.constant 0 : index
    %c0_93 = arith.constant 0 : index
    %92 = vector.load %arg2[%c2_90, %c1_91, %c0_92, %c0_93] : memref<5x2x28x120xf32, #tpu.memory_space<vmem>>, vector<1x1x28x120xf32>
    %93 = vector.shape_cast %92 : vector<1x1x28x120xf32> to vector<28x120xf32>
    %cst_94 = arith.constant dense<0.000000e+00> : vector<96x120xf32>
    %94 = tpu.matmul %91, %93, %cst_94 {dimension_numbers = #tpu.dot_dimension_numbers<[1], [0], [0], [1], [0, 0, 1, 1], [], []>} : vector<96x28xf32>, vector<28x120xf32>, vector<96x120xf32> -> vector<96x120xf32>
    %95 = arith.addf %90, %94 : vector<96x120xf32>
    %96 = vector.extract_strided_slice %57 {offsets = [8, 0], sizes = [96, 28], strides = [1, 1]} : vector<112x28xf32> to vector<96x28xf32>
    %c3_95 = arith.constant 3 : index
    %c1_96 = arith.constant 1 : index
    %c0_97 = arith.constant 0 : index
    %c0_98 = arith.constant 0 : index
    %97 = vector.load %arg2[%c3_95, %c1_96, %c0_97, %c0_98] : memref<5x2x28x120xf32, #tpu.memory_space<vmem>>, vector<1x1x28x120xf32>
    %98 = vector.shape_cast %97 : vector<1x1x28x120xf32> to vector<28x120xf32>
    %cst_99 = arith.constant dense<0.000000e+00> : vector<96x120xf32>
    %99 = tpu.matmul %96, %98, %cst_99 {dimension_numbers = #tpu.dot_dimension_numbers<[1], [0], [0], [1], [0, 0, 1, 1], [], []>} : vector<96x28xf32>, vector<28x120xf32>, vector<96x120xf32> -> vector<96x120xf32>
    %100 = arith.addf %95, %99 : vector<96x120xf32>
    %101 = vector.extract_strided_slice %28 {offsets = [16, 0], sizes = [96, 28], strides = [1, 1]} : vector<112x28xf32> to vector<96x28xf32>
    %c4_100 = arith.constant 4 : index
    %c1_101 = arith.constant 1 : index
    %c0_102 = arith.constant 0 : index
    %c0_103 = arith.constant 0 : index
    %102 = vector.load %arg2[%c4_100, %c1_101, %c0_102, %c0_103] : memref<5x2x28x120xf32, #tpu.memory_space<vmem>>, vector<1x1x28x120xf32>
    %103 = vector.shape_cast %102 : vector<1x1x28x120xf32> to vector<28x120xf32>
    %cst_104 = arith.constant dense<0.000000e+00> : vector<96x120xf32>
    %104 = tpu.matmul %101, %103, %cst_104 {dimension_numbers = #tpu.dot_dimension_numbers<[1], [0], [0], [1], [0, 0, 1, 1], [], []>} : vector<96x28xf32>, vector<28x120xf32>, vector<96x120xf32> -> vector<96x120xf32>
    %105 = arith.addf %100, %104 : vector<96x120xf32>
    %106 = vector.extract_strided_slice %57 {offsets = [0, 0], sizes = [96, 28], strides = [1, 1]} : vector<112x28xf32> to vector<96x28xf32>
    %c0_105 = arith.constant 0 : index
    %c0_106 = arith.constant 0 : index
    %c0_107 = arith.constant 0 : index
    %c0_108 = arith.constant 0 : index
    %107 = vector.load %arg2[%c0_105, %c0_106, %c0_107, %c0_108] : memref<5x2x28x120xf32, #tpu.memory_space<vmem>>, vector<1x1x28x120xf32>
    %108 = vector.shape_cast %107 : vector<1x1x28x120xf32> to vector<28x120xf32>
    %cst_109 = arith.constant dense<0.000000e+00> : vector<96x120xf32>
    %109 = tpu.matmul %106, %108, %cst_109 {dimension_numbers = #tpu.dot_dimension_numbers<[1], [0], [0], [1], [0, 0, 1, 1], [], []>} : vector<96x28xf32>, vector<28x120xf32>, vector<96x120xf32> -> vector<96x120xf32>
    %110 = vector.extract_strided_slice %28 {offsets = [8, 0], sizes = [96, 28], strides = [1, 1]} : vector<112x28xf32> to vector<96x28xf32>
    %c1_110 = arith.constant 1 : index
    %c0_111 = arith.constant 0 : index
    %c0_112 = arith.constant 0 : index
    %c0_113 = arith.constant 0 : index
    %111 = vector.load %arg2[%c1_110, %c0_111, %c0_112, %c0_113] : memref<5x2x28x120xf32, #tpu.memory_space<vmem>>, vector<1x1x28x120xf32>
    %112 = vector.shape_cast %111 : vector<1x1x28x120xf32> to vector<28x120xf32>
    %cst_114 = arith.constant dense<0.000000e+00> : vector<96x120xf32>
    %113 = tpu.matmul %110, %112, %cst_114 {dimension_numbers = #tpu.dot_dimension_numbers<[1], [0], [0], [1], [0, 0, 1, 1], [], []>} : vector<96x28xf32>, vector<28x120xf32>, vector<96x120xf32> -> vector<96x120xf32>
    %114 = arith.addf %109, %113 : vector<96x120xf32>
    %115 = vector.extract_strided_slice %57 {offsets = [8, 0], sizes = [96, 28], strides = [1, 1]} : vector<112x28xf32> to vector<96x28xf32>
    %c2_115 = arith.constant 2 : index
    %c0_116 = arith.constant 0 : index
    %c0_117 = arith.constant 0 : index
    %c0_118 = arith.constant 0 : index
    %116 = vector.load %arg2[%c2_115, %c0_116, %c0_117, %c0_118] : memref<5x2x28x120xf32, #tpu.memory_space<vmem>>, vector<1x1x28x120xf32>
    %117 = vector.shape_cast %116 : vector<1x1x28x120xf32> to vector<28x120xf32>
    %cst_119 = arith.constant dense<0.000000e+00> : vector<96x120xf32>
    %118 = tpu.matmul %115, %117, %cst_119 {dimension_numbers = #tpu.dot_dimension_numbers<[1], [0], [0], [1], [0, 0, 1, 1], [], []>} : vector<96x28xf32>, vector<28x120xf32>, vector<96x120xf32> -> vector<96x120xf32>
    %119 = arith.addf %114, %118 : vector<96x120xf32>
    %120 = vector.extract_strided_slice %28 {offsets = [16, 0], sizes = [96, 28], strides = [1, 1]} : vector<112x28xf32> to vector<96x28xf32>
    %c3_120 = arith.constant 3 : index
    %c0_121 = arith.constant 0 : index
    %c0_122 = arith.constant 0 : index
    %c0_123 = arith.constant 0 : index
    %121 = vector.load %arg2[%c3_120, %c0_121, %c0_122, %c0_123] : memref<5x2x28x120xf32, #tpu.memory_space<vmem>>, vector<1x1x28x120xf32>
    %122 = vector.shape_cast %121 : vector<1x1x28x120xf32> to vector<28x120xf32>
    %cst_124 = arith.constant dense<0.000000e+00> : vector<96x120xf32>
    %123 = tpu.matmul %120, %122, %cst_124 {dimension_numbers = #tpu.dot_dimension_numbers<[1], [0], [0], [1], [0, 0, 1, 1], [], []>} : vector<96x28xf32>, vector<28x120xf32>, vector<96x120xf32> -> vector<96x120xf32>
    %124 = arith.addf %119, %123 : vector<96x120xf32>
    %125 = vector.extract_strided_slice %57 {offsets = [16, 0], sizes = [96, 28], strides = [1, 1]} : vector<112x28xf32> to vector<96x28xf32>
    %c4_125 = arith.constant 4 : index
    %c0_126 = arith.constant 0 : index
    %c0_127 = arith.constant 0 : index
    %c0_128 = arith.constant 0 : index
    %126 = vector.load %arg2[%c4_125, %c0_126, %c0_127, %c0_128] : memref<5x2x28x120xf32, #tpu.memory_space<vmem>>, vector<1x1x28x120xf32>
    %127 = vector.shape_cast %126 : vector<1x1x28x120xf32> to vector<28x120xf32>
    %cst_129 = arith.constant dense<0.000000e+00> : vector<96x120xf32>
    %128 = tpu.matmul %125, %127, %cst_129 {dimension_numbers = #tpu.dot_dimension_numbers<[1], [0], [0], [1], [0, 0, 1, 1], [], []>} : vector<96x28xf32>, vector<28x120xf32>, vector<96x120xf32> -> vector<96x120xf32>
    %129 = arith.addf %124, %128 : vector<96x120xf32>
    %130 = vector.extract_strided_slice %57 {offsets = [0, 0], sizes = [96, 28], strides = [1, 1]} : vector<112x28xf32> to vector<96x28xf32>
    %c0_130 = arith.constant 0 : index
    %c1_131 = arith.constant 1 : index
    %c0_132 = arith.constant 0 : index
    %c0_133 = arith.constant 0 : index
    %131 = vector.load %arg2[%c0_130, %c1_131, %c0_132, %c0_133] : memref<5x2x28x120xf32, #tpu.memory_space<vmem>>, vector<1x1x28x120xf32>
    %132 = vector.shape_cast %131 : vector<1x1x28x120xf32> to vector<28x120xf32>
    %cst_134 = arith.constant dense<0.000000e+00> : vector<96x120xf32>
    %133 = tpu.matmul %130, %132, %cst_134 {dimension_numbers = #tpu.dot_dimension_numbers<[1], [0], [0], [1], [0, 0, 1, 1], [], []>} : vector<96x28xf32>, vector<28x120xf32>, vector<96x120xf32> -> vector<96x120xf32>
    %134 = vector.extract_strided_slice %28 {offsets = [8, 0], sizes = [96, 28], strides = [1, 1]} : vector<112x28xf32> to vector<96x28xf32>
    %c1_135 = arith.constant 1 : index
    %c1_136 = arith.constant 1 : index
    %c0_137 = arith.constant 0 : index
    %c0_138 = arith.constant 0 : index
    %135 = vector.load %arg2[%c1_135, %c1_136, %c0_137, %c0_138] : memref<5x2x28x120xf32, #tpu.memory_space<vmem>>, vector<1x1x28x120xf32>
    %136 = vector.shape_cast %135 : vector<1x1x28x120xf32> to vector<28x120xf32>
    %cst_139 = arith.constant dense<0.000000e+00> : vector<96x120xf32>
    %137 = tpu.matmul %134, %136, %cst_139 {dimension_numbers = #tpu.dot_dimension_numbers<[1], [0], [0], [1], [0, 0, 1, 1], [], []>} : vector<96x28xf32>, vector<28x120xf32>, vector<96x120xf32> -> vector<96x120xf32>
    %138 = arith.addf %133, %137 : vector<96x120xf32>
    %139 = vector.extract_strided_slice %57 {offsets = [8, 0], sizes = [96, 28], strides = [1, 1]} : vector<112x28xf32> to vector<96x28xf32>
    %c2_140 = arith.constant 2 : index
    %c1_141 = arith.constant 1 : index
    %c0_142 = arith.constant 0 : index
    %c0_143 = arith.constant 0 : index
    %140 = vector.load %arg2[%c2_140, %c1_141, %c0_142, %c0_143] : memref<5x2x28x120xf32, #tpu.memory_space<vmem>>, vector<1x1x28x120xf32>
    %141 = vector.shape_cast %140 : vector<1x1x28x120xf32> to vector<28x120xf32>
    %cst_144 = arith.constant dense<0.000000e+00> : vector<96x120xf32>
    %142 = tpu.matmul %139, %141, %cst_144 {dimension_numbers = #tpu.dot_dimension_numbers<[1], [0], [0], [1], [0, 0, 1, 1], [], []>} : vector<96x28xf32>, vector<28x120xf32>, vector<96x120xf32> -> vector<96x120xf32>
    %143 = arith.addf %138, %142 : vector<96x120xf32>
    %144 = vector.extract_strided_slice %28 {offsets = [16, 0], sizes = [96, 28], strides = [1, 1]} : vector<112x28xf32> to vector<96x28xf32>
    %c3_145 = arith.constant 3 : index
    %c1_146 = arith.constant 1 : index
    %c0_147 = arith.constant 0 : index
    %c0_148 = arith.constant 0 : index
    %145 = vector.load %arg2[%c3_145, %c1_146, %c0_147, %c0_148] : memref<5x2x28x120xf32, #tpu.memory_space<vmem>>, vector<1x1x28x120xf32>
    %146 = vector.shape_cast %145 : vector<1x1x28x120xf32> to vector<28x120xf32>
    %cst_149 = arith.constant dense<0.000000e+00> : vector<96x120xf32>
    %147 = tpu.matmul %144, %146, %cst_149 {dimension_numbers = #tpu.dot_dimension_numbers<[1], [0], [0], [1], [0, 0, 1, 1], [], []>} : vector<96x28xf32>, vector<28x120xf32>, vector<96x120xf32> -> vector<96x120xf32>
    %148 = arith.addf %143, %147 : vector<96x120xf32>
    %149 = vector.extract_strided_slice %57 {offsets = [16, 0], sizes = [96, 28], strides = [1, 1]} : vector<112x28xf32> to vector<96x28xf32>
    %c4_150 = arith.constant 4 : index
    %c1_151 = arith.constant 1 : index
    %c0_152 = arith.constant 0 : index
    %c0_153 = arith.constant 0 : index
    %150 = vector.load %arg2[%c4_150, %c1_151, %c0_152, %c0_153] : memref<5x2x28x120xf32, #tpu.memory_space<vmem>>, vector<1x1x28x120xf32>
    %151 = vector.shape_cast %150 : vector<1x1x28x120xf32> to vector<28x120xf32>
    %cst_154 = arith.constant dense<0.000000e+00> : vector<96x120xf32>
    %152 = tpu.matmul %149, %151, %cst_154 {dimension_numbers = #tpu.dot_dimension_numbers<[1], [0], [0], [1], [0, 0, 1, 1], [], []>} : vector<96x28xf32>, vector<28x120xf32>, vector<96x120xf32> -> vector<96x120xf32>
    %153 = arith.addf %148, %152 : vector<96x120xf32>
    %154 = arith.maximumf %81, %105 : vector<96x120xf32>
    %155 = arith.maximumf %129, %153 : vector<96x120xf32>
    %156 = arith.maximumf %154, %155 : vector<96x120xf32>
    %c0_155 = arith.constant 0 : index
    %c0_156 = arith.constant 0 : index
    %157 = vector.load %arg3[%c0_155, %c0_156] : memref<1x120xf32, #tpu.memory_space<vmem>>, vector<1x120xf32>
    %158 = vector.broadcast %157 : vector<1x120xf32> to vector<96x120xf32>
    %159 = arith.addf %156, %158 : vector<96x120xf32>
    %cst_157 = arith.constant 0.000000e+00 : f32
    %160 = vector.broadcast %cst_157 : f32 to vector<96x120xf32>
    %161 = arith.maximumf %159, %160 : vector<96x120xf32>
    %162 = vector.extract_strided_slice %161 {offsets = [0, 0], sizes = [8, 120], strides = [1, 1]} : vector<96x120xf32> to vector<8x120xf32>
    %163 = vector.extract_strided_slice %161 {offsets = [16, 0], sizes = [8, 120], strides = [1, 1]} : vector<96x120xf32> to vector<8x120xf32>
    %164 = vector.extract_strided_slice %161 {offsets = [32, 0], sizes = [8, 120], strides = [1, 1]} : vector<96x120xf32> to vector<8x120xf32>
    %165 = vector.extract_strided_slice %161 {offsets = [48, 0], sizes = [8, 120], strides = [1, 1]} : vector<96x120xf32> to vector<8x120xf32>
    %166 = vector.extract_strided_slice %161 {offsets = [64, 0], sizes = [8, 120], strides = [1, 1]} : vector<96x120xf32> to vector<8x120xf32>
    %167 = vector.extract_strided_slice %161 {offsets = [80, 0], sizes = [8, 120], strides = [1, 1]} : vector<96x120xf32> to vector<8x120xf32>
    %168 = tpu.concatenate %162, %163, %164, %165, %166, %167 in 0 : vector<8x120xf32>, vector<8x120xf32>, vector<8x120xf32>, vector<8x120xf32>, vector<8x120xf32>, vector<8x120xf32> -> vector<48x120xf32>
    %169 = vector.extract_strided_slice %161 {offsets = [8, 0], sizes = [8, 120], strides = [1, 1]} : vector<96x120xf32> to vector<8x120xf32>
    %170 = vector.extract_strided_slice %161 {offsets = [24, 0], sizes = [8, 120], strides = [1, 1]} : vector<96x120xf32> to vector<8x120xf32>
    %171 = vector.extract_strided_slice %161 {offsets = [40, 0], sizes = [8, 120], strides = [1, 1]} : vector<96x120xf32> to vector<8x120xf32>
    %172 = vector.extract_strided_slice %161 {offsets = [56, 0], sizes = [8, 120], strides = [1, 1]} : vector<96x120xf32> to vector<8x120xf32>
    %173 = vector.extract_strided_slice %161 {offsets = [72, 0], sizes = [8, 120], strides = [1, 1]} : vector<96x120xf32> to vector<8x120xf32>
    %174 = vector.extract_strided_slice %161 {offsets = [88, 0], sizes = [8, 120], strides = [1, 1]} : vector<96x120xf32> to vector<8x120xf32>
    %175 = tpu.concatenate %169, %170, %171, %172, %173, %174 in 0 : vector<8x120xf32>, vector<8x120xf32>, vector<8x120xf32>, vector<8x120xf32>, vector<8x120xf32>, vector<8x120xf32> -> vector<48x120xf32>
    %176 = vector.extract_strided_slice %168 {offsets = [0, 0], sizes = [32, 120], strides = [1, 1]} : vector<48x120xf32> to vector<32x120xf32>
    %c0_158 = arith.constant 0 : index
    %c0_159 = arith.constant 0 : index
    %c0_160 = arith.constant 0 : index
    %c0_161 = arith.constant 0 : index
    %177 = vector.load %arg4[%c0_158, %c0_159, %c0_160, %c0_161] : memref<5x2x120x80xf32, #tpu.memory_space<vmem>>, vector<1x1x120x80xf32>
    %178 = vector.shape_cast %177 : vector<1x1x120x80xf32> to vector<120x80xf32>
    %cst_162 = arith.constant dense<0.000000e+00> : vector<32x80xf32>
    %179 = tpu.matmul %176, %178, %cst_162 {dimension_numbers = #tpu.dot_dimension_numbers<[1], [0], [0], [1], [0, 0, 1, 1], [], []>} : vector<32x120xf32>, vector<120x80xf32>, vector<32x80xf32> -> vector<32x80xf32>
    %180 = vector.extract_strided_slice %175 {offsets = [0, 0], sizes = [32, 120], strides = [1, 1]} : vector<48x120xf32> to vector<32x120xf32>
    %c1_163 = arith.constant 1 : index
    %c0_164 = arith.constant 0 : index
    %c0_165 = arith.constant 0 : index
    %c0_166 = arith.constant 0 : index
    %181 = vector.load %arg4[%c1_163, %c0_164, %c0_165, %c0_166] : memref<5x2x120x80xf32, #tpu.memory_space<vmem>>, vector<1x1x120x80xf32>
    %182 = vector.shape_cast %181 : vector<1x1x120x80xf32> to vector<120x80xf32>
    %cst_167 = arith.constant dense<0.000000e+00> : vector<32x80xf32>
    %183 = tpu.matmul %180, %182, %cst_167 {dimension_numbers = #tpu.dot_dimension_numbers<[1], [0], [0], [1], [0, 0, 1, 1], [], []>} : vector<32x120xf32>, vector<120x80xf32>, vector<32x80xf32> -> vector<32x80xf32>
    %184 = arith.addf %179, %183 : vector<32x80xf32>
    %185 = vector.extract_strided_slice %168 {offsets = [8, 0], sizes = [32, 120], strides = [1, 1]} : vector<48x120xf32> to vector<32x120xf32>
    %c2_168 = arith.constant 2 : index
    %c0_169 = arith.constant 0 : index
    %c0_170 = arith.constant 0 : index
    %c0_171 = arith.constant 0 : index
    %186 = vector.load %arg4[%c2_168, %c0_169, %c0_170, %c0_171] : memref<5x2x120x80xf32, #tpu.memory_space<vmem>>, vector<1x1x120x80xf32>
    %187 = vector.shape_cast %186 : vector<1x1x120x80xf32> to vector<120x80xf32>
    %cst_172 = arith.constant dense<0.000000e+00> : vector<32x80xf32>
    %188 = tpu.matmul %185, %187, %cst_172 {dimension_numbers = #tpu.dot_dimension_numbers<[1], [0], [0], [1], [0, 0, 1, 1], [], []>} : vector<32x120xf32>, vector<120x80xf32>, vector<32x80xf32> -> vector<32x80xf32>
    %189 = arith.addf %184, %188 : vector<32x80xf32>
    %190 = vector.extract_strided_slice %175 {offsets = [8, 0], sizes = [32, 120], strides = [1, 1]} : vector<48x120xf32> to vector<32x120xf32>
    %c3_173 = arith.constant 3 : index
    %c0_174 = arith.constant 0 : index
    %c0_175 = arith.constant 0 : index
    %c0_176 = arith.constant 0 : index
    %191 = vector.load %arg4[%c3_173, %c0_174, %c0_175, %c0_176] : memref<5x2x120x80xf32, #tpu.memory_space<vmem>>, vector<1x1x120x80xf32>
    %192 = vector.shape_cast %191 : vector<1x1x120x80xf32> to vector<120x80xf32>
    %cst_177 = arith.constant dense<0.000000e+00> : vector<32x80xf32>
    %193 = tpu.matmul %190, %192, %cst_177 {dimension_numbers = #tpu.dot_dimension_numbers<[1], [0], [0], [1], [0, 0, 1, 1], [], []>} : vector<32x120xf32>, vector<120x80xf32>, vector<32x80xf32> -> vector<32x80xf32>
    %194 = arith.addf %189, %193 : vector<32x80xf32>
    %195 = vector.extract_strided_slice %168 {offsets = [16, 0], sizes = [32, 120], strides = [1, 1]} : vector<48x120xf32> to vector<32x120xf32>
    %c4_178 = arith.constant 4 : index
    %c0_179 = arith.constant 0 : index
    %c0_180 = arith.constant 0 : index
    %c0_181 = arith.constant 0 : index
    %196 = vector.load %arg4[%c4_178, %c0_179, %c0_180, %c0_181] : memref<5x2x120x80xf32, #tpu.memory_space<vmem>>, vector<1x1x120x80xf32>
    %197 = vector.shape_cast %196 : vector<1x1x120x80xf32> to vector<120x80xf32>
    %cst_182 = arith.constant dense<0.000000e+00> : vector<32x80xf32>
    %198 = tpu.matmul %195, %197, %cst_182 {dimension_numbers = #tpu.dot_dimension_numbers<[1], [0], [0], [1], [0, 0, 1, 1], [], []>} : vector<32x120xf32>, vector<120x80xf32>, vector<32x80xf32> -> vector<32x80xf32>
    %199 = arith.addf %194, %198 : vector<32x80xf32>
    %200 = vector.extract_strided_slice %168 {offsets = [0, 0], sizes = [32, 120], strides = [1, 1]} : vector<48x120xf32> to vector<32x120xf32>
    %c0_183 = arith.constant 0 : index
    %c1_184 = arith.constant 1 : index
    %c0_185 = arith.constant 0 : index
    %c0_186 = arith.constant 0 : index
    %201 = vector.load %arg4[%c0_183, %c1_184, %c0_185, %c0_186] : memref<5x2x120x80xf32, #tpu.memory_space<vmem>>, vector<1x1x120x80xf32>
    %202 = vector.shape_cast %201 : vector<1x1x120x80xf32> to vector<120x80xf32>
    %cst_187 = arith.constant dense<0.000000e+00> : vector<32x80xf32>
    %203 = tpu.matmul %200, %202, %cst_187 {dimension_numbers = #tpu.dot_dimension_numbers<[1], [0], [0], [1], [0, 0, 1, 1], [], []>} : vector<32x120xf32>, vector<120x80xf32>, vector<32x80xf32> -> vector<32x80xf32>
    %204 = vector.extract_strided_slice %175 {offsets = [0, 0], sizes = [32, 120], strides = [1, 1]} : vector<48x120xf32> to vector<32x120xf32>
    %c1_188 = arith.constant 1 : index
    %c1_189 = arith.constant 1 : index
    %c0_190 = arith.constant 0 : index
    %c0_191 = arith.constant 0 : index
    %205 = vector.load %arg4[%c1_188, %c1_189, %c0_190, %c0_191] : memref<5x2x120x80xf32, #tpu.memory_space<vmem>>, vector<1x1x120x80xf32>
    %206 = vector.shape_cast %205 : vector<1x1x120x80xf32> to vector<120x80xf32>
    %cst_192 = arith.constant dense<0.000000e+00> : vector<32x80xf32>
    %207 = tpu.matmul %204, %206, %cst_192 {dimension_numbers = #tpu.dot_dimension_numbers<[1], [0], [0], [1], [0, 0, 1, 1], [], []>} : vector<32x120xf32>, vector<120x80xf32>, vector<32x80xf32> -> vector<32x80xf32>
    %208 = arith.addf %203, %207 : vector<32x80xf32>
    %209 = vector.extract_strided_slice %168 {offsets = [8, 0], sizes = [32, 120], strides = [1, 1]} : vector<48x120xf32> to vector<32x120xf32>
    %c2_193 = arith.constant 2 : index
    %c1_194 = arith.constant 1 : index
    %c0_195 = arith.constant 0 : index
    %c0_196 = arith.constant 0 : index
    %210 = vector.load %arg4[%c2_193, %c1_194, %c0_195, %c0_196] : memref<5x2x120x80xf32, #tpu.memory_space<vmem>>, vector<1x1x120x80xf32>
    %211 = vector.shape_cast %210 : vector<1x1x120x80xf32> to vector<120x80xf32>
    %cst_197 = arith.constant dense<0.000000e+00> : vector<32x80xf32>
    %212 = tpu.matmul %209, %211, %cst_197 {dimension_numbers = #tpu.dot_dimension_numbers<[1], [0], [0], [1], [0, 0, 1, 1], [], []>} : vector<32x120xf32>, vector<120x80xf32>, vector<32x80xf32> -> vector<32x80xf32>
    %213 = arith.addf %208, %212 : vector<32x80xf32>
    %214 = vector.extract_strided_slice %175 {offsets = [8, 0], sizes = [32, 120], strides = [1, 1]} : vector<48x120xf32> to vector<32x120xf32>
    %c3_198 = arith.constant 3 : index
    %c1_199 = arith.constant 1 : index
    %c0_200 = arith.constant 0 : index
    %c0_201 = arith.constant 0 : index
    %215 = vector.load %arg4[%c3_198, %c1_199, %c0_200, %c0_201] : memref<5x2x120x80xf32, #tpu.memory_space<vmem>>, vector<1x1x120x80xf32>
    %216 = vector.shape_cast %215 : vector<1x1x120x80xf32> to vector<120x80xf32>
    %cst_202 = arith.constant dense<0.000000e+00> : vector<32x80xf32>
    %217 = tpu.matmul %214, %216, %cst_202 {dimension_numbers = #tpu.dot_dimension_numbers<[1], [0], [0], [1], [0, 0, 1, 1], [], []>} : vector<32x120xf32>, vector<120x80xf32>, vector<32x80xf32> -> vector<32x80xf32>
    %218 = arith.addf %213, %217 : vector<32x80xf32>
    %219 = vector.extract_strided_slice %168 {offsets = [16, 0], sizes = [32, 120], strides = [1, 1]} : vector<48x120xf32> to vector<32x120xf32>
    %c4_203 = arith.constant 4 : index
    %c1_204 = arith.constant 1 : index
    %c0_205 = arith.constant 0 : index
    %c0_206 = arith.constant 0 : index
    %220 = vector.load %arg4[%c4_203, %c1_204, %c0_205, %c0_206] : memref<5x2x120x80xf32, #tpu.memory_space<vmem>>, vector<1x1x120x80xf32>
    %221 = vector.shape_cast %220 : vector<1x1x120x80xf32> to vector<120x80xf32>
    %cst_207 = arith.constant dense<0.000000e+00> : vector<32x80xf32>
    %222 = tpu.matmul %219, %221, %cst_207 {dimension_numbers = #tpu.dot_dimension_numbers<[1], [0], [0], [1], [0, 0, 1, 1], [], []>} : vector<32x120xf32>, vector<120x80xf32>, vector<32x80xf32> -> vector<32x80xf32>
    %223 = arith.addf %218, %222 : vector<32x80xf32>
    %224 = vector.extract_strided_slice %175 {offsets = [0, 0], sizes = [32, 120], strides = [1, 1]} : vector<48x120xf32> to vector<32x120xf32>
    %c0_208 = arith.constant 0 : index
    %c0_209 = arith.constant 0 : index
    %c0_210 = arith.constant 0 : index
    %c0_211 = arith.constant 0 : index
    %225 = vector.load %arg4[%c0_208, %c0_209, %c0_210, %c0_211] : memref<5x2x120x80xf32, #tpu.memory_space<vmem>>, vector<1x1x120x80xf32>
    %226 = vector.shape_cast %225 : vector<1x1x120x80xf32> to vector<120x80xf32>
    %cst_212 = arith.constant dense<0.000000e+00> : vector<32x80xf32>
    %227 = tpu.matmul %224, %226, %cst_212 {dimension_numbers = #tpu.dot_dimension_numbers<[1], [0], [0], [1], [0, 0, 1, 1], [], []>} : vector<32x120xf32>, vector<120x80xf32>, vector<32x80xf32> -> vector<32x80xf32>
    %228 = vector.extract_strided_slice %168 {offsets = [8, 0], sizes = [32, 120], strides = [1, 1]} : vector<48x120xf32> to vector<32x120xf32>
    %c1_213 = arith.constant 1 : index
    %c0_214 = arith.constant 0 : index
    %c0_215 = arith.constant 0 : index
    %c0_216 = arith.constant 0 : index
    %229 = vector.load %arg4[%c1_213, %c0_214, %c0_215, %c0_216] : memref<5x2x120x80xf32, #tpu.memory_space<vmem>>, vector<1x1x120x80xf32>
    %230 = vector.shape_cast %229 : vector<1x1x120x80xf32> to vector<120x80xf32>
    %cst_217 = arith.constant dense<0.000000e+00> : vector<32x80xf32>
    %231 = tpu.matmul %228, %230, %cst_217 {dimension_numbers = #tpu.dot_dimension_numbers<[1], [0], [0], [1], [0, 0, 1, 1], [], []>} : vector<32x120xf32>, vector<120x80xf32>, vector<32x80xf32> -> vector<32x80xf32>
    %232 = arith.addf %227, %231 : vector<32x80xf32>
    %233 = vector.extract_strided_slice %175 {offsets = [8, 0], sizes = [32, 120], strides = [1, 1]} : vector<48x120xf32> to vector<32x120xf32>
    %c2_218 = arith.constant 2 : index
    %c0_219 = arith.constant 0 : index
    %c0_220 = arith.constant 0 : index
    %c0_221 = arith.constant 0 : index
    %234 = vector.load %arg4[%c2_218, %c0_219, %c0_220, %c0_221] : memref<5x2x120x80xf32, #tpu.memory_space<vmem>>, vector<1x1x120x80xf32>
    %235 = vector.shape_cast %234 : vector<1x1x120x80xf32> to vector<120x80xf32>
    %cst_222 = arith.constant dense<0.000000e+00> : vector<32x80xf32>
    %236 = tpu.matmul %233, %235, %cst_222 {dimension_numbers = #tpu.dot_dimension_numbers<[1], [0], [0], [1], [0, 0, 1, 1], [], []>} : vector<32x120xf32>, vector<120x80xf32>, vector<32x80xf32> -> vector<32x80xf32>
    %237 = arith.addf %232, %236 : vector<32x80xf32>
    %238 = vector.extract_strided_slice %168 {offsets = [16, 0], sizes = [32, 120], strides = [1, 1]} : vector<48x120xf32> to vector<32x120xf32>
    %c3_223 = arith.constant 3 : index
    %c0_224 = arith.constant 0 : index
    %c0_225 = arith.constant 0 : index
    %c0_226 = arith.constant 0 : index
    %239 = vector.load %arg4[%c3_223, %c0_224, %c0_225, %c0_226] : memref<5x2x120x80xf32, #tpu.memory_space<vmem>>, vector<1x1x120x80xf32>
    %240 = vector.shape_cast %239 : vector<1x1x120x80xf32> to vector<120x80xf32>
    %cst_227 = arith.constant dense<0.000000e+00> : vector<32x80xf32>
    %241 = tpu.matmul %238, %240, %cst_227 {dimension_numbers = #tpu.dot_dimension_numbers<[1], [0], [0], [1], [0, 0, 1, 1], [], []>} : vector<32x120xf32>, vector<120x80xf32>, vector<32x80xf32> -> vector<32x80xf32>
    %242 = arith.addf %237, %241 : vector<32x80xf32>
    %243 = vector.extract_strided_slice %175 {offsets = [16, 0], sizes = [32, 120], strides = [1, 1]} : vector<48x120xf32> to vector<32x120xf32>
    %c4_228 = arith.constant 4 : index
    %c0_229 = arith.constant 0 : index
    %c0_230 = arith.constant 0 : index
    %c0_231 = arith.constant 0 : index
    %244 = vector.load %arg4[%c4_228, %c0_229, %c0_230, %c0_231] : memref<5x2x120x80xf32, #tpu.memory_space<vmem>>, vector<1x1x120x80xf32>
    %245 = vector.shape_cast %244 : vector<1x1x120x80xf32> to vector<120x80xf32>
    %cst_232 = arith.constant dense<0.000000e+00> : vector<32x80xf32>
    %246 = tpu.matmul %243, %245, %cst_232 {dimension_numbers = #tpu.dot_dimension_numbers<[1], [0], [0], [1], [0, 0, 1, 1], [], []>} : vector<32x120xf32>, vector<120x80xf32>, vector<32x80xf32> -> vector<32x80xf32>
    %247 = arith.addf %242, %246 : vector<32x80xf32>
    %248 = vector.extract_strided_slice %175 {offsets = [0, 0], sizes = [32, 120], strides = [1, 1]} : vector<48x120xf32> to vector<32x120xf32>
    %c0_233 = arith.constant 0 : index
    %c1_234 = arith.constant 1 : index
    %c0_235 = arith.constant 0 : index
    %c0_236 = arith.constant 0 : index
    %249 = vector.load %arg4[%c0_233, %c1_234, %c0_235, %c0_236] : memref<5x2x120x80xf32, #tpu.memory_space<vmem>>, vector<1x1x120x80xf32>
    %250 = vector.shape_cast %249 : vector<1x1x120x80xf32> to vector<120x80xf32>
    %cst_237 = arith.constant dense<0.000000e+00> : vector<32x80xf32>
    %251 = tpu.matmul %248, %250, %cst_237 {dimension_numbers = #tpu.dot_dimension_numbers<[1], [0], [0], [1], [0, 0, 1, 1], [], []>} : vector<32x120xf32>, vector<120x80xf32>, vector<32x80xf32> -> vector<32x80xf32>
    %252 = vector.extract_strided_slice %168 {offsets = [8, 0], sizes = [32, 120], strides = [1, 1]} : vector<48x120xf32> to vector<32x120xf32>
    %c1_238 = arith.constant 1 : index
    %c1_239 = arith.constant 1 : index
    %c0_240 = arith.constant 0 : index
    %c0_241 = arith.constant 0 : index
    %253 = vector.load %arg4[%c1_238, %c1_239, %c0_240, %c0_241] : memref<5x2x120x80xf32, #tpu.memory_space<vmem>>, vector<1x1x120x80xf32>
    %254 = vector.shape_cast %253 : vector<1x1x120x80xf32> to vector<120x80xf32>
    %cst_242 = arith.constant dense<0.000000e+00> : vector<32x80xf32>
    %255 = tpu.matmul %252, %254, %cst_242 {dimension_numbers = #tpu.dot_dimension_numbers<[1], [0], [0], [1], [0, 0, 1, 1], [], []>} : vector<32x120xf32>, vector<120x80xf32>, vector<32x80xf32> -> vector<32x80xf32>
    %256 = arith.addf %251, %255 : vector<32x80xf32>
    %257 = vector.extract_strided_slice %175 {offsets = [8, 0], sizes = [32, 120], strides = [1, 1]} : vector<48x120xf32> to vector<32x120xf32>
    %c2_243 = arith.constant 2 : index
    %c1_244 = arith.constant 1 : index
    %c0_245 = arith.constant 0 : index
    %c0_246 = arith.constant 0 : index
    %258 = vector.load %arg4[%c2_243, %c1_244, %c0_245, %c0_246] : memref<5x2x120x80xf32, #tpu.memory_space<vmem>>, vector<1x1x120x80xf32>
    %259 = vector.shape_cast %258 : vector<1x1x120x80xf32> to vector<120x80xf32>
    %cst_247 = arith.constant dense<0.000000e+00> : vector<32x80xf32>
    %260 = tpu.matmul %257, %259, %cst_247 {dimension_numbers = #tpu.dot_dimension_numbers<[1], [0], [0], [1], [0, 0, 1, 1], [], []>} : vector<32x120xf32>, vector<120x80xf32>, vector<32x80xf32> -> vector<32x80xf32>
    %261 = arith.addf %256, %260 : vector<32x80xf32>
    %262 = vector.extract_strided_slice %168 {offsets = [16, 0], sizes = [32, 120], strides = [1, 1]} : vector<48x120xf32> to vector<32x120xf32>
    %c3_248 = arith.constant 3 : index
    %c1_249 = arith.constant 1 : index
    %c0_250 = arith.constant 0 : index
    %c0_251 = arith.constant 0 : index
    %263 = vector.load %arg4[%c3_248, %c1_249, %c0_250, %c0_251] : memref<5x2x120x80xf32, #tpu.memory_space<vmem>>, vector<1x1x120x80xf32>
    %264 = vector.shape_cast %263 : vector<1x1x120x80xf32> to vector<120x80xf32>
    %cst_252 = arith.constant dense<0.000000e+00> : vector<32x80xf32>
    %265 = tpu.matmul %262, %264, %cst_252 {dimension_numbers = #tpu.dot_dimension_numbers<[1], [0], [0], [1], [0, 0, 1, 1], [], []>} : vector<32x120xf32>, vector<120x80xf32>, vector<32x80xf32> -> vector<32x80xf32>
    %266 = arith.addf %261, %265 : vector<32x80xf32>
    %267 = vector.extract_strided_slice %175 {offsets = [16, 0], sizes = [32, 120], strides = [1, 1]} : vector<48x120xf32> to vector<32x120xf32>
    %c4_253 = arith.constant 4 : index
    %c1_254 = arith.constant 1 : index
    %c0_255 = arith.constant 0 : index
    %c0_256 = arith.constant 0 : index
    %268 = vector.load %arg4[%c4_253, %c1_254, %c0_255, %c0_256] : memref<5x2x120x80xf32, #tpu.memory_space<vmem>>, vector<1x1x120x80xf32>
    %269 = vector.shape_cast %268 : vector<1x1x120x80xf32> to vector<120x80xf32>
    %cst_257 = arith.constant dense<0.000000e+00> : vector<32x80xf32>
    %270 = tpu.matmul %267, %269, %cst_257 {dimension_numbers = #tpu.dot_dimension_numbers<[1], [0], [0], [1], [0, 0, 1, 1], [], []>} : vector<32x120xf32>, vector<120x80xf32>, vector<32x80xf32> -> vector<32x80xf32>
    %271 = arith.addf %266, %270 : vector<32x80xf32>
    %272 = arith.maximumf %199, %223 : vector<32x80xf32>
    %273 = arith.maximumf %247, %271 : vector<32x80xf32>
    %274 = arith.maximumf %272, %273 : vector<32x80xf32>
    %c0_258 = arith.constant 0 : index
    %c0_259 = arith.constant 0 : index
    %275 = vector.load %arg5[%c0_258, %c0_259] : memref<1x80xf32, #tpu.memory_space<vmem>>, vector<1x80xf32>
    %276 = vector.broadcast %275 : vector<1x80xf32> to vector<32x80xf32>
    %277 = arith.addf %274, %276 : vector<32x80xf32>
    %cst_260 = arith.constant 0.000000e+00 : f32
    %278 = vector.broadcast %cst_260 : f32 to vector<32x80xf32>
    %279 = arith.maximumf %277, %278 : vector<32x80xf32>
    %280 = vector.extract_strided_slice %279 {offsets = [0, 0], sizes = [8, 80], strides = [1, 1]} : vector<32x80xf32> to vector<8x80xf32>
    %c0_261 = arith.constant 0 : index
    %c0_262 = arith.constant 0 : index
    %c0_263 = arith.constant 0 : index
    %281 = vector.load %arg6[%c0_261, %c0_262, %c0_263] : memref<4x80x50xf32, #tpu.memory_space<vmem>>, vector<1x80x50xf32>
    %282 = vector.shape_cast %281 : vector<1x80x50xf32> to vector<80x50xf32>
    %cst_264 = arith.constant dense<0.000000e+00> : vector<8x50xf32>
    %283 = tpu.matmul %280, %282, %cst_264 {dimension_numbers = #tpu.dot_dimension_numbers<[1], [0], [0], [1], [0, 0, 1, 1], [], []>} : vector<8x80xf32>, vector<80x50xf32>, vector<8x50xf32> -> vector<8x50xf32>
    %284 = vector.extract_strided_slice %279 {offsets = [8, 0], sizes = [8, 80], strides = [1, 1]} : vector<32x80xf32> to vector<8x80xf32>
    %c1_265 = arith.constant 1 : index
    %c0_266 = arith.constant 0 : index
    %c0_267 = arith.constant 0 : index
    %285 = vector.load %arg6[%c1_265, %c0_266, %c0_267] : memref<4x80x50xf32, #tpu.memory_space<vmem>>, vector<1x80x50xf32>
    %286 = vector.shape_cast %285 : vector<1x80x50xf32> to vector<80x50xf32>
    %cst_268 = arith.constant dense<0.000000e+00> : vector<8x50xf32>
    %287 = tpu.matmul %284, %286, %cst_268 {dimension_numbers = #tpu.dot_dimension_numbers<[1], [0], [0], [1], [0, 0, 1, 1], [], []>} : vector<8x80xf32>, vector<80x50xf32>, vector<8x50xf32> -> vector<8x50xf32>
    %288 = arith.addf %283, %287 : vector<8x50xf32>
    %289 = vector.extract_strided_slice %279 {offsets = [16, 0], sizes = [8, 80], strides = [1, 1]} : vector<32x80xf32> to vector<8x80xf32>
    %c2_269 = arith.constant 2 : index
    %c0_270 = arith.constant 0 : index
    %c0_271 = arith.constant 0 : index
    %290 = vector.load %arg6[%c2_269, %c0_270, %c0_271] : memref<4x80x50xf32, #tpu.memory_space<vmem>>, vector<1x80x50xf32>
    %291 = vector.shape_cast %290 : vector<1x80x50xf32> to vector<80x50xf32>
    %cst_272 = arith.constant dense<0.000000e+00> : vector<8x50xf32>
    %292 = tpu.matmul %289, %291, %cst_272 {dimension_numbers = #tpu.dot_dimension_numbers<[1], [0], [0], [1], [0, 0, 1, 1], [], []>} : vector<8x80xf32>, vector<80x50xf32>, vector<8x50xf32> -> vector<8x50xf32>
    %293 = arith.addf %288, %292 : vector<8x50xf32>
    %294 = vector.extract_strided_slice %279 {offsets = [24, 0], sizes = [8, 80], strides = [1, 1]} : vector<32x80xf32> to vector<8x80xf32>
    %c3_273 = arith.constant 3 : index
    %c0_274 = arith.constant 0 : index
    %c0_275 = arith.constant 0 : index
    %295 = vector.load %arg6[%c3_273, %c0_274, %c0_275] : memref<4x80x50xf32, #tpu.memory_space<vmem>>, vector<1x80x50xf32>
    %296 = vector.shape_cast %295 : vector<1x80x50xf32> to vector<80x50xf32>
    %cst_276 = arith.constant dense<0.000000e+00> : vector<8x50xf32>
    %297 = tpu.matmul %294, %296, %cst_276 {dimension_numbers = #tpu.dot_dimension_numbers<[1], [0], [0], [1], [0, 0, 1, 1], [], []>} : vector<8x80xf32>, vector<80x50xf32>, vector<8x50xf32> -> vector<8x50xf32>
    %298 = arith.addf %293, %297 : vector<8x50xf32>
    %c0_277 = arith.constant 0 : index
    %c0_278 = arith.constant 0 : index
    %299 = vector.load %arg7[%c0_277, %c0_278] : memref<1x50xf32, #tpu.memory_space<vmem>>, vector<1x50xf32>
    %300 = vector.broadcast %299 : vector<1x50xf32> to vector<8x50xf32>
    %301 = arith.addf %298, %300 : vector<8x50xf32>
    %cst_279 = arith.constant 0.000000e+00 : f32
    %302 = vector.broadcast %cst_279 : f32 to vector<8x50xf32>
    %303 = arith.maximumf %301, %302 : vector<8x50xf32>
    %c0_280 = arith.constant 0 : index
    %c0_281 = arith.constant 0 : index
    %304 = vector.load %arg8[%c0_280, %c0_281] : memref<50x10xf32, #tpu.memory_space<vmem>>, vector<50x10xf32>
    %cst_282 = arith.constant dense<0.000000e+00> : vector<8x10xf32>
    %305 = tpu.matmul %303, %304, %cst_282 {dimension_numbers = #tpu.dot_dimension_numbers<[1], [0], [0], [1], [0, 0, 1, 1], [], []>} : vector<8x50xf32>, vector<50x10xf32>, vector<8x10xf32> -> vector<8x10xf32>
    %c0_283 = arith.constant 0 : index
    %c0_284 = arith.constant 0 : index
    %306 = vector.load %arg9[%c0_283, %c0_284] : memref<1x10xf32, #tpu.memory_space<vmem>>, vector<1x10xf32>
    %307 = vector.broadcast %306 : vector<1x10xf32> to vector<8x10xf32>
    %308 = arith.addf %305, %307 : vector<8x10xf32>
    %cst_285 = arith.constant dense<0xFF800000> : vector<8xf32>
    %309 = vector.multi_reduction <maximumf>, %308, %cst_285 [1] : vector<8x10xf32> to vector<8xf32>
    %310 = vector.shape_cast %309 : vector<8xf32> to vector<8x1xf32>
    %311 = vector.broadcast %310 : vector<8x1xf32> to vector<8x10xf32>
    %312 = arith.subf %308, %311 : vector<8x10xf32>
    %313 = math.exp %312 : vector<8x10xf32>
    %cst_286 = arith.constant dense<0.000000e+00> : vector<8xf32>
    %314 = vector.multi_reduction <add>, %313, %cst_286 [1] : vector<8x10xf32> to vector<8xf32>
    %315 = vector.shape_cast %314 : vector<8xf32> to vector<8x1xf32>
    %316 = math.log %315 : vector<8x1xf32>
    %317 = arith.addf %310, %316 : vector<8x1xf32>
    %318 = vector.broadcast %317 : vector<8x1xf32> to vector<8x10xf32>
    %319 = arith.subf %308, %318 : vector<8x10xf32>
    %c0_287 = arith.constant 0 : index
    %c0_288 = arith.constant 0 : index
    %320 = vector.load %arg10[%c0_287, %c0_288] : memref<8x10xf32, #tpu.memory_space<vmem>>, vector<8x10xf32>
    tpu.vector_store %arg10[%c0_287, %c0_288], %319 {strides = array<i32>} : memref<8x10xf32, #tpu.memory_space<vmem>>, vector<8x10xf32>,
    return
  }
  func.func @transform_0(%arg0: i32) -> (i32, i32, i32) {
    %c0_i32 = arith.constant 0 : i32
    %c0_i32_0 = arith.constant 0 : i32
    %c0_i32_1 = arith.constant 0 : i32
    return %c0_i32, %arg0, %c0_i32_0 : i32, i32, i32
  }
  func.func @transform_1(%arg0: i32) -> (i32, i32, i32, i32) {
    %c0_i32 = arith.constant 0 : i32
    %c0_i32_0 = arith.constant 0 : i32
    %c0_i32_1 = arith.constant 0 : i32
    %c0_i32_2 = arith.constant 0 : i32
    %c0_i32_3 = arith.constant 0 : i32
    return %c0_i32, %c0_i32_0, %c0_i32_1, %c0_i32_2 : i32, i32, i32, i32
  }
  func.func @transform_2(%arg0: i32) -> (i32, i32) {
    %c0_i32 = arith.constant 0 : i32
    %c0_i32_0 = arith.constant 0 : i32
    %c0_i32_1 = arith.constant 0 : i32
    return %c0_i32, %c0_i32_0 : i32, i32
  }
  func.func @transform_3(%arg0: i32) -> (i32, i32, i32, i32) {
    %c0_i32 = arith.constant 0 : i32
    %c0_i32_0 = arith.constant 0 : i32
    %c0_i32_1 = arith.constant 0 : i32
    %c0_i32_2 = arith.constant 0 : i32
    %c0_i32_3 = arith.constant 0 : i32
    return %c0_i32, %c0_i32_0, %c0_i32_1, %c0_i32_2 : i32, i32, i32, i32
  }
  func.func @transform_4(%arg0: i32) -> (i32, i32) {
    %c0_i32 = arith.constant 0 : i32
    %c0_i32_0 = arith.constant 0 : i32
    %c0_i32_1 = arith.constant 0 : i32
    return %c0_i32, %c0_i32_0 : i32, i32
  }
  func.func @transform_5(%arg0: i32) -> (i32, i32, i32) {
    %c0_i32 = arith.constant 0 : i32
    %c0_i32_0 = arith.constant 0 : i32
    %c0_i32_1 = arith.constant 0 : i32
    %c0_i32_2 = arith.constant 0 : i32
    return %c0_i32, %c0_i32_0, %c0_i32_1 : i32, i32, i32
  }
  func.func @transform_6(%arg0: i32) -> (i32, i32) {
    %c0_i32 = arith.constant 0 : i32
    %c0_i32_0 = arith.constant 0 : i32
    %c0_i32_1 = arith.constant 0 : i32
    return %c0_i32, %c0_i32_0 : i32, i32
  }
  func.func @transform_7(%arg0: i32) -> (i32, i32) {
    %c0_i32 = arith.constant 0 : i32
    %c0_i32_0 = arith.constant 0 : i32
    %c0_i32_1 = arith.constant 0 : i32
    return %c0_i32, %c0_i32_0 : i32, i32
  }
  func.func @transform_8(%arg0: i32) -> (i32, i32) {
    %c0_i32 = arith.constant 0 : i32
    %c0_i32_0 = arith.constant 0 : i32
    %c0_i32_1 = arith.constant 0 : i32
    return %c0_i32, %c0_i32_0 : i32, i32
  }
  func.func @transform_9(%arg0: i32) -> (i32, i32) {
    %c0_i32 = arith.constant 0 : i32
    %c0_i32_0 = arith.constant 0 : i32
    return %arg0, %c0_i32 : i32, i32
  }
}

</mosaic_0001>

<bundles_post_ra>
// kernel: net_forward.1
= control target key start
LH: loop header
LB: loop body
LE: loop exit
PB: predicated region body
PF: predicated region fallthrough
CT: control target
= control target key end

     0   :  { %14 = vsyncpa [#allocation4], 0  ;;  %s12103_s0 = inlined_call_operand.vmem [shape: f32[28,16,28], index: 0, kind: input, shape index: {}]   ;;  %s12104_s1 = inlined_call_operand.vmem [shape: f32[5,2,28,120], index: 1, kind: input, shape index: {}]   ;;  %s12105_s2 = inlined_call_operand.vmem [shape: f32[1,120], index: 2, kind: input, shape index: {}]   ;;  %s12106_s3 = inlined_call_operand.vmem [shape: f32[5,2,120,80], index: 3, kind: input, shape index: {}]   ;;  %s12107_s4 = inlined_call_operand.vmem [shape: f32[1,80], index: 4, kind: input, shape index: {}]   ;;  %s12108_s5 = inlined_call_operand.vmem [shape: f32[4,80,50], index: 5, kind: input, shape index: {}]   ;;  %s12109_s6 = inlined_call_operand.vmem [shape: f32[1,50], index: 6, kind: input, shape index: {}]   ;;  %s12110_s7 = inlined_call_operand.vmem [shape: f32[50,10], index: 7, kind: input, shape index: {}]   ;;  %s12111_s8 = inlined_call_operand.vmem [shape: f32[1,10], index: 8, kind: input, shape index: {}]   ;;  %s12112_s9 = inlined_call_operand.hbm [shape: f32[16,10], index: 9, kind: output, shape index: {}]  }
   0x1   :  { %16 = vsyncpa [#allocation4 + $0x1], 0  ;;  %s8793_s30 = smov 0   ;;  %s8795_s10 = smov 0  }
   0x2   :  { %s8797_s11 = smov 0   ;;  %s8799_s12 = smov 0  }
   0x3 LB: > { %s5908_s13 = sadd.s32 4294967295, %s8738_s12   ;;  %s5909_s14 = sadd.s32 4294967294, %s8738_s12   ;;  %s8738_s12 = sphi %s8799_s12, %s12515_s12   ;;  %s8734_s11 = sphi %s8797_s11, %s12514_s11   ;;  %s8730_s10 = sphi %s8795_s10, %s12513_s10   ;;  %s8726_s30 = sphi %s8793_s30, %s12512_s30  }
   0x4   : > { %s8816_s15 = sadd.s32 1, %s8738_s12   ;;  %s29_s16 = sadd.s32 1, %s8734_s11 }
   0x5   : > { %s26_s17 = ssub.s32 %s8738_s12, %s8816_s15  ;;  %p36_p0 = scmp.ne.s32.totalorder %s8734_s11, %s8730_s10 }
   0x6   : > { %p27_p1 = scmp.eq.s32.totalorder %s26_s17, 0  ;;  %p37_p2 = scmp.eq.s32.totalorder %s8738_s12, 0 }
   0x7   : > { %p234_p3 = scmp.eq.s32.totalorder %s5908_s13, 1  ;;  %p239_p4 = scmp.ne.s32.totalorder %s8730_s10, %s8726_s30 }
   0x8   : > { %s8829_s18 = scalar_select %p27_p1, %s8734_s11, %s29_s16  }
   0x9   : > { %p38_p5 = por %p37_p2, %p36_p0  ;;  %p8831_p6 = por %p234_p3, %p36_p0 }
   0xa   : > { %p240_p7 = scmp.eq.s32.totalorder %s5909_s14, 1  ;;  %p12271_p9 = scmp.ge.s32.totalorder %s8738_s12, 2 }
   0xc   : > { %p8835_p8 = por %p240_p7, %p239_p4  ;;  %280 = sbr.rel (%p12271_p9) target bundleno = 35 (0x23), region = 48 }
  0x11   : > { %283 = sbr.rel (!%p38_p5) target bundleno = 35 (0x23), region = 52  ;;  %s285_s21 = sand.u32 (%p38_p5), 1, %s8734_s11  }
  0x12   : > { %s5912_s22 = sshll.u32 (%p38_p5), %s8738_s12, 3  ;;  %s8598_s23 = smul.u32 (%p38_p5), 224, %s285_s21 }
  0x13   : > { %s8847_s26 = scalar_lea.vmem (%p38_p5), %s12103_s0, %s5912_s22 }
  0x14   : > { %v372_v0 = vld [vmem:[%s8847_s26] sm:$0xff] (%p38_p5)  ;;  %v374_v1 = vld [vmem:[%s8847_s26 + $0x10] sm:$0xff] (%p38_p5)  ;;  %s8855_s27 = scalar_lea.vmem (%p38_p5), [#allocation2], %s8598_s23 }
  0x15   : > { %v376_v2 = vld [vmem:[%s8847_s26 + $0x20] sm:$0xff] (%p38_p5)  ;;  %v378_v3 = vld [vmem:[%s8847_s26 + $0x30] sm:$0xff] (%p38_p5)  ;;  %373 = vst [vmem:[%s8855_s27] sm:$0xff] (%p38_p5), %v372_v0  ;;  %375 = vst [vmem:[%s8855_s27 + $0x8] sm:$0xff] (%p38_p5), %v374_v1 }
  0x16   : > { %v380_v4 = vld [vmem:[%s8847_s26 + $0x40] sm:$0xff]  ;;  %v382_v5 = vld [vmem:[%s8847_s26 + $0x50] sm:$0xff]  ;;  %377 = vst [vmem:[%s8855_s27 + $0x10] sm:$0xff] %v376_v2  ;;  %379 = vst [vmem:[%s8855_s27 + $0x18] sm:$0xff] %v378_v3 }
  0x17   : > { %381 = vst [vmem:[%s8855_s27 + $0x20] sm:$0xff] %v380_v4  ;;  %383 = vst [vmem:[%s8855_s27 + $0x28] sm:$0xff] %v382_v5  ;;  %v384_v6 = vld [vmem:[%s8847_s26 + $0x60] sm:$0xff]  ;;  %v386_v7 = vld [vmem:[%s8847_s26 + $0x70] sm:$0xff] }
  0x18   : > { %v388_v8 = vld [vmem:[%s8847_s26 + $0x80] sm:$0xff]  ;;  %385 = vst [vmem:[%s8855_s27 + $0x30] sm:$0xff] %v384_v6  ;;  %387 = vst [vmem:[%s8855_s27 + $0x38] sm:$0xff] %v386_v7  ;;  %v390_v9 = vld [vmem:[%s8847_s26 + $0x90] sm:$0xff] }
  0x19   : > { %389 = vst [vmem:[%s8855_s27 + $0x40] sm:$0xff] %v388_v8  ;;  %v392_v10 = vld [vmem:[%s8847_s26 + $0xa0] sm:$0xff]  ;;  %v394_v11 = vld [vmem:[%s8847_s26 + $0xb0] sm:$0xff]  ;;  %391 = vst [vmem:[%s8855_s27 + $0x48] sm:$0xff] %v390_v9 }
  0x1a   : > { %393 = vst [vmem:[%s8855_s27 + $0x50] sm:$0xff] %v392_v10  ;;  %395 = vst [vmem:[%s8855_s27 + $0x58] sm:$0xff] %v394_v11  ;;  %v396_v12 = vld [vmem:[%s8847_s26 + $0xc0] sm:$0xff]  ;;  %v398_v13 = vld [vmem:[%s8847_s26 + $0xd0] sm:$0xff] }
  0x1b   : > { %v400_v14 = vld [vmem:[%s8847_s26 + $0xe0] sm:$0xff]  ;;  %397 = vst [vmem:[%s8855_s27 + $0x60] sm:$0xff] %v396_v12  ;;  %399 = vst [vmem:[%s8855_s27 + $0x68] sm:$0xff] %v398_v13  ;;  %v402_v15 = vld [vmem:[%s8847_s26 + $0xf0] sm:$0xff] }
  0x1c   : > { %401 = vst [vmem:[%s8855_s27 + $0x70] sm:$0xff] %v400_v14  ;;  %v404_v16 = vld [vmem:[%s8847_s26 + $0x100] sm:$0xff]  ;;  %v406_v17 = vld [vmem:[%s8847_s26 + $0x110] sm:$0xff]  ;;  %403 = vst [vmem:[%s8855_s27 + $0x78] sm:$0xff] %v402_v15 }
  0x1d   : > { %405 = vst [vmem:[%s8855_s27 + $0x80] sm:$0xff] %v404_v16  ;;  %407 = vst [vmem:[%s8855_s27 + $0x88] sm:$0xff] %v406_v17  ;;  %v408_v18 = vld [vmem:[%s8847_s26 + $0x120] sm:$0xff]  ;;  %v410_v19 = vld [vmem:[%s8847_s26 + $0x130] sm:$0xff] }
  0x1e   : > { %v412_v20 = vld [vmem:[%s8847_s26 + $0x140] sm:$0xff]  ;;  %409 = vst [vmem:[%s8855_s27 + $0x90] sm:$0xff] %v408_v18  ;;  %411 = vst [vmem:[%s8855_s27 + $0x98] sm:$0xff] %v410_v19  ;;  %v414_v21 = vld [vmem:[%s8847_s26 + $0x150] sm:$0xff] }
  0x1f   : > { %413 = vst [vmem:[%s8855_s27 + $0xa0] sm:$0xff] %v412_v20  ;;  %v416_v22 = vld [vmem:[%s8847_s26 + $0x160] sm:$0xff]  ;;  %v418_v23 = vld [vmem:[%s8847_s26 + $0x170] sm:$0xff]  ;;  %415 = vst [vmem:[%s8855_s27 + $0xa8] sm:$0xff] %v414_v21 }
  0x20   : > { %417 = vst [vmem:[%s8855_s27 + $0xb0] sm:$0xff] %v416_v22  ;;  %419 = vst [vmem:[%s8855_s27 + $0xb8] sm:$0xff] %v418_v23  ;;  %v420_v24 = vld [vmem:[%s8847_s26 + $0x180] sm:$0xff]  ;;  %v422_v25 = vld [vmem:[%s8847_s26 + $0x190] sm:$0xff] }
  0x21   : > { %v424_v26 = vld [vmem:[%s8847_s26 + $0x1a0] sm:$0xff]  ;;  %421 = vst [vmem:[%s8855_s27 + $0xc0] sm:$0xff] %v420_v24  ;;  %423 = vst [vmem:[%s8855_s27 + $0xc8] sm:$0xff] %v422_v25  ;;  %v426_v27 = vld [vmem:[%s8847_s26 + $0x1b0] sm:$0xff] }
  0x22   : > { %425 = vst [vmem:[%s8855_s27 + $0xd0] sm:$0xff] %v424_v26  ;;  %427 = vst [vmem:[%s8855_s27 + $0xd8] sm:$0xff] %v426_v27 }
  0x23 PF: > { %p5913_p10 = scmp.ge.s32.totalorder %s8738_s12, 1  ;;  %p432_p11 = scmp.lt.s32.totalorder %s8738_s12, 3 }
  0x25   : > { %p433_p12 = pnand %p5913_p10, %p432_p11 }
  0x27   : > { %436 = sbr.rel (%p433_p12) target bundleno = 1735 (0x6c7), region = 90 }
  0x2c   : > { %v8912_v28 = vld [vmem:[%s12104_s1 + $0x58] sm:$0xf]  ;;  %vm575_vm0 = vcmask 1043456   ;;  %v8922_v30 = vld [vmem:[%s12104_s1 + $0x50] sm:$0xff]  ;;  %s8934_s24 = sand.u32 1, %s8730_s10   ;;  %v8943_v32 = vld [vmem:[%s12104_s1 + $0x48] sm:$0xff] }
  0x2d   : > { %v8917_v29 = vld [vmem:[%s12104_s1 + $0x18] sm:$0xf]  ;;  %7249 = vmatprep.subr.msk.mxu0 %vm575_vm0, %v8912_v28  ;;  %v8931_v31 = vld [vmem:[%s12104_s1 + $0x10] sm:$0xff]  ;;  %v8948_v33 = vld [vmem:[%s12104_s1 + $0x8] sm:$0xff]  ;;  %s8599_s29 = smul.u32 224, %s8934_s24  ;;  %vm538_vm1 = vcmask 228352  }
  0x2e   : > { %7275 = vmatprep.subr.msk.mxu1 %vm575_vm0, %v8917_v29  ;;  %7250 = vmatpush3.msk.msra.mxu0 %vm575_vm0, %v8912_v28  ;;  %v8958_v34 = vld [vmem:[%s12104_s1 + $0x40] sm:$0xff]  ;;  %v8991_v40 = vld [vmem:[%s12104_s1 + $0x98] sm:$0xf]  ;;  %v9028_v46 = vld [vmem:[%s12104_s1 + $0x90] sm:$0xff]  ;;  %vm3436_vm2 = vcmask 982016   ;;  %vm8741_vm3 = vmmov 0  }
  0x2f   : > { %7276 = vmatpush3.msk.msra.mxu1 %vm575_vm0, %v8917_v29  ;;  %7251 = vmatprep.subr.mxu0 %v8922_v30  ;;  %v8963_v35 = vld [vmem:[%s12104_s1] sm:$0xff]  ;;  %s8967_s22 = scalar_lea.vmem [#allocation2], %s8599_s29  ;;  %v8996_v41 = vld [vmem:[%s12104_s1 + $0xd8] sm:$0xf]  ;;  %v9047_v49 = vld [vmem:[%s12104_s1 + $0xd0] sm:$0xff]  ;;  %vm5397_vm4 = vcmask 654336  }
  0x30   : > { %7277 = vmatprep.subr.mxu1 %v8931_v31  ;;  %7252 = vmatpush3.msra.mxu0 %v8922_v30  ;;  %v8970_v36 = vld [vmem:[%s8967_s22 + $0x8] sm:$0xff]  ;;  %v8975_v37 = vld [vmem:[%s8967_s22] sm:$0xff]  ;;  %v8980_v38 = vld [vmem:[%s8967_s22 + $0x18] sm:$0xff]  ;;  %vm5741_vm5 = vcmask 1041408   ;;  %vm5737_vm6 = vcmask 408576   ;;  %vm5815_vm7 = vcmask 80896  }
  0x31   : > { %7278 = vmatpush3.msra.mxu1 %v8931_v31  ;;  %7253 = vmatprep.subr.mxu0 %v8943_v32  ;;  %v8983_v39 = vld [vmem:[%s8967_s22 + $0x10] sm:$0xff]  ;;  %v9002_v42 = vld [vmem:[%s8967_s22 + $0x28] sm:$0xff]  ;;  %v9009_v43 = vld [vmem:[%s8967_s22 + $0x20] sm:$0xff]  ;;  %s5914_s21 = sshll.u32 %s8934_s24, 3  ;;  %s6494_s23 = sshll.u32 %s5908_s13, 7 }
  0x32   : > { %7279 = vmatprep.subr.mxu1 %v8948_v33  ;;  %7254 = vmatpush3.msra.mxu0 %v8943_v32  ;;  %v9016_v44 = vld [vmem:[%s8967_s22 + $0x38] sm:$0xff]  ;;  %v9019_v45 = vld [vmem:[%s8967_s22 + $0x30] sm:$0xff]  ;;  %v9031_v47 = vld [vmem:[%s8967_s22 + $0x48] sm:$0xff]  ;;  %s473_s25 = scalar_lea.vmem [#allocation3], %s5914_s21  ;;  %s5842_s28 = scalar_lea.hbm %s12112_s9, %s6494_s23 }
  0x33   : > { %7280 = vmatpush3.msra.mxu1 %v8948_v33  ;;  %7255 = vmatprep.subr.mxu0 %v8958_v34  ;;  %v9038_v48 = vld [vmem:[%s8967_s22 + $0x40] sm:$0xff]  ;;  %v9052_v50 = vld [vmem:[%s12104_s1 + $0x88] sm:$0xff]  ;;  %v9058_v51 = vld [vmem:[%s8967_s22 + $0x58] sm:$0xff]  ;;  %s5844_s26 = sshll.u32 %s473_s25, 4  ;;  %s5831_s29 = scalar_lea.sflag [#allocation4], %s8934_s24  ;;  %s5845_s26 = int_to_ptr.vmem [resolvable:$true] %s5844_s26 }
  0x34   : > { %7281 = vmatprep.subr.mxu1 %v8963_v35  ;;  %7256 = vmatpush3.msra.mxu0 %v8958_v34  ;;  %v9061_v52 = vld [vmem:[%s8967_s22 + $0x50] sm:$0xff]  ;;  %v9067_v53 = vld [vmem:[%s8967_s22 + $0x68] sm:$0xff]  ;;  %v9071_v54 = vld [vmem:[%s8967_s22 + $0x60] sm:$0xff]  ;;  %s8678_s14 = scalar_lea.vmem %s5845_s26, 128  ;;  %s8742_s16 = smov [#allocation3]  }
  0x35   : > { %7257 = vmatprep.mubr.msk.f32.mxu0 %vm538_vm1, %v8970_v36  ;;  %7282 = vmatpush3.msra.mxu1 %v8963_v35  ;;  %v9081_v55 = vld [vmem:[%s12104_s1 + $0xc8] sm:$0xff]  ;;  %v9086_v56 = vld [vmem:[%s12104_s1 + $0x80] sm:$0xff]  ;;  %v9092_v57 = vld [vmem:[%s8967_s22 + $0x78] sm:$0xff]  ;;  %p8679_p13 = scmp.ne.s32.totalorder %s5845_s26, %s8678_s14  ;;  %s8682_s17 = sshll.u32 %s8742_s16, 4  ;;  %s8683_s17 = int_to_ptr.vmem [resolvable:$false] %s8682_s17 }
  0x36   : > { %7283 = vmatprep.mubr.msk.f32.mxu1 %vm538_vm1, %v8975_v37  ;;  %7258 = vmatmul.mubr.msk.f32.vlgmr.msra.gmra.mxu0 %vm538_vm1, %v8980_v38  ;;  %v9095_v58 = vld [vmem:[%s8967_s22 + $0x70] sm:$0xff]  ;;  %v9101_v59 = vld [vmem:[%s8967_s22 + $0x88] sm:$0xff]  ;;  %v9104_v60 = vld [vmem:[%s8967_s22 + $0x80] sm:$0xff]  ;;  %s8684_s13 = scalar_lea.vmem %s8683_s17, 256  ;;  %p8685_p2 = scmp.lt.s32.totalorder %s5845_s26, %s8683_s17 }
  0x37   : > { %7284 = vmatmul.mubr.msk.f32.vlgmr.msra.gmra.mxu1 %vm538_vm1, %v8983_v39  ;;  %7301 = vmatprep.subr.msk.mxu0 %vm575_vm0, %v8991_v40  ;;  %v9115_v61 = vld [vmem:[%s12104_s1 + $0xc0] sm:$0xff]  ;;  %v9120_v62 = vld [vmem:[%s12104_s1 + $0x118] sm:$0xf]  ;;  %v9130_v0 = vld [vmem:[%s8967_s22 + $0x90] sm:$0xff]  ;;  %p8680_p0 = pnand %p8679_p13, %p8831_p6  ;;  %p8686_p3 = scmp.lt.s32.totalorder %s8684_s13, %s8678_s14 }
  0x38   : > { %7327 = vmatprep.subr.msk.mxu1 %vm575_vm0, %v8996_v41  ;;  %7302 = vmatpush3.msk.msra.mxu0 %vm575_vm0, %v8991_v40  ;;  %v9127_v63 = vld [vmem:[%s8967_s22 + $0x98] sm:$0xff]  ;;  %v9134_v1 = vld [vmem:[%s8967_s22 + $0xa8] sm:$0xff]  ;;  %v9137_v2 = vld [vmem:[%s8967_s22 + $0xa0] sm:$0xff] }
  0x39   : > { %7260 = vmatprep.mubr.msk.f32.mxu0 %vm538_vm1, %v9002_v42  ;;  %7286 = vmatprep.mubr.msk.f32.mxu1 %vm538_vm1, %v9009_v43  ;;  %v9150_v3 = vld [vmem:[%s12104_s1 + $0x78] sm:$0xf]  ;;  %v9160_v5 = vld [vmem:[%s8967_s22 + $0xb0] sm:$0xff]  ;;  %v9204_v8 = vld [vmem:[%s12104_s1 + $0x108] sm:$0xff]  ;;  %p8681_p1 = pneg %p8680_p0  ;;  %p8687_p4 = por %p8686_p3, %p8685_p2 }
  0x3a   : > { %7328 = vmatpush3.msk.msra.mxu1 %vm575_vm0, %v8996_v41  ;;  %7261 = vmatmul.mubr.msk.f32.gmra.mxu0 %vm538_vm1, %v9016_v44  ;;  %v9157_v4 = vld [vmem:[%s8967_s22 + $0xb8] sm:$0xff]  ;;  %v9180_v6 = vld [vmem:[%s12104_s1 + $0x110] sm:$0xff]  ;;  %v9209_v9 = vld [vmem:[%s12104_s1 + $0x68] sm:$0xff] }
  0x3b   : > { %7287 = vmatmul.mubr.msk.f32.gmra.mxu1 %vm538_vm1, %v9019_v45  ;;  %7303 = vmatprep.subr.mxu0 %v9028_v46  ;;  %v9185_v7 = vld [vmem:[%s12104_s1 + $0x70] sm:$0xff]  ;;  %v9226_v10 = vld [vmem:[%s12104_s1 + $0x100] sm:$0xff]  ;;  %v9248_v12 = vld [vmem:[%s12104_s1 + $0x38] sm:$0xf]  ;;  %p8688_p5 = pnand %p8687_p4, %p8681_p1 }
  0x3c   : > { %7263 = vmatprep.mubr.msk.f32.mxu0 %vm538_vm1, %v9031_v47  ;;  %7289 = vmatprep.mubr.msk.f32.mxu1 %vm538_vm1, %v9038_v48  ;;  %v9231_v11 = vld [vmem:[%s12104_s1 + $0x60] sm:$0xff]  ;;  %v9253_v13 = vld [vmem:[%s12104_s1 + $0xb8] sm:$0xf]  ;;  %v9277_v15 = vld [vmem:[%s8967_s22 + $0xc8] sm:$0xff] }
  0x3d   : > { %7304 = vmatpush3.msra.mxu0 %v9028_v46  ;;  %7329 = vmatprep.subr.mxu1 %v9047_v49  ;;  %v9274_v14 = vld [vmem:[%s8967_s22 + $0xc0] sm:$0xff]  ;;  %v9294_v16 = vld [vmem:[%s12104_s1 + $0x30] sm:$0xff]  ;;  %v9318_v18 = vld [vmem:[%s12104_s1 + $0x28] sm:$0xff] }
  0x3e   : > { %7305 = vmatprep.subr.mxu0 %v9052_v50  ;;  %7264 = vmatmul.mubr.msk.f32.gmra.mxu0 %vm538_vm1, %v9058_v51  ;;  %v9299_v17 = vld [vmem:[%s12104_s1 + $0xb0] sm:$0xff]  ;;  %v9323_v19 = vld [vmem:[%s12104_s1 + $0xa8] sm:$0xff]  ;;  %v9340_v20 = vld [vmem:[%s12104_s1 + $0x20] sm:$0xff] }
  0x3f   : > { %7290 = vmatmul.mubr.msk.f32.gmra.mxu1 %vm538_vm1, %v9061_v52  ;;  %7266 = vmatprep.mubr.msk.f32.mxu0 %vm538_vm1, %v9067_v53  ;;  %v9345_v21 = vld [vmem:[%s12104_s1 + $0xa0] sm:$0xff]  ;;  %v9362_v22 = vld [vmem:[%s12104_s1 + $0xf8] sm:$0xf]  ;;  %v9388_v24 = vld [vmem:[%s8967_s22 + $0xd0] sm:$0xff] }
  0x40   : > { %7330 = vmatpush3.msra.mxu1 %v9047_v49  ;;  %7292 = vmatprep.mubr.msk.f32.mxu1 %vm538_vm1, %v9071_v54  ;;  %v9367_v23 = vld [vmem:[%s12104_s1 + $0x138] sm:$0xf]  ;;  %v9405_v25 = vld [vmem:[%s12104_s1 + $0xf0] sm:$0xff]  ;;  %v9429_v27 = vld [vmem:[%s12104_s1 + $0xe8] sm:$0xff] }
  0x41   : > { %7306 = vmatpush3.msra.mxu0 %v9052_v50  ;;  %7331 = vmatprep.subr.mxu1 %v9081_v55  ;;  %12274 = vst [vmem:[#allocation6_spill] sm:$0xff] %v9367_v23  ;;  %12275 = vst [vmem:[#allocation7_spill] sm:$0xff] %v9405_v25  ;;  %v9410_v26 = vld [vmem:[%s12104_s1 + $0x130] sm:$0xff] }
  0x42   : > { %7307 = vmatprep.subr.mxu0 %v9086_v56  ;;  %7267 = vmatmul.mubr.msk.f32.gmra.mxu0 %vm538_vm1, %v9092_v57 }
  0x43   : > { %7293 = vmatmul.mubr.msk.f32.gmra.mxu1 %vm538_vm1, %v9095_v58  ;;  %7269 = vmatprep.mubr.msk.f32.mxu0 %vm538_vm1, %v9101_v59 }
  0x44   : > { %7295 = vmatprep.mubr.msk.f32.mxu1 %vm538_vm1, %v9104_v60  ;;  %7332 = vmatpush3.msra.mxu1 %v9081_v55 }
  0x45   : > { %7308 = vmatpush3.msra.mxu0 %v9086_v56  ;;  %7333 = vmatprep.subr.mxu1 %v9115_v61 }
  0x46   : > { %7353 = vmatprep.subr.msk.mxu0 %vm575_vm0, %v9120_v62  ;;  %7270 = vmatmul.mubr.msk.f32.gmra.mxu0 %vm538_vm1, %v9127_v63 }
  0x47   : > { %7296 = vmatmul.mubr.msk.f32.gmra.mxu1 %vm538_vm1, %v9130_v0  ;;  %7272 = vmatprep.mubr.msk.f32.mxu0 %vm538_vm1, %v9134_v1 }
  0x48   : > { %7298 = vmatprep.mubr.msk.f32.mxu1 %vm538_vm1, %v9137_v2  ;;  %7334 = vmatpush3.msra.mxu1 %v9115_v61 }
  0x49   : > { %7379 = vmatprep.subr.msk.mxu1 %vm575_vm0, %v9150_v3 }
  0x4a   : > { %7273 = vmatmul.mubr.msk.f32.gmra.mxu0 %vm538_vm1, %v9157_v4 }
  0x4b   : > { %7299 = vmatmul.mubr.msk.f32.gmra.mxu1 %vm538_vm1, %v9160_v5  ;;  %7309 = vmatprep.mubr.msk.f32.mxu0 %vm538_vm1, %v8983_v39 }
  0x4c   : > { %7335 = vmatprep.mubr.msk.f32.mxu1 %vm538_vm1, %v8980_v38 }
  0x4e   : > { %7310 = vmatmul.mubr.msk.f32.vlgmr.msra.gmra.mxu0 %vm538_vm1, %v9009_v43 }
  0x4f   : > { %7336 = vmatmul.mubr.msk.f32.vlgmr.msra.gmra.mxu1 %vm538_vm1, %v9002_v42  ;;  %7354 = vmatpush3.msk.msra.mxu0 %vm575_vm0, %v9120_v62 }
  0x50   : > { %7312 = vmatprep.mubr.msk.f32.mxu0 %vm538_vm1, %v9019_v45  ;;  %7338 = vmatprep.mubr.msk.f32.mxu1 %vm538_vm1, %v9016_v44 }
  0x51   : > { %7380 = vmatpush3.msk.msra.mxu1 %vm575_vm0, %v9150_v3  ;;  %7355 = vmatprep.subr.mxu0 %v9180_v6 }
  0x52   : > { %7381 = vmatprep.subr.mxu1 %v9185_v7  ;;  %7313 = vmatmul.mubr.msk.f32.gmra.mxu0 %vm538_vm1, %v9038_v48 }
  0x53   : > { %7339 = vmatmul.mubr.msk.f32.gmra.mxu1 %vm538_vm1, %v9031_v47  ;;  %7315 = vmatprep.mubr.msk.f32.mxu0 %vm538_vm1, %v9061_v52 }
  0x54   : > { %7341 = vmatprep.mubr.msk.f32.mxu1 %vm538_vm1, %v9058_v51  ;;  %7356 = vmatpush3.msra.mxu0 %v9180_v6 }
  0x55   : > { %7382 = vmatpush3.msra.mxu1 %v9185_v7  ;;  %7357 = vmatprep.subr.mxu0 %v9204_v8 }
  0x56   : > { %7383 = vmatprep.subr.mxu1 %v9209_v9  ;;  %7316 = vmatmul.mubr.msk.f32.gmra.mxu0 %vm538_vm1, %v9071_v54 }
  0x57   : > { %7342 = vmatmul.mubr.msk.f32.gmra.mxu1 %vm538_vm1, %v9067_v53  ;;  %7318 = vmatprep.mubr.msk.f32.mxu0 %vm538_vm1, %v9095_v58 }
  0x58   : > { %7344 = vmatprep.mubr.msk.f32.mxu1 %vm538_vm1, %v9092_v57  ;;  %7358 = vmatpush3.msra.mxu0 %v9204_v8 }
  0x59   : > { %7384 = vmatpush3.msra.mxu1 %v9209_v9  ;;  %7359 = vmatprep.subr.mxu0 %v9226_v10 }
  0x5a   : > { %7385 = vmatprep.subr.mxu1 %v9231_v11  ;;  %7319 = vmatmul.mubr.msk.f32.gmra.mxu0 %vm538_vm1, %v9104_v60 }
  0x5b   : > { %7345 = vmatmul.mubr.msk.f32.gmra.mxu1 %vm538_vm1, %v9101_v59  ;;  %7321 = vmatprep.mubr.msk.f32.mxu0 %vm538_vm1, %v9130_v0 }
  0x5c   : > { %7347 = vmatprep.mubr.msk.f32.mxu1 %vm538_vm1, %v9127_v63  ;;  %7360 = vmatpush3.msra.mxu0 %v9226_v10 }
  0x5d   : > { %7386 = vmatpush3.msra.mxu1 %v9231_v11  ;;  %7405 = vmatprep.subr.msk.mxu0 %vm575_vm0, %v9248_v12 }
  0x5e   : > { %7431 = vmatprep.subr.msk.mxu1 %vm575_vm0, %v9253_v13  ;;  %7322 = vmatmul.mubr.msk.f32.gmra.mxu0 %vm538_vm1, %v9137_v2 }
  0x5f   : > { %7348 = vmatmul.mubr.msk.f32.gmra.mxu1 %vm538_vm1, %v9134_v1  ;;  %7324 = vmatprep.mubr.msk.f32.mxu0 %vm538_vm1, %v9160_v5 }
  0x60   : > { %7350 = vmatprep.mubr.msk.f32.mxu1 %vm538_vm1, %v9157_v4 }
  0x62   : > { %7325 = vmatmul.mubr.msk.f32.gmra.mxu0 %vm538_vm1, %v9274_v14 }
  0x63   : > { %7351 = vmatmul.mubr.msk.f32.gmra.mxu1 %vm538_vm1, %v9277_v15  ;;  %7361 = vmatprep.mubr.msk.f32.mxu0 %vm538_vm1, %v9009_v43 }
  0x64   : > { %7387 = vmatprep.mubr.msk.f32.mxu1 %vm538_vm1, %v8970_v36 }
  0x66   : > { %7362 = vmatmul.mubr.msk.f32.vlgmr.msra.gmra.mxu0 %vm538_vm1, %v9019_v45 }
  0x67   : > { %7388 = vmatmul.mubr.msk.f32.vlgmr.msra.gmra.mxu1 %vm538_vm1, %v8980_v38  ;;  %7406 = vmatpush3.msk.msra.mxu0 %vm575_vm0, %v9248_v12 }
  0x68   : > { %7364 = vmatprep.mubr.msk.f32.mxu0 %vm538_vm1, %v9038_v48  ;;  %7390 = vmatprep.mubr.msk.f32.mxu1 %vm538_vm1, %v9002_v42 }
  0x69   : > { %7432 = vmatpush3.msk.msra.mxu1 %vm575_vm0, %v9253_v13  ;;  %7407 = vmatprep.subr.mxu0 %v9294_v16 }
  0x6a   : > { %7433 = vmatprep.subr.mxu1 %v9299_v17  ;;  %7365 = vmatmul.mubr.msk.f32.gmra.mxu0 %vm538_vm1, %v9061_v52 }
  0x6b   : > { %7391 = vmatmul.mubr.msk.f32.gmra.mxu1 %vm538_vm1, %v9016_v44  ;;  %7367 = vmatprep.mubr.msk.f32.mxu0 %vm538_vm1, %v9071_v54 }
  0x6c   : > { %7393 = vmatprep.mubr.msk.f32.mxu1 %vm538_vm1, %v9031_v47  ;;  %7408 = vmatpush3.msra.mxu0 %v9294_v16 }
  0x6d   : > { %7434 = vmatpush3.msra.mxu1 %v9299_v17  ;;  %7409 = vmatprep.subr.mxu0 %v9318_v18 }
  0x6e   : > { %7435 = vmatprep.subr.mxu1 %v9323_v19  ;;  %7368 = vmatmul.mubr.msk.f32.gmra.mxu0 %vm538_vm1, %v9095_v58 }
  0x6f   : > { %7394 = vmatmul.mubr.msk.f32.gmra.mxu1 %vm538_vm1, %v9058_v51  ;;  %7370 = vmatprep.mubr.msk.f32.mxu0 %vm538_vm1, %v9104_v60 }
  0x70   : > { %7396 = vmatprep.mubr.msk.f32.mxu1 %vm538_vm1, %v9067_v53  ;;  %7410 = vmatpush3.msra.mxu0 %v9318_v18 }
  0x71   : > { %7436 = vmatpush3.msra.mxu1 %v9323_v19  ;;  %7411 = vmatprep.subr.mxu0 %v9340_v20 }
  0x72   : > { %7437 = vmatprep.subr.mxu1 %v9345_v21  ;;  %7371 = vmatmul.mubr.msk.f32.gmra.mxu0 %vm538_vm1, %v9130_v0 }
  0x73   : > { %7397 = vmatmul.mubr.msk.f32.gmra.mxu1 %vm538_vm1, %v9092_v57  ;;  %7373 = vmatprep.mubr.msk.f32.mxu0 %vm538_vm1, %v9137_v2 }
  0x74   : > { %7399 = vmatprep.mubr.msk.f32.mxu1 %vm538_vm1, %v9101_v59  ;;  %7412 = vmatpush3.msra.mxu0 %v9340_v20 }
  0x75   : > { %7438 = vmatpush3.msra.mxu1 %v9345_v21  ;;  %7457 = vmatprep.subr.msk.mxu0 %vm575_vm0, %v9362_v22 }
  0x76   : > { %7483 = vmatprep.subr.msk.mxu1 %vm575_vm0, %v9367_v23  ;;  %7374 = vmatmul.mubr.msk.f32.gmra.mxu0 %vm538_vm1, %v9160_v5 }
  0x77   : > { %7400 = vmatmul.mubr.msk.f32.gmra.mxu1 %vm538_vm1, %v9127_v63  ;;  %7376 = vmatprep.mubr.msk.f32.mxu0 %vm538_vm1, %v9274_v14 }
  0x78   : > { %7402 = vmatprep.mubr.msk.f32.mxu1 %vm538_vm1, %v9134_v1 }
  0x7a   : > { %7377 = vmatmul.mubr.msk.f32.gmra.mxu0 %vm538_vm1, %v9388_v24 }
  0x7b   : > { %7403 = vmatmul.mubr.msk.f32.gmra.mxu1 %vm538_vm1, %v9157_v4  ;;  %7413 = vmatprep.mubr.msk.f32.mxu0 %vm538_vm1, %v8975_v37  ;;  %v9434_v37 = vld [vmem:[%s12104_s1 + $0x128] sm:$0xff] }
  0x7c   : > { %7439 = vmatprep.mubr.msk.f32.mxu1 %vm538_vm1, %v8983_v39 }
  0x7e   : > { %7414 = vmatmul.mubr.msk.f32.vlgmr.msra.gmra.mxu0 %vm538_vm1, %v8983_v39 }
  0x7f   : > { %7440 = vmatmul.mubr.msk.f32.vlgmr.msra.gmra.mxu1 %vm538_vm1, %v9009_v43  ;;  %7458 = vmatpush3.msk.msra.mxu0 %vm575_vm0, %v9362_v22 }
  0x80   : > { %7416 = vmatprep.mubr.msk.f32.mxu0 %vm538_vm1, %v9009_v43  ;;  %7442 = vmatprep.mubr.msk.f32.mxu1 %vm538_vm1, %v9019_v45 }
  0x81   : > { %7484 = vmatpush3.msk.msra.mxu1 %vm575_vm0, %v9367_v23  ;;  %7459 = vmatprep.subr.mxu0 %v9405_v25  ;;  %v9451_v23 = vld [vmem:[%s12104_s1 + $0xe0] sm:$0xff] }
  0x82   : > { %7485 = vmatprep.subr.mxu1 %v9410_v26  ;;  %7417 = vmatmul.mubr.msk.f32.gmra.mxu0 %vm538_vm1, %v9019_v45 }
  0x83   : > { %7443 = vmatmul.mubr.msk.f32.gmra.mxu1 %vm538_vm1, %v9038_v48  ;;  %7419 = vmatprep.mubr.msk.f32.mxu0 %vm538_vm1, %v9038_v48 }
  0x84   : > { %7445 = vmatprep.mubr.msk.f32.mxu1 %vm538_vm1, %v9061_v52  ;;  %7460 = vmatpush3.msra.mxu0 %v9405_v25  ;;  %v9456_v25 = vld [vmem:[%s12104_s1 + $0x120] sm:$0xff] }
  0x85   : > { %7486 = vmatpush3.msra.mxu1 %v9410_v26  ;;  %7461 = vmatprep.subr.mxu0 %v9429_v27 }
  0x86   : > { %7487 = vmatprep.subr.mxu1 %v9434_v37  ;;  %7420 = vmatmul.mubr.msk.f32.gmra.mxu0 %vm538_vm1, %v9061_v52 }
  0x87   : > { %7446 = vmatmul.mubr.msk.f32.gmra.mxu1 %vm538_vm1, %v9071_v54  ;;  %7422 = vmatprep.mubr.msk.f32.mxu0 %vm538_vm1, %v9071_v54 }
  0x88   : > { %7448 = vmatprep.mubr.msk.f32.mxu1 %vm538_vm1, %v9095_v58  ;;  %7462 = vmatpush3.msra.mxu0 %v9429_v27 }
  0x89   : > { %7488 = vmatpush3.msra.mxu1 %v9434_v37  ;;  %7463 = vmatprep.subr.mxu0 %v9451_v23 }
  0x8a   : > { %7489 = vmatprep.subr.mxu1 %v9456_v25  ;;  %7423 = vmatmul.mubr.msk.f32.gmra.mxu0 %vm538_vm1, %v9095_v58 }
  0x8b   : > { %7449 = vmatmul.mubr.msk.f32.gmra.mxu1 %vm538_vm1, %v9104_v60  ;;  %7425 = vmatprep.mubr.msk.f32.mxu0 %vm538_vm1, %v9104_v60 }
  0x8c   : > { %7451 = vmatprep.mubr.msk.f32.mxu1 %vm538_vm1, %v9130_v0  ;;  %7464 = vmatpush3.msra.mxu0 %v9451_v23 }
  0x8d   : > { %7490 = vmatpush3.msra.mxu1 %v9456_v25  ;;  %7509 = vmatprep.subr.msk.mxu0 %vm575_vm0, %v8912_v28 }
  0x8e   : > { %7535 = vmatprep.subr.msk.mxu1 %vm575_vm0, %v8917_v29  ;;  %7426 = vmatmul.mubr.msk.f32.gmra.mxu0 %vm538_vm1, %v9130_v0 }
  0x8f   : > { %7452 = vmatmul.mubr.msk.f32.gmra.mxu1 %vm538_vm1, %v9137_v2  ;;  %7428 = vmatprep.mubr.msk.f32.mxu0 %vm538_vm1, %v9137_v2 }
  0x90   : > { %7454 = vmatprep.mubr.msk.f32.mxu1 %vm538_vm1, %v9160_v5 }
  0x92   : > { %7429 = vmatmul.mubr.msk.f32.gmra.mxu0 %vm538_vm1, %v9160_v5 }
  0x93   : > { %7455 = vmatmul.mubr.msk.f32.gmra.mxu1 %vm538_vm1, %v9274_v14  ;;  %7465 = vmatprep.mubr.msk.f32.mxu0 %vm538_vm1, %v8980_v38 }
  0x94   : > { %7491 = vmatprep.mubr.msk.f32.mxu1 %vm538_vm1, %v9009_v43 }
  0x96   : > { %7466 = vmatmul.mubr.msk.f32.vlgmr.msra.gmra.mxu0 %vm538_vm1, %v9002_v42 }
  0x97   : > { %7492 = vmatmul.mubr.msk.f32.vlgmr.msra.gmra.mxu1 %vm538_vm1, %v9019_v45  ;;  %7510 = vmatpush3.msk.msra.mxu0 %vm575_vm0, %v8912_v28  ;;  %v12276_v28 = vld [vmem:[#allocation6_spill] sm:$0xff] }
  0x98   : > { %7468 = vmatprep.mubr.msk.f32.mxu0 %vm538_vm1, %v9016_v44  ;;  %7494 = vmatprep.mubr.msk.f32.mxu1 %vm538_vm1, %v9038_v48 }
  0x99   : > { %7536 = vmatpush3.msk.msra.mxu1 %vm575_vm0, %v8917_v29  ;;  %7511 = vmatprep.subr.mxu0 %v8922_v30  ;;  %v9759_v29 = vld [vmem:[%s8967_s22 + $0xd8] sm:$0xff] }
  0x9a   : > { %7537 = vmatprep.subr.mxu1 %v8931_v31  ;;  %7469 = vmatmul.mubr.msk.f32.gmra.mxu0 %vm538_vm1, %v9031_v47 }
  0x9b   : > { %7495 = vmatmul.mubr.msk.f32.gmra.mxu1 %vm538_vm1, %v9061_v52  ;;  %7471 = vmatprep.mubr.msk.f32.mxu0 %vm538_vm1, %v9058_v51 }
  0x9c   : > { %7497 = vmatprep.mubr.msk.f32.mxu1 %vm538_vm1, %v9071_v54  ;;  %7512 = vmatpush3.msra.mxu0 %v8922_v30 }
  0x9d   : > { %7538 = vmatpush3.msra.mxu1 %v8931_v31  ;;  %7513 = vmatprep.subr.mxu0 %v8943_v32 }
  0x9e   : > { %7539 = vmatprep.subr.mxu1 %v8948_v33  ;;  %7472 = vmatmul.mubr.msk.f32.gmra.mxu0 %vm538_vm1, %v9067_v53 }
  0x9f   : > { %7498 = vmatmul.mubr.msk.f32.gmra.mxu1 %vm538_vm1, %v9095_v58  ;;  %7474 = vmatprep.mubr.msk.f32.mxu0 %vm538_vm1, %v9092_v57 }
  0xa0   : > { %7500 = vmatprep.mubr.msk.f32.mxu1 %vm538_vm1, %v9104_v60  ;;  %7514 = vmatpush3.msra.mxu0 %v8943_v32 }
  0xa1   : > { %7540 = vmatpush3.msra.mxu1 %v8948_v33  ;;  %7515 = vmatprep.subr.mxu0 %v8958_v34 }
  0xa2   : > { %7541 = vmatprep.subr.mxu1 %v8963_v35  ;;  %7475 = vmatmul.mubr.msk.f32.gmra.mxu0 %vm538_vm1, %v9101_v59 }
  0xa3   : > { %7501 = vmatmul.mubr.msk.f32.gmra.mxu1 %vm538_vm1, %v9130_v0  ;;  %7477 = vmatprep.mubr.msk.f32.mxu0 %vm538_vm1, %v9127_v63 }
  0xa4   : > { %7503 = vmatprep.mubr.msk.f32.mxu1 %vm538_vm1, %v9137_v2  ;;  %7516 = vmatpush3.msra.mxu0 %v8958_v34 }
  0xa5   : > { %7542 = vmatpush3.msra.mxu1 %v8963_v35  ;;  %7561 = vmatprep.subr.msk.mxu0 %vm575_vm0, %v8991_v40 }
  0xa6   : > { %7587 = vmatprep.subr.msk.mxu1 %vm575_vm0, %v8996_v41  ;;  %7478 = vmatmul.mubr.msk.f32.gmra.mxu0 %vm538_vm1, %v9134_v1 }
  0xa7   : > { %7504 = vmatmul.mubr.msk.f32.gmra.mxu1 %vm538_vm1, %v9160_v5  ;;  %7480 = vmatprep.mubr.msk.f32.mxu0 %vm538_vm1, %v9157_v4 }
  0xa8   : > { %7506 = vmatprep.mubr.msk.f32.mxu1 %vm538_vm1, %v9274_v14 }
  0xaa   : > { %7481 = vmatmul.mubr.msk.f32.gmra.mxu0 %vm538_vm1, %v9277_v15 }
  0xab   : > { %7507 = vmatmul.mubr.msk.f32.gmra.mxu1 %vm538_vm1, %v9388_v24  ;;  %7517 = vmatprep.mubr.msk.f32.mxu0 %vm538_vm1, %v8983_v39 }
  0xac   : > { %7543 = vmatprep.mubr.msk.f32.mxu1 %vm538_vm1, %v8970_v36 }
  0xae   : > { %7518 = vmatmul.mubr.msk.f32.vlgmr.msra.gmra.mxu0 %vm538_vm1, %v9009_v43 }
  0xaf   : > { %7544 = vmatmul.mubr.msk.f32.vlgmr.msra.gmra.mxu1 %vm538_vm1, %v8980_v38  ;;  %7562 = vmatpush3.msk.msra.mxu0 %vm575_vm0, %v8991_v40 }
  0xb0   : > { %7520 = vmatprep.mubr.msk.f32.mxu0 %vm538_vm1, %v9019_v45  ;;  %7546 = vmatprep.mubr.msk.f32.mxu1 %vm538_vm1, %v9002_v42 }
  0xb1   : > { %7588 = vmatpush3.msk.msra.mxu1 %vm575_vm0, %v8996_v41  ;;  %7563 = vmatprep.subr.mxu0 %v9028_v46 }
  0xb2   : > { %7589 = vmatprep.subr.mxu1 %v9047_v49  ;;  %7521 = vmatmul.mubr.msk.f32.gmra.mxu0 %vm538_vm1, %v9038_v48 }
  0xb3   : > { %7547 = vmatmul.mubr.msk.f32.gmra.mxu1 %vm538_vm1, %v9016_v44  ;;  %7523 = vmatprep.mubr.msk.f32.mxu0 %vm538_vm1, %v9061_v52 }
  0xb4   : > { %7549 = vmatprep.mubr.msk.f32.mxu1 %vm538_vm1, %v9031_v47  ;;  %7564 = vmatpush3.msra.mxu0 %v9028_v46 }
  0xb5   : > { %7590 = vmatpush3.msra.mxu1 %v9047_v49  ;;  %7565 = vmatprep.subr.mxu0 %v9052_v50 }
  0xb6   : > { %7591 = vmatprep.subr.mxu1 %v9081_v55  ;;  %7524 = vmatmul.mubr.msk.f32.gmra.mxu0 %vm538_vm1, %v9071_v54 }
  0xb7   : > { %7550 = vmatmul.mubr.msk.f32.gmra.mxu1 %vm538_vm1, %v9058_v51  ;;  %7526 = vmatprep.mubr.msk.f32.mxu0 %vm538_vm1, %v9095_v58 }
  0xb8   : > { %7552 = vmatprep.mubr.msk.f32.mxu1 %vm538_vm1, %v9067_v53  ;;  %7566 = vmatpush3.msra.mxu0 %v9052_v50 }
  0xb9   : > { %7592 = vmatpush3.msra.mxu1 %v9081_v55  ;;  %7567 = vmatprep.subr.mxu0 %v9086_v56 }
  0xba   : > { %7593 = vmatprep.subr.mxu1 %v9115_v61  ;;  %7527 = vmatmul.mubr.msk.f32.gmra.mxu0 %vm538_vm1, %v9104_v60 }
  0xbb   : > { %7553 = vmatmul.mubr.msk.f32.gmra.mxu1 %vm538_vm1, %v9092_v57  ;;  %7529 = vmatprep.mubr.msk.f32.mxu0 %vm538_vm1, %v9130_v0 }
  0xbc   : > { %7555 = vmatprep.mubr.msk.f32.mxu1 %vm538_vm1, %v9101_v59  ;;  %7568 = vmatpush3.msra.mxu0 %v9086_v56 }
  0xbd   : > { %7594 = vmatpush3.msra.mxu1 %v9115_v61  ;;  %7613 = vmatprep.subr.msk.mxu0 %vm575_vm0, %v9120_v62 }
  0xbe   : > { %7639 = vmatprep.subr.msk.mxu1 %vm575_vm0, %v9150_v3  ;;  %7530 = vmatmul.mubr.msk.f32.gmra.mxu0 %vm538_vm1, %v9137_v2 }
  0xbf   : > { %7556 = vmatmul.mubr.msk.f32.gmra.mxu1 %vm538_vm1, %v9127_v63  ;;  %7532 = vmatprep.mubr.msk.f32.mxu0 %vm538_vm1, %v9160_v5 }
  0xc0   : > { %7558 = vmatprep.mubr.msk.f32.mxu1 %vm538_vm1, %v9134_v1 }
  0xc2   : > { %7533 = vmatmul.mubr.msk.f32.gmra.mxu0 %vm538_vm1, %v9274_v14 }
  0xc3   : > { %7559 = vmatmul.mubr.msk.f32.gmra.mxu1 %vm538_vm1, %v9157_v4  ;;  %7569 = vmatprep.mubr.msk.f32.mxu0 %vm538_vm1, %v8980_v38 }
  0xc4   : > { %7595 = vmatprep.mubr.msk.f32.mxu1 %vm538_vm1, %v9009_v43 }
  0xc6   : > { %7570 = vmatmul.mubr.msk.f32.vlgmr.msra.gmra.mxu0 %vm538_vm1, %v9002_v42 }
  0xc7   : > { %7596 = vmatmul.mubr.msk.f32.vlgmr.msra.gmra.mxu1 %vm538_vm1, %v9019_v45  ;;  %7614 = vmatpush3.msk.msra.mxu0 %vm575_vm0, %v9120_v62 }
  0xc8   : > { %7572 = vmatprep.mubr.msk.f32.mxu0 %vm538_vm1, %v9016_v44  ;;  %7640 = vmatpush3.msk.msra.mxu1 %vm575_vm0, %v9150_v3 }
  0xc9   : > { %7598 = vmatprep.mubr.msk.f32.mxu1 %vm538_vm1, %v9038_v48  ;;  %7615 = vmatprep.subr.mxu0 %v9180_v6 }
  0xca   : > { %7641 = vmatprep.subr.mxu1 %v9185_v7  ;;  %7573 = vmatmul.mubr.msk.f32.gmra.mxu0 %vm538_vm1, %v9031_v47 }
  0xcb   : > { %7599 = vmatmul.mubr.msk.f32.gmra.mxu1 %vm538_vm1, %v9061_v52  ;;  %7575 = vmatprep.mubr.msk.f32.mxu0 %vm538_vm1, %v9058_v51 }
  0xcc   : > { %7616 = vmatpush3.msra.mxu0 %v9180_v6  ;;  %7601 = vmatprep.mubr.msk.f32.mxu1 %vm538_vm1, %v9071_v54 }
  0xcd   : > { %7642 = vmatpush3.msra.mxu1 %v9185_v7  ;;  %7617 = vmatprep.subr.mxu0 %v9204_v8 }
  0xce   : > { %7643 = vmatprep.subr.mxu1 %v9209_v9  ;;  %7576 = vmatmul.mubr.msk.f32.gmra.mxu0 %vm538_vm1, %v9067_v53 }
  0xcf   : > { %7602 = vmatmul.mubr.msk.f32.gmra.mxu1 %vm538_vm1, %v9095_v58  ;;  %7578 = vmatprep.mubr.msk.f32.mxu0 %vm538_vm1, %v9092_v57 }
  0xd0   : > { %7604 = vmatprep.mubr.msk.f32.mxu1 %vm538_vm1, %v9104_v60  ;;  %7618 = vmatpush3.msra.mxu0 %v9204_v8 }
  0xd1   : > { %7644 = vmatpush3.msra.mxu1 %v9209_v9  ;;  %7619 = vmatprep.subr.mxu0 %v9226_v10 }
  0xd2   : > { %7645 = vmatprep.subr.mxu1 %v9231_v11  ;;  %7579 = vmatmul.mubr.msk.f32.gmra.mxu0 %vm538_vm1, %v9101_v59 }
  0xd3   : > { %7605 = vmatmul.mubr.msk.f32.gmra.mxu1 %vm538_vm1, %v9130_v0  ;;  %7581 = vmatprep.mubr.msk.f32.mxu0 %vm538_vm1, %v9127_v63 }
  0xd4   : > { %7607 = vmatprep.mubr.msk.f32.mxu1 %vm538_vm1, %v9137_v2  ;;  %7620 = vmatpush3.msra.mxu0 %v9226_v10 }
  0xd5   : > { %7646 = vmatpush3.msra.mxu1 %v9231_v11  ;;  %7665 = vmatprep.subr.msk.mxu0 %vm575_vm0, %v9248_v12 }
  0xd6   : > { %7691 = vmatprep.subr.msk.mxu1 %vm575_vm0, %v9253_v13  ;;  %7582 = vmatmul.mubr.msk.f32.gmra.mxu0 %vm538_vm1, %v9134_v1 }
  0xd7   : > { %7608 = vmatmul.mubr.msk.f32.gmra.mxu1 %vm538_vm1, %v9160_v5  ;;  %7584 = vmatprep.mubr.msk.f32.mxu0 %vm538_vm1, %v9157_v4 }
  0xd8   : > { %7610 = vmatprep.mubr.msk.f32.mxu1 %vm538_vm1, %v9274_v14 }
  0xda   : > { %7585 = vmatmul.mubr.msk.f32.gmra.mxu0 %vm538_vm1, %v9277_v15 }
  0xdb   : > { %7611 = vmatmul.mubr.msk.f32.gmra.mxu1 %vm538_vm1, %v9388_v24  ;;  %7621 = vmatprep.mubr.msk.f32.mxu0 %vm538_vm1, %v9002_v42 }
  0xdc   : > { %7647 = vmatprep.mubr.msk.f32.mxu1 %vm538_vm1, %v8983_v39 }
  0xde   : > { %7622 = vmatmul.mubr.msk.f32.vlgmr.msra.gmra.mxu0 %vm538_vm1, %v9016_v44 }
  0xdf   : > { %7648 = vmatmul.mubr.msk.f32.vlgmr.msra.gmra.mxu1 %vm538_vm1, %v9009_v43  ;;  %7666 = vmatpush3.msk.msra.mxu0 %vm575_vm0, %v9248_v12 }
  0xe0   : > { %7624 = vmatprep.mubr.msk.f32.mxu0 %vm538_vm1, %v9031_v47  ;;  %7692 = vmatpush3.msk.msra.mxu1 %vm575_vm0, %v9253_v13 }
  0xe1   : > { %7650 = vmatprep.mubr.msk.f32.mxu1 %vm538_vm1, %v9019_v45  ;;  %7667 = vmatprep.subr.mxu0 %v9294_v16 }
  0xe2   : > { %7693 = vmatprep.subr.mxu1 %v9299_v17  ;;  %7625 = vmatmul.mubr.msk.f32.gmra.mxu0 %vm538_vm1, %v9058_v51 }
  0xe3   : > { %7651 = vmatmul.mubr.msk.f32.gmra.mxu1 %vm538_vm1, %v9038_v48  ;;  %7627 = vmatprep.mubr.msk.f32.mxu0 %vm538_vm1, %v9067_v53 }
  0xe4   : > { %7668 = vmatpush3.msra.mxu0 %v9294_v16  ;;  %7653 = vmatprep.mubr.msk.f32.mxu1 %vm538_vm1, %v9061_v52 }
  0xe5   : > { %7694 = vmatpush3.msra.mxu1 %v9299_v17  ;;  %7669 = vmatprep.subr.mxu0 %v9318_v18 }
  0xe6   : > { %7695 = vmatprep.subr.mxu1 %v9323_v19  ;;  %7628 = vmatmul.mubr.msk.f32.gmra.mxu0 %vm538_vm1, %v9092_v57 }
  0xe7   : > { %7654 = vmatmul.mubr.msk.f32.gmra.mxu1 %vm538_vm1, %v9071_v54  ;;  %7630 = vmatprep.mubr.msk.f32.mxu0 %vm538_vm1, %v9101_v59 }
  0xe8   : > { %7656 = vmatprep.mubr.msk.f32.mxu1 %vm538_vm1, %v9095_v58  ;;  %7670 = vmatpush3.msra.mxu0 %v9318_v18 }
  0xe9   : > { %7696 = vmatpush3.msra.mxu1 %v9323_v19  ;;  %7671 = vmatprep.subr.mxu0 %v9340_v20 }
  0xea   : > { %7697 = vmatprep.subr.mxu1 %v9345_v21  ;;  %7631 = vmatmul.mubr.msk.f32.gmra.mxu0 %vm538_vm1, %v9127_v63 }
  0xeb   : > { %7657 = vmatmul.mubr.msk.f32.gmra.mxu1 %vm538_vm1, %v9104_v60  ;;  %7633 = vmatprep.mubr.msk.f32.mxu0 %vm538_vm1, %v9134_v1 }
  0xec   : > { %7659 = vmatprep.mubr.msk.f32.mxu1 %vm538_vm1, %v9130_v0  ;;  %7672 = vmatpush3.msra.mxu0 %v9340_v20 }
  0xed   : > { %7698 = vmatpush3.msra.mxu1 %v9345_v21  ;;  %7717 = vmatprep.subr.msk.mxu0 %vm575_vm0, %v9362_v22 }
  0xee   : > { %7743 = vmatprep.subr.msk.mxu1 %vm575_vm0, %v12276_v28  ;;  %7634 = vmatmul.mubr.msk.f32.gmra.mxu0 %vm538_vm1, %v9157_v4 }
  0xef   : > { %7660 = vmatmul.mubr.msk.f32.gmra.mxu1 %vm538_vm1, %v9137_v2  ;;  %7636 = vmatprep.mubr.msk.f32.mxu0 %vm538_vm1, %v9277_v15 }
  0xf0   : > { %7662 = vmatprep.mubr.msk.f32.mxu1 %vm538_vm1, %v9160_v5 }
  0xf2   : > { %7637 = vmatmul.mubr.msk.f32.gmra.mxu0 %vm538_vm1, %v9759_v29 }
  0xf3   : > { %7663 = vmatmul.mubr.msk.f32.gmra.mxu1 %vm538_vm1, %v9274_v14  ;;  %7673 = vmatprep.mubr.msk.f32.mxu0 %vm538_vm1, %v8970_v36  ;;  %v12277_v36 = vld [vmem:[#allocation7_spill] sm:$0xff] }
  0xf4   : > { %7699 = vmatprep.mubr.msk.f32.mxu1 %vm538_vm1, %v8980_v38 }
  0xf6   : > { %v7259_v30 = vpop.f32.mrf.mxu0  ;;  %7674 = vmatmul.mubr.msk.f32.vlgmr.msra.gmra.mxu0 %vm538_vm1, %v8980_v38 }
  0xf7   : > { %v7285_v31 = vpop.f32.mrf.mxu1  ;;  %7700 = vmatmul.mubr.msk.f32.vlgmr.msra.gmra.mxu1 %vm538_vm1, %v9002_v42  ;;  %7718 = vmatpush3.msk.msra.mxu0 %vm575_vm0, %v9362_v22 }
  0xf8   : > { %v9775_v32 = vadd.f32 %v7285_v31, %v7259_v30  ;;  %7676 = vmatprep.mubr.msk.f32.mxu0 %vm538_vm1, %v9002_v42  ;;  %v645_v33 = vpop.f32.mrf.mxu0  ;;  %7744 = vmatpush3.msk.msra.mxu1 %vm575_vm0, %v12276_v28 }
  0xf9   : > { %v809_v34 = vpop.f32.mrf.mxu1  ;;  %7702 = vmatprep.mubr.msk.f32.mxu1 %vm538_vm1, %v9016_v44  ;;  %7719 = vmatprep.subr.mxu0 %v12277_v36 }
  0xfa   : > { %v9785_v35 = vadd.f32 %v809_v34, %v645_v33  ;;  %7745 = vmatprep.subr.mxu1 %v9410_v26  ;;  %v7262_v38 = vpop.f32.mrf.mxu0  ;;  %7677 = vmatmul.mubr.msk.f32.gmra.mxu0 %vm538_vm1, %v9016_v44 }
  0xfb   : > { %v7288_v39 = vpop.f32.mrf.mxu1  ;;  %7703 = vmatmul.mubr.msk.f32.gmra.mxu1 %vm538_vm1, %v9031_v47  ;;  %7679 = vmatprep.mubr.msk.f32.mxu0 %vm538_vm1, %v9031_v47 }
  0xfc   : > { %v9793_v40 = vadd.f32 %v7288_v39, %v7262_v38  ;;  %7720 = vmatpush3.msra.mxu0 %v12277_v36  ;;  %v655_v41 = vpop.f32.mrf.mxu0  ;;  %7705 = vmatprep.mubr.msk.f32.mxu1 %vm538_vm1, %v9058_v51 }
  0xfd   : > { %v819_v46 = vpop.f32.mrf.mxu1  ;;  %7746 = vmatpush3.msra.mxu1 %v9410_v26  ;;  %7721 = vmatprep.subr.mxu0 %v9429_v27 }
  0xfe   : > { %v9801_v49 = vadd.f32 %v819_v46, %v655_v41  ;;  %7747 = vmatprep.subr.mxu1 %v9434_v37  ;;  %v7265_v50 = vpop.f32.mrf.mxu0  ;;  %7680 = vmatmul.mubr.msk.f32.gmra.mxu0 %vm538_vm1, %v9058_v51 }
  0xff   : > { %v7291_v55 = vpop.f32.mrf.mxu1  ;;  %7706 = vmatmul.mubr.msk.f32.gmra.mxu1 %vm538_vm1, %v9067_v53  ;;  %7682 = vmatprep.mubr.msk.f32.mxu0 %vm538_vm1, %v9067_v53 }
 0x100   : > { %v9809_v56 = vadd.f32 %v7291_v55, %v7265_v50  ;;  %7708 = vmatprep.mubr.msk.f32.mxu1 %vm538_vm1, %v9092_v57  ;;  %v665_v61 = vpop.f32.mrf.mxu0  ;;  %7722 = vmatpush3.msra.mxu0 %v9429_v27 }
 0x101   : > { %v829_v62 = vpop.f32.mrf.mxu1  ;;  %7748 = vmatpush3.msra.mxu1 %v9434_v37  ;;  %7723 = vmatprep.subr.mxu0 %v9451_v23 }
 0x102   : > { %v9817_v3 = vadd.f32 %v829_v62, %v665_v61  ;;  %7749 = vmatprep.subr.mxu1 %v9456_v25  ;;  %v7268_v6 = vpop.f32.mrf.mxu0  ;;  %7683 = vmatmul.mubr.msk.f32.gmra.mxu0 %vm538_vm1, %v9092_v57 }
 0x103   : > { %v7294_v7 = vpop.f32.mrf.mxu1  ;;  %7709 = vmatmul.mubr.msk.f32.gmra.mxu1 %vm538_vm1, %v9101_v59  ;;  %7685 = vmatprep.mubr.msk.f32.mxu0 %vm538_vm1, %v9101_v59 }
 0x104   : > { %v845_v8 = vadd.f32 %v7294_v7, %v7268_v6  ;;  %7711 = vmatprep.mubr.msk.f32.mxu1 %vm538_vm1, %v9127_v63  ;;  %v675_v9 = vpop.f32.mrf.mxu0  ;;  %7724 = vmatpush3.msra.mxu0 %v9451_v23 }
 0x105   : > { %v839_v10 = vpop.f32.mrf.mxu1  ;;  %7750 = vmatpush3.msra.mxu1 %v9456_v25 }
 0x106   : > { %v9831_v11 = vadd.f32 %v839_v10, %v675_v9  ;;  %v7271_v12 = vpop.f32.mrf.mxu0  ;;  %7686 = vmatmul.mubr.msk.f32.gmra.mxu0 %vm538_vm1, %v9127_v63 }
 0x107   : > { %v7297_v13 = vpop.f32.mrf.mxu1  ;;  %7712 = vmatmul.mubr.msk.f32.gmra.mxu1 %vm538_vm1, %v9134_v1  ;;  %7688 = vmatprep.mubr.msk.f32.mxu0 %vm538_vm1, %v9134_v1 }
 0x108   : > { %v855_v16 = vadd.f32 %v7297_v13, %v7271_v12  ;;  %7714 = vmatprep.mubr.msk.f32.mxu1 %vm538_vm1, %v9157_v4  ;;  %v9841_v17 = vpop.f32.mrf.mxu0 }
 0x109   : > { %v9843_v18 = vpop.f32.mrf.mxu1 }
 0x10a   : > { %v7274_v19 = vpop.f32.mrf.mxu0  ;;  %7689 = vmatmul.mubr.msk.f32.gmra.mxu0 %vm538_vm1, %v9157_v4 }
 0x10b   : > { %v7300_v20 = vpop.f32.mrf.mxu1  ;;  %7715 = vmatmul.mubr.msk.f32.gmra.mxu1 %vm538_vm1, %v9277_v15  ;;  %7725 = vmatprep.mubr.msk.f32.mxu0 %vm538_vm1, %v9009_v43 }
 0x10c   : > { %v865_v21 = vadd.f32 %v7300_v20, %v7274_v19  ;;  %7751 = vmatprep.mubr.msk.f32.mxu1 %vm538_vm1, %v9002_v42  ;;  %v9853_v22 = vpop.f32.mrf.mxu0 }
 0x10d   : > { %v9855_v23 = vpop.f32.mrf.mxu1 }
 0x10e   : > { %v7311_v25 = vpop.f32.mrf.mxu0  ;;  %7726 = vmatmul.mubr.msk.f32.vlgmr.msra.gmra.mxu0 %vm538_vm1, %v9019_v45 }
 0x10f   : > { %v7337_v26 = vpop.f32.mrf.mxu1  ;;  %7752 = vmatmul.mubr.msk.f32.vlgmr.msra.gmra.mxu1 %vm538_vm1, %v9016_v44  ;;  %v1005_v27 = vadd.f32 %v7311_v25, %v9775_v32  ;;  %7728 = vmatprep.mubr.msk.f32.mxu0 %vm538_vm1, %v9038_v48 }
 0x110   : > { %7754 = vmatprep.mubr.msk.f32.mxu1 %vm538_vm1, %v9031_v47  ;;  %v9866_v42 = vpop.f32.mrf.mxu0 }
 0x111   : > { %v9868_v43 = vpop.f32.mrf.mxu1  ;;  %v1153_v37 = vadd.f32 %v7337_v26, %v1005_v27 }
 0x112   : > { %v7314_v28 = vpop.f32.mrf.mxu0  ;;  %7729 = vmatmul.mubr.msk.f32.gmra.mxu0 %vm538_vm1, %v9061_v52 }
 0x113   : > { %v7340_v30 = vpop.f32.mrf.mxu1  ;;  %7755 = vmatmul.mubr.msk.f32.gmra.mxu1 %vm538_vm1, %v9058_v51  ;;  %v1007_v44 = vadd.f32 %v7314_v28, %v9793_v40  ;;  %7731 = vmatprep.mubr.msk.f32.mxu0 %vm538_vm1, %v9071_v54 }
 0x114   : > { %7757 = vmatprep.mubr.msk.f32.mxu1 %vm538_vm1, %v9067_v53  ;;  %v9879_v45 = vpop.f32.mrf.mxu0 }
 0x115   : > { %v9881_v47 = vpop.f32.mrf.mxu1  ;;  %v1155_v48 = vadd.f32 %v7340_v30, %v1007_v44 }
 0x116   : > { %v7317_v31 = vpop.f32.mrf.mxu0  ;;  %7732 = vmatmul.mubr.msk.f32.gmra.mxu0 %vm538_vm1, %v9095_v58 }
 0x117   : > { %v7343_v32 = vpop.f32.mrf.mxu1  ;;  %7758 = vmatmul.mubr.msk.f32.gmra.mxu1 %vm538_vm1, %v9092_v57  ;;  %v1009_v51 = vadd.f32 %v7317_v31, %v9809_v56  ;;  %7734 = vmatprep.mubr.msk.f32.mxu0 %vm538_vm1, %v9104_v60 }
 0x118   : > { %7760 = vmatprep.mubr.msk.f32.mxu1 %vm538_vm1, %v9101_v59  ;;  %v9892_v52 = vpop.f32.mrf.mxu0 }
 0x119   : > { %v9894_v53 = vpop.f32.mrf.mxu1  ;;  %v1157_v54 = vadd.f32 %v7343_v32, %v1009_v51 }
 0x11a   : > { %v7320_v33 = vpop.f32.mrf.mxu0  ;;  %7735 = vmatmul.mubr.msk.f32.gmra.mxu0 %vm538_vm1, %v9130_v0 }
 0x11b   : > { %v7346_v34 = vpop.f32.mrf.mxu1  ;;  %7761 = vmatmul.mubr.msk.f32.gmra.mxu1 %vm538_vm1, %v9127_v63  ;;  %v1011_v57 = vadd.f32 %v7320_v33, %v845_v8  ;;  %7737 = vmatprep.mubr.msk.f32.mxu0 %vm538_vm1, %v9137_v2 }
 0x11c   : > { %7763 = vmatprep.mubr.msk.f32.mxu1 %vm538_vm1, %v9134_v1  ;;  %v9904_v58 = vpop.f32.mrf.mxu0 }
 0x11d   : > { %v9906_v59 = vpop.f32.mrf.mxu1  ;;  %v1159_v60 = vadd.f32 %v7346_v34, %v1011_v57  ;;  %v6253_v34 = vld [vmem:[%s12106_s3 + $0x160] sm:$0xff] }
 0x11e   : > { %v7323_v36 = vpop.f32.mrf.mxu0  ;;  %7738 = vmatmul.mubr.msk.f32.gmra.mxu0 %vm538_vm1, %v9160_v5  ;;  %7769 = vmatprep.subr.mxu0 %v6253_v34 }
 0x11f   : > { %v7349_v38 = vpop.f32.mrf.mxu1  ;;  %7764 = vmatmul.mubr.msk.f32.gmra.mxu1 %vm538_vm1, %v9157_v4  ;;  %v1013_v63 = vadd.f32 %v7323_v36, %v855_v16  ;;  %7740 = vmatprep.mubr.msk.f32.mxu0 %vm538_vm1, %v9274_v14 }
 0x120   : > { %7766 = vmatprep.mubr.msk.f32.mxu1 %vm538_vm1, %v9277_v15  ;;  %v9916_v0 = vpop.f32.mrf.mxu0  ;;  %7770 = vmatpush3.msra.mxu0 %v6253_v34 }
 0x121   : > { %v9918_v1 = vpop.f32.mrf.mxu1  ;;  %v1161_v2 = vadd.f32 %v7349_v38, %v1013_v63  ;;  %v6252_v38 = vld [vmem:[%s12106_s3 + $0x158] sm:$0xff]  ;;  %v3419_v63 = vld [vmem:[%s12106_s3 + $0x70] sm:$0xff] }
 0x122   : > { %12278 = vst [vmem:[#allocation6_spill] sm:$0xff] %v9918_v1  ;;  %v7326_v39 = vpop.f32.mrf.mxu0  ;;  %7741 = vmatmul.mubr.msk.f32.gmra.mxu0 %vm538_vm1, %v9388_v24  ;;  %7771 = vmatprep.subr.mxu0 %v6252_v38 }
 0x123   : > { %v7352_v40 = vpop.f32.mrf.mxu1  ;;  %7767 = vmatmul.mubr.msk.f32.gmra.mxu1 %vm538_vm1, %v9759_v29  ;;  %v1015_v4 = vadd.f32 %v7326_v39, %v865_v21  ;;  %7805 = vmatprep.subr.mxu1 %v3419_v63 }
 0x124   : > { %v9924_v5 = vpop.f32.mrf.mxu0  ;;  %7772 = vmatpush3.msra.mxu0 %v6252_v38  ;;  %7806 = vmatpush3.msra.mxu1 %v3419_v63  ;;  %v3415_v63 = vld [vmem:[%s12106_s3 + $0x50] sm:$0xff] }
 0x125   : > { %12279 = vst [vmem:[#allocation7_spill] sm:$0xff] %v9924_v5  ;;  %v9926_v14 = vpop.f32.mrf.mxu1  ;;  %v1163_v41 = vadd.f32 %v7352_v40, %v1015_v4  ;;  %v6251_v4 = vld [vmem:[%s12106_s3 + $0x150] sm:$0xff] }
 0x126   : > { %12280 = vst [vmem:[#allocation8_spill] sm:$0xff] %v9926_v14  ;;  %v7363_v15 = vpop.f32.mrf.mxu0  ;;  %7773 = vmatprep.subr.mxu0 %v6251_v4 }
 0x127   : > { %v7389_v46 = vpop.f32.mrf.mxu1  ;;  %v9928_v50 = vadd.f32 %v7363_v15, %v1153_v37  ;;  %7774 = vmatpush3.msra.mxu0 %v6251_v4  ;;  %v6247_v4 = vld [vmem:[%s12106_s3 + $0x130] sm:$0xff] }
 0x128   : > { %v9930_v55 = vpop.f32.mrf.mxu0 }
 0x129   : > { %v9932_v56 = vpop.f32.mrf.mxu1 }
 0x12a   : > { %v7366_v61 = vpop.f32.mrf.mxu0 }
 0x12b   : > { %v7392_v62 = vpop.f32.mrf.mxu1  ;;  %v9934_v24 = vadd.f32 %v7366_v61, %v1155_v48 }
 0x12c   : > { %v9936_v6 = vpop.f32.mrf.mxu0 }
 0x12d   : > { %12281 = vst [vmem:[#allocation9_spill] sm:$0xff] %v9934_v24  ;;  %v9938_v29 = vpop.f32.mrf.mxu1 }
 0x12e   : > { %v7369_v7 = vpop.f32.mrf.mxu0 }
 0x12f   : > { %v7395_v8 = vpop.f32.mrf.mxu1  ;;  %v9940_v9 = vadd.f32 %v7369_v7, %v1157_v54  ;;  %v3417_v7 = vld [vmem:[%s12106_s3 + $0x60] sm:$0xff] }
 0x130   : > { %v9942_v10 = vpop.f32.mrf.mxu0 }
 0x131   : > { %12282 = vst [vmem:[#allocation10_spill] sm:$0xff] %v9940_v9  ;;  %v9944_v12 = vpop.f32.mrf.mxu1 }
 0x132   : > { %v7372_v13 = vpop.f32.mrf.mxu0 }
 0x133   : > { %v9946_v16 = vpop.f32.mrf.mxu1  ;;  %v9948_v19 = vadd.f32 %v7372_v13, %v1159_v60 }
 0x134   : > { %v9950_v20 = vpop.f32.mrf.mxu0 }
 0x135   : > { %12283 = vst [vmem:[#allocation11_spill] sm:$0xff] %v9948_v19  ;;  %v9952_v21 = vpop.f32.mrf.mxu1 }
 0x136   : > { %v7375_v25 = vpop.f32.mrf.mxu0 }
 0x137   : > { %v9954_v26 = vpop.f32.mrf.mxu1  ;;  %v9956_v27 = vadd.f32 %v7375_v25, %v1161_v2 }
 0x138   : > { %v9958_v37 = vpop.f32.mrf.mxu0 }
 0x139   : > { %12284 = vst [vmem:[#allocation12_spill] sm:$0xff] %v9956_v27  ;;  %12285 = vst [vmem:[#allocation13_spill] sm:$0xff] %v9958_v37  ;;  %v9960_v28 = vpop.f32.mrf.mxu1 }
 0x13a   : > { %v7378_v30 = vpop.f32.mrf.mxu0 }
 0x13b   : > { %v9962_v44 = vpop.f32.mrf.mxu1  ;;  %v9964_v48 = vadd.f32 %v7378_v30, %v1163_v41  ;;  %v3418_v41 = vld [vmem:[%s12106_s3 + $0x68] sm:$0xff] }
 0x13c   : > { %v9966_v31 = vpop.f32.mrf.mxu0  ;;  %7807 = vmatprep.subr.mxu1 %v3418_v41 }
 0x13d   : > { %12286 = vst [vmem:[#allocation14_spill] sm:$0xff] %v9964_v48  ;;  %12287 = vst [vmem:[#allocation15_spill] sm:$0xff] %v9966_v31  ;;  %v9968_v32 = vpop.f32.mrf.mxu1  ;;  %7808 = vmatpush3.msra.mxu1 %v3418_v41  ;;  %v3414_v41 = vld [vmem:[%s12106_s3 + $0x48] sm:$0xff] }
 0x13e   : > { %v7415_v51 = vpop.f32.mrf.mxu0  ;;  %7809 = vmatprep.subr.mxu1 %v3417_v7 }
 0x13f   : > { %v7441_v54 = vpop.f32.mrf.mxu1  ;;  %v1525_v33 = vadd.f32 %v7415_v51, %v7389_v46  ;;  %7810 = vmatpush3.msra.mxu1 %v3417_v7  ;;  %v6249_v51 = vld [vmem:[%s12106_s3 + $0x140] sm:$0xff] }
 0x140   : > { %v9973_v57 = vpop.f32.mrf.mxu0 }
 0x141   : > { %v9975_v60 = vpop.f32.mrf.mxu1  ;;  %v9977_v36 = vadd.f32 %v7441_v54, %v1525_v33  ;;  %v3416_v54 = vld [vmem:[%s12106_s3 + $0x58] sm:$0xff] }
 0x142   : > { %v7418_v2 = vpop.f32.mrf.mxu0  ;;  %7811 = vmatprep.subr.mxu1 %v3416_v54 }
 0x143   : > { %v7444_v39 = vpop.f32.mrf.mxu1  ;;  %v1535_v40 = vadd.f32 %v7418_v2, %v7392_v62  ;;  %v6250_v62 = vld [vmem:[%s12106_s3 + $0x148] sm:$0xff]  ;;  %7812 = vmatpush3.msra.mxu1 %v3416_v54 }
 0x144   : > { %v9991_v15 = vpop.f32.mrf.mxu0  ;;  %7775 = vmatprep.subr.mxu0 %v6250_v62  ;;  %7813 = vmatprep.subr.mxu1 %v3415_v63 }
 0x145   : > { %v9993_v46 = vpop.f32.mrf.mxu1  ;;  %v9995_v61 = vadd.f32 %v7444_v39, %v1535_v40  ;;  %7776 = vmatpush3.msra.mxu0 %v6250_v62  ;;  %7814 = vmatpush3.msra.mxu1 %v3415_v63  ;;  %v3412_v63 = vld [vmem:[%s12106_s3 + $0x38] sm:$0xff] }
 0x146   : > { %v7421_v13 = vpop.f32.mrf.mxu0  ;;  %7777 = vmatprep.subr.mxu0 %v6249_v51  ;;  %7815 = vmatprep.subr.mxu1 %v3414_v41 }
 0x147   : > { %v7447_v25 = vpop.f32.mrf.mxu1  ;;  %v1545_v30 = vadd.f32 %v7421_v13, %v7395_v8  ;;  %7778 = vmatpush3.msra.mxu0 %v6249_v51  ;;  %v6248_v8 = vld [vmem:[%s12106_s3 + $0x138] sm:$0xff]  ;;  %7816 = vmatpush3.msra.mxu1 %v3414_v41 }
 0x148   : > { %v10009_v33 = vpop.f32.mrf.mxu0  ;;  %7779 = vmatprep.subr.mxu0 %v6248_v8 }
 0x149   : > { %v10011_v34 = vpop.f32.mrf.mxu1  ;;  %v10013_v38 = vadd.f32 %v7447_v25, %v1545_v30  ;;  %7780 = vmatpush3.msra.mxu0 %v6248_v8  ;;  %v3413_v25 = vld [vmem:[%s12106_s3 + $0x40] sm:$0xff] }
 0x14a   : > { %v7424_v2 = vpop.f32.mrf.mxu0  ;;  %7781 = vmatprep.subr.mxu0 %v6247_v4  ;;  %7817 = vmatprep.subr.mxu1 %v3413_v25  ;;  %v6245_v8 = vld [vmem:[%s12106_s3 + $0x120] sm:$0xff] }
 0x14b   : > { %v7450_v39 = vpop.f32.mrf.mxu1  ;;  %v1555_v40 = vadd.f32 %v7424_v2, %v9946_v16  ;;  %7782 = vmatpush3.msra.mxu0 %v6247_v4  ;;  %v6246_v16 = vld [vmem:[%s12106_s3 + $0x128] sm:$0xff]  ;;  %7818 = vmatpush3.msra.mxu1 %v3413_v25  ;;  %v3411_v4 = vld [vmem:[%s12106_s3 + $0x30] sm:$0xff] }
 0x14c   : > { %v10028_v62 = vpop.f32.mrf.mxu0  ;;  %7783 = vmatprep.subr.mxu0 %v6246_v16  ;;  %7819 = vmatprep.subr.mxu1 %v3412_v63 }
 0x14d   : > { %v10030_v7 = vpop.f32.mrf.mxu1  ;;  %v10032_v13 = vadd.f32 %v7450_v39, %v1555_v40  ;;  %7784 = vmatpush3.msra.mxu0 %v6246_v16  ;;  %7820 = vmatpush3.msra.mxu1 %v3412_v63 }
 0x14e   : > { %v7427_v30 = vpop.f32.mrf.mxu0  ;;  %7785 = vmatprep.subr.mxu0 %v6245_v8  ;;  %7821 = vmatprep.subr.mxu1 %v3411_v4 }
 0x14f   : > { %v7453_v51 = vpop.f32.mrf.mxu1  ;;  %v1565_v54 = vadd.f32 %v7427_v30, %v9954_v26  ;;  %7786 = vmatpush3.msra.mxu0 %v6245_v8  ;;  %v6244_v26 = vld [vmem:[%s12106_s3 + $0x118] sm:$0xff]  ;;  %7822 = vmatpush3.msra.mxu1 %v3411_v4  ;;  %v6243_v30 = vld [vmem:[%s12106_s3 + $0x110] sm:$0xff]  ;;  %v6242_v4 = vld [vmem:[%s12106_s3 + $0x108] sm:$0xff] }
 0x150   : > { %v10047_v2 = vpop.f32.mrf.mxu0  ;;  %7787 = vmatprep.subr.mxu0 %v6244_v26 }
 0x151   : > { %v10049_v39 = vpop.f32.mrf.mxu1  ;;  %v10051_v40 = vadd.f32 %v7453_v51, %v1565_v54  ;;  %7788 = vmatpush3.msra.mxu0 %v6244_v26  ;;  %v3410_v51 = vld [vmem:[%s12106_s3 + $0x28] sm:$0xff] }
 0x152   : > { %v7430_v41 = vpop.f32.mrf.mxu0  ;;  %7789 = vmatprep.subr.mxu0 %v6243_v30  ;;  %7823 = vmatprep.subr.mxu1 %v3410_v51 }
 0x153   : > { %v7456_v16 = vpop.f32.mrf.mxu1  ;;  %v1575_v25 = vadd.f32 %v7430_v41, %v9962_v44  ;;  %7790 = vmatpush3.msra.mxu0 %v6243_v30  ;;  %7824 = vmatpush3.msra.mxu1 %v3410_v51  ;;  %v3409_v41 = vld [vmem:[%s12106_s3 + $0x20] sm:$0xff]  ;;  %v3408_v30 = vld [vmem:[%s12106_s3 + $0x18] sm:$0xff] }
 0x154   : > { %v10066_v54 = vpop.f32.mrf.mxu0  ;;  %7791 = vmatprep.subr.mxu0 %v6242_v4  ;;  %7825 = vmatprep.subr.mxu1 %v3409_v41 }
 0x155   : > { %v10068_v8 = vpop.f32.mrf.mxu1  ;;  %v10070_v63 = vadd.f32 %v7456_v16, %v1575_v25  ;;  %7792 = vmatpush3.msra.mxu0 %v6242_v4  ;;  %7826 = vmatpush3.msra.mxu1 %v3409_v41  ;;  %v6241_v25 = vld [vmem:[%s12106_s3 + $0x100] sm:$0xff]  ;;  %v6240_v4 = vld [vmem:[%s12106_s3 + $0xf8] sm:$0xff]  ;;  %v3407_v41 = vld [vmem:[%s12106_s3 + $0x10] sm:$0xff] }
 0x156   : > { %v7467_v44 = vpop.f32.mrf.mxu0  ;;  %7793 = vmatprep.subr.mxu0 %v6241_v25  ;;  %7827 = vmatprep.subr.mxu1 %v3408_v30 }
 0x157   : > { %v7493_v26 = vpop.f32.mrf.mxu1  ;;  %v1857_v31 = vadd.f32 %v7467_v44, %v9977_v36  ;;  %v1540_v36 = vadd.f32 %v10009_v33, %v9944_v12  ;;  %7794 = vmatpush3.msra.mxu0 %v6241_v25  ;;  %7828 = vmatpush3.msra.mxu1 %v3408_v30  ;;  %v1008_v12 = vadd.f32 %v9892_v52, %v9817_v3  ;;  %v6239_v30 = vld [vmem:[%s12106_s3 + $0xf0] sm:$0xff] }
 0x158   : > { %v10079_v37 = vpop.f32.mrf.mxu0  ;;  %7795 = vmatprep.subr.mxu0 %v6240_v4  ;;  %7829 = vmatprep.subr.mxu1 %v3407_v41 }
 0x159   : > { %v10081_v16 = vpop.f32.mrf.mxu1  ;;  %v10089_v51 = vadd.f32 %v7493_v26, %v1857_v31  ;;  %7796 = vmatpush3.msra.mxu0 %v6240_v4  ;;  %7830 = vmatpush3.msra.mxu1 %v3407_v41  ;;  %v3406_v31 = vld [vmem:[%s12106_s3 + $0x8] sm:$0xff]  ;;  %v1715_v3 = vadd.f32 %v10011_v34, %v1540_v36  ;;  %v3405_v4 = vld [vmem:[%s12106_s3] sm:$0xff]  ;;  %v10123_v41 = vld [vmem:[%s12106_s3 + $0x250] sm:$0xff]  ;;  %v1156_v36 = vadd.f32 %v9894_v53, %v1008_v12 }
 0x15a   : > { %v7470_v44 = vpop.f32.mrf.mxu0  ;;  %7797 = vmatprep.subr.mxu0 %v6239_v30  ;;  %7831 = vmatprep.subr.mxu1 %v3406_v31  ;;  %12289 = vst [vmem:[#allocation17_spill] sm:$0xff] %v10123_v41  ;;  %v1560_v53 = vadd.f32 %v10047_v2, %v9960_v28 }
 0x15b   : > { %v7496_v14 = vpop.f32.mrf.mxu1  ;;  %v1859_v26 = vadd.f32 %v7470_v44, %v9995_v61  ;;  %7798 = vmatpush3.msra.mxu0 %v6239_v30  ;;  %7832 = vmatpush3.msra.mxu1 %v3406_v31  ;;  %v1010_v31 = vadd.f32 %v9904_v58, %v9831_v11 }
 0x15c   : > { %v10104_v33 = vpop.f32.mrf.mxu0  ;;  %7833 = vmatprep.subr.mxu1 %v3405_v4  ;;  %7841 = vmatprep.subr.mxu0 %v10123_v41 }
 0x15d   : > { %v10106_v25 = vpop.f32.mrf.mxu1  ;;  %v10114_v61 = vadd.f32 %v7496_v14, %v1859_v26  ;;  %v1550_v14 = vadd.f32 %v10028_v62, %v9952_v21  ;;  %7834 = vmatpush3.msra.mxu1 %v3405_v4  ;;  %v10137_v21 = vld [vmem:[%s12106_s3 + $0x340] sm:$0xff] }
 0x15e   : > { %v7473_v52 = vpop.f32.mrf.mxu0  ;;  %12290 = vst [vmem:[#allocation18_spill] sm:$0xff] %v10137_v21  ;;  %7877 = vmatprep.subr.mxu1 %v10137_v21 }
 0x15f   : > { %12288 = vst [vmem:[#allocation16_spill] sm:$0xff] %v10114_v61  ;;  %v7499_v44 = vpop.f32.mrf.mxu1  ;;  %v1861_v34 = vadd.f32 %v7473_v52, %v10013_v38  ;;  %v10143_v38 = vadd.f32 %v9942_v10, %v1156_v36  ;;  %v1717_v12 = vadd.f32 %v10030_v7, %v1550_v14  ;;  %v1719_v7 = vadd.f32 %v10049_v39, %v1560_v53 }
 0x160   : > { %v1817_v30 = vpop.f32.mrf.mxu0 }
 0x161   : > { %v1962_v1 = vpop.f32.mrf.mxu1  ;;  %v10139_v62 = vadd.f32 %v7499_v44, %v1861_v34  ;;  %v1860_v26 = vadd.f32 %v1817_v30, %v1715_v3  ;;  %12292 = vst [vmem:[#allocation20_spill] sm:$0xff] %v10143_v38  ;;  %v1158_v3 = vadd.f32 %v9906_v59, %v1010_v31 }
 0x162   : > { %v7476_v11 = vpop.f32.mrf.mxu0 }
 0x163   : > { %12291 = vst [vmem:[#allocation19_spill] sm:$0xff] %v10139_v62  ;;  %v7502_v58 = vpop.f32.mrf.mxu1  ;;  %v10150_v4 = vadd.f32 %v1962_v1, %v1860_v26  ;;  %v1863_v44 = vadd.f32 %v7476_v11, %v10032_v13  ;;  %v10159_v2 = vadd.f32 %v9950_v20, %v1158_v3  ;;  %v1570_v13 = vadd.f32 %v10066_v54, %v9968_v32 }
 0x164   : > { %v1827_v34 = vpop.f32.mrf.mxu0 }
 0x165   : > { %12293 = vst [vmem:[#allocation21_spill] sm:$0xff] %v10150_v4  ;;  %v1972_v30 = vpop.f32.mrf.mxu1  ;;  %v10156_v36 = vadd.f32 %v7502_v58, %v1863_v44  ;;  %v1862_v28 = vadd.f32 %v1827_v34, %v1717_v12  ;;  %12295 = vst [vmem:[#allocation23_spill] sm:$0xff] %v10159_v2  ;;  %v1721_v3 = vadd.f32 %v10068_v8, %v1570_v13 }
 0x166   : > { %v7479_v14 = vpop.f32.mrf.mxu0 }
 0x167   : > { %12294 = vst [vmem:[#allocation22_spill] sm:$0xff] %v10156_v36  ;;  %v7505_v1 = vpop.f32.mrf.mxu1  ;;  %v10166_v26 = vadd.f32 %v1972_v30, %v1862_v28  ;;  %v1865_v31 = vadd.f32 %v7479_v14, %v10051_v40 }
 0x168   : > { %v1837_v11 = vpop.f32.mrf.mxu0 }
 0x169   : > { %12296 = vst [vmem:[#allocation24_spill] sm:$0xff] %v10166_v26  ;;  %v1982_v58 = vpop.f32.mrf.mxu1  ;;  %v10171_v12 = vadd.f32 %v7505_v1, %v1865_v31  ;;  %v1864_v39 = vadd.f32 %v1837_v11, %v1719_v7 }
 0x16a   : > { %v7482_v53 = vpop.f32.mrf.mxu0 }
 0x16b   : > { %12297 = vst [vmem:[#allocation25_spill] sm:$0xff] %v10171_v12  ;;  %v7508_v44 = vpop.f32.mrf.mxu1  ;;  %v10176_v54 = vadd.f32 %v1982_v58, %v1864_v39  ;;  %v1867_v34 = vadd.f32 %v7482_v53, %v10070_v63 }
 0x16c   : > { %v1847_v40 = vpop.f32.mrf.mxu0 }
 0x16d   : > { %12298 = vst [vmem:[#allocation26_spill] sm:$0xff] %v10176_v54  ;;  %v1992_v30 = vpop.f32.mrf.mxu1  ;;  %v10179_v28 = vadd.f32 %v7508_v44, %v1867_v34  ;;  %v1866_v14 = vadd.f32 %v1847_v40, %v1721_v3 }
 0x16e   : > { %v7519_v20 = vpop.f32.mrf.mxu0 }
 0x16f   : > { %12299 = vst [vmem:[#allocation27_spill] sm:$0xff] %v10179_v28  ;;  %v7545_v1 = vpop.f32.mrf.mxu1  ;;  %v10183_v31 = vadd.f32 %v1992_v30, %v1866_v14 }
 0x170   : > { %v2210_v8 = vadd.f32 %v7545_v1, %v7519_v20  ;;  %v2079_v13 = vpop.f32.mrf.mxu0 }
 0x171   : > { %12300 = vst [vmem:[#allocation28_spill] sm:$0xff] %v10183_v31  ;;  %v2204_v11 = vpop.f32.mrf.mxu1 }
 0x172   : > { %v2205_v32 = vadd.f32 %v2204_v11, %v2079_v13  ;;  %v7522_v58 = vpop.f32.mrf.mxu0 }
 0x173   : > { %v7548_v39 = vpop.f32.mrf.mxu1 }
 0x174   : > { %v2220_v59 = vadd.f32 %v7548_v39, %v7522_v58  ;;  %v2089_v63 = vpop.f32.mrf.mxu0 }
 0x175   : > { %v2214_v53 = vpop.f32.mrf.mxu1 }
 0x176   : > { %v2215_v10 = vadd.f32 %v2214_v53, %v2089_v63  ;;  %v7525_v44 = vpop.f32.mrf.mxu0 }
 0x177   : > { %v7551_v34 = vpop.f32.mrf.mxu1 }
 0x178   : > { %v2230_v3 = vadd.f32 %v7551_v34, %v7525_v44  ;;  %v2099_v40 = vpop.f32.mrf.mxu0 }
 0x179   : > { %v2224_v52 = vpop.f32.mrf.mxu1 }
 0x17a   : > { %v2225_v54 = vadd.f32 %v2224_v52, %v2099_v40  ;;  %v7528_v12 = vpop.f32.mrf.mxu0 }
 0x17b   : > { %v7554_v7 = vpop.f32.mrf.mxu1 }
 0x17c   : > { %v2240_v30 = vadd.f32 %v7554_v7, %v7528_v12  ;;  %v2109_v14 = vpop.f32.mrf.mxu0 }
 0x17d   : > { %v2234_v20 = vpop.f32.mrf.mxu1 }
 0x17e   : > { %v2235_v1 = vadd.f32 %v2234_v20, %v2109_v14  ;;  %v7531_v28 = vpop.f32.mrf.mxu0 }
 0x17f   : > { %v7557_v13 = vpop.f32.mrf.mxu1 }
 0x180   : > { %v2250_v11 = vadd.f32 %v7557_v13, %v7531_v28  ;;  %v2119_v48 = vpop.f32.mrf.mxu0 }
 0x181   : > { %v2244_v58 = vpop.f32.mrf.mxu1 }
 0x182   : > { %v2245_v39 = vadd.f32 %v2244_v58, %v2119_v48  ;;  %v7534_v31 = vpop.f32.mrf.mxu0 }
 0x183   : > { %v7560_v63 = vpop.f32.mrf.mxu1 }
 0x184   : > { %v2260_v53 = vadd.f32 %v7560_v63, %v7534_v31  ;;  %v2129_v27 = vpop.f32.mrf.mxu0 }
 0x185   : > { %v2254_v44 = vpop.f32.mrf.mxu1 }
 0x186   : > { %v2255_v34 = vadd.f32 %v2254_v44, %v2129_v27  ;;  %v7571_v21 = vpop.f32.mrf.mxu0 }
 0x187   : > { %v7597_v52 = vpop.f32.mrf.mxu1  ;;  %v2389_v40 = vadd.f32 %v7571_v21, %v2210_v8 }
 0x188   : > { %v2329_v26 = vpop.f32.mrf.mxu0 }
 0x189   : > { %v2466_v12 = vpop.f32.mrf.mxu1  ;;  %v10185_v7 = vadd.f32 %v7597_v52, %v2389_v40  ;;  %v2388_v14 = vadd.f32 %v2329_v26, %v2205_v32 }
 0x18a   : > { %v7574_v20 = vpop.f32.mrf.mxu0 }
 0x18b   : > { %v7600_v2 = vpop.f32.mrf.mxu1  ;;  %v10187_v28 = vadd.f32 %v2466_v12, %v2388_v14  ;;  %v2391_v13 = vadd.f32 %v7574_v20, %v2220_v59 }
 0x18c   : > { %v2339_v48 = vpop.f32.mrf.mxu0 }
 0x18d   : > { %v2476_v58 = vpop.f32.mrf.mxu1  ;;  %v10189_v36 = vadd.f32 %v7600_v2, %v2391_v13  ;;  %v2390_v31 = vadd.f32 %v2339_v48, %v2215_v10 }
 0x18e   : > { %v7577_v63 = vpop.f32.mrf.mxu0 }
 0x18f   : > { %v7603_v27 = vpop.f32.mrf.mxu1  ;;  %v10191_v44 = vadd.f32 %v2476_v58, %v2390_v31  ;;  %v2393_v21 = vadd.f32 %v7577_v63, %v2230_v3 }
 0x190   : > { %v2349_v8 = vpop.f32.mrf.mxu0 }
 0x191   : > { %v2486_v19 = vpop.f32.mrf.mxu1  ;;  %v10193_v52 = vadd.f32 %v7603_v27, %v2393_v21  ;;  %v2392_v26 = vadd.f32 %v2349_v8, %v2225_v54 }
 0x192   : > { %v7580_v32 = vpop.f32.mrf.mxu0 }
 0x193   : > { %v7606_v40 = vpop.f32.mrf.mxu1  ;;  %v10195_v12 = vadd.f32 %v2486_v19, %v2392_v26  ;;  %v2395_v59 = vadd.f32 %v7580_v32, %v2240_v30 }
 0x194   : > { %v2359_v14 = vpop.f32.mrf.mxu0 }
 0x195   : > { %12301 = vst [vmem:[#allocation29_spill] sm:$0xff] %v10195_v12  ;;  %v2496_v20 = vpop.f32.mrf.mxu1  ;;  %v10197_v2 = vadd.f32 %v7606_v40, %v2395_v59  ;;  %v2394_v10 = vadd.f32 %v2359_v14, %v2235_v1 }
 0x196   : > { %v7583_v13 = vpop.f32.mrf.mxu0 }
 0x197   : > { %12302 = vst [vmem:[#allocation30_spill] sm:$0xff] %v10197_v2  ;;  %v7609_v48 = vpop.f32.mrf.mxu1  ;;  %v10199_v58 = vadd.f32 %v2496_v20, %v2394_v10  ;;  %v2397_v3 = vadd.f32 %v7583_v13, %v2250_v11 }
 0x198   : > { %v2369_v31 = vpop.f32.mrf.mxu0 }
 0x199   : > { %12303 = vst [vmem:[#allocation31_spill] sm:$0xff] %v10199_v58  ;;  %v2506_v63 = vpop.f32.mrf.mxu1  ;;  %v2534_v27 = vadd.f32 %v7609_v48, %v2397_v3  ;;  %v2396_v21 = vadd.f32 %v2369_v31, %v2245_v39 }
 0x19a   : > { %v7586_v54 = vpop.f32.mrf.mxu0 }
 0x19b   : > { %v7612_v8 = vpop.f32.mrf.mxu1  ;;  %v2533_v41 = vadd.f32 %v2506_v63, %v2396_v21  ;;  %v2399_v19 = vadd.f32 %v7586_v54, %v2260_v53 }
 0x19c   : > { %v2379_v26 = vpop.f32.mrf.mxu0 }
 0x19d   : > { %v2516_v30 = vpop.f32.mrf.mxu1  ;;  %v2536_v32 = vadd.f32 %v7612_v8, %v2399_v19  ;;  %v2398_v4 = vadd.f32 %v2379_v26, %v2255_v34 }
 0x19e   : > { %v10201_v40 = vpop.f32.mrf.mxu0 }
 0x19f   : > { %v7649_v1 = vpop.f32.mrf.mxu1  ;;  %v2535_v59 = vadd.f32 %v2516_v30, %v2398_v4 }
 0x1a0   : > { %v10203_v14 = vpop.f32.mrf.mxu0 }
 0x1a1   : > { %v2743_v20 = vpop.f32.mrf.mxu1 }
 0x1a2   : > { %v10205_v11 = vpop.f32.mrf.mxu0 }
 0x1a3   : > { %v7652_v10 = vpop.f32.mrf.mxu1 }
 0x1a4   : > { %v10207_v13 = vpop.f32.mrf.mxu0 }
 0x1a5   : > { %v10209_v39 = vpop.f32.mrf.mxu1 }
 0x1a6   : > { %v10211_v48 = vpop.f32.mrf.mxu0 }
 0x1a7   : > { %12304 = vst [vmem:[#allocation32_spill] sm:$0xff] %v10211_v48  ;;  %v10213_v53 = vpop.f32.mrf.mxu1 }
 0x1a8   : > { %v10215_v3 = vpop.f32.mrf.mxu0 }
 0x1a9   : > { %12305 = vst [vmem:[#allocation33_spill] sm:$0xff] %v10215_v3  ;;  %v10217_v34 = vpop.f32.mrf.mxu1 }
 0x1aa   : > { %v10219_v31 = vpop.f32.mrf.mxu0 }
 0x1ab   : > { %12306 = vst [vmem:[#allocation34_spill] sm:$0xff] %v10219_v31  ;;  %v10221_v4 = vpop.f32.mrf.mxu1 }
 0x1ac   : > { %v10223_v63 = vpop.f32.mrf.mxu0 }
 0x1ad   : > { %12307 = vst [vmem:[#allocation35_spill] sm:$0xff] %v10223_v63  ;;  %v10225_v21 = vpop.f32.mrf.mxu1 }
 0x1ae   : > { %12308 = vst [vmem:[#allocation36_spill] sm:$0xff] %v10225_v21  ;;  %v7635_v54 = vpop.f32.mrf.mxu0 }
 0x1af   : > { %v10227_v8 = vpop.f32.mrf.mxu1  ;;  %v10229_v19 = vadd.f32 %v7635_v54, %v2534_v27 }
 0x1b0   : > { %12309 = vst [vmem:[#allocation37_spill] sm:$0xff] %v10227_v8  ;;  %v2646_v26 = vpop.f32.mrf.mxu0 }
 0x1b1   : > { %12310 = vst [vmem:[#allocation38_spill] sm:$0xff] %v10229_v19  ;;  %v10231_v30 = vpop.f32.mrf.mxu1  ;;  %v10233_v38 = vadd.f32 %v2646_v26, %v2533_v41 }
 0x1b2   : > { %12311 = vst [vmem:[#allocation39_spill] sm:$0xff] %v10231_v30  ;;  %v7638_v5 = vpop.f32.mrf.mxu0 }
 0x1b3   : > { %12312 = vst [vmem:[#allocation40_spill] sm:$0xff] %v10233_v38  ;;  %v7664_v62 = vpop.f32.mrf.mxu1  ;;  %v10235_v9 = vadd.f32 %v7638_v5, %v2536_v32 }
 0x1b4   : > { %v2656_v58 = vpop.f32.mrf.mxu0 }
 0x1b5   : > { %12313 = vst [vmem:[#allocation41_spill] sm:$0xff] %v10235_v9  ;;  %v2793_v31 = vpop.f32.mrf.mxu1  ;;  %v10237_v2 = vadd.f32 %v2656_v58, %v2535_v59  ;;  %v1520_v58 = vadd.f32 %v9973_v57, %v9932_v56  ;;  %v1530_v59 = vadd.f32 %v9991_v15, %v9938_v29  ;;  %v1004_v29 = vadd.f32 %v9866_v42, %v9785_v35 }
 0x1b6   : > { %v7675_v63 = vpop.f32.mrf.mxu0  ;;  %v1006_v57 = vadd.f32 %v9879_v45, %v9801_v49 }
 0x1b7   : > { %12314 = vst [vmem:[#allocation42_spill] sm:$0xff] %v10237_v2  ;;  %v7701_v61 = vpop.f32.mrf.mxu1  ;;  %v1711_v12 = vadd.f32 %v9975_v60, %v1520_v58  ;;  %v2874_v56 = vadd.f32 %v7675_v63, %v7649_v1  ;;  %v10275_v1 = vadd.f32 %v9855_v23, %v9853_v22 }
 0x1b8   : > { %v2868_v24 = vpop.f32.mrf.mxu0 }
 0x1b9   : > { %v2993_v21 = vpop.f32.mrf.mxu1  ;;  %v1856_v15 = vadd.f32 %v10079_v37, %v1711_v12  ;;  %v2869_v60 = vadd.f32 %v2868_v24, %v2743_v20  ;;  %v3053_v42 = vadd.f32 %v7701_v61, %v2874_v56  ;;  %v1152_v37 = vadd.f32 %v9868_v43, %v1004_v29 }
 0x1ba   : > { %v7678_v8 = vpop.f32.mrf.mxu0 }
 0x1bb   : > { %v7704_v27 = vpop.f32.mrf.mxu1  ;;  %v2001_v24 = vadd.f32 %v10081_v16, %v1856_v15  ;;  %v3052_v22 = vadd.f32 %v2993_v21, %v2869_v60  ;;  %v1300_v43 = vadd.f32 %v9930_v55, %v1152_v37  ;;  %v12326_v60 = vld [vmem:[#allocation36_spill] sm:$0xff] }
 0x1bc   : > { %v2878_v54 = vpop.f32.mrf.mxu0 }
 0x1bd   : > { %v3003_v19 = vpop.f32.mrf.mxu1  ;;  %v2879_v23 = vadd.f32 %v2878_v54, %v10209_v39  ;;  %v3338_v39 = vmax.f32 %v1300_v43, %v2001_v24  ;;  %v12332_v43 = vld [vmem:[#allocation16_spill] sm:$0xff] }
 0x1be   : > { %v7681_v3 = vpop.f32.mrf.mxu0 }
 0x1bf   : > { %v10239_v30 = vpop.f32.mrf.mxu1 }
 0x1c0   : > { %12315 = vst [vmem:[#allocation43_spill] sm:$0xff] %v10239_v30  ;;  %v10241_v41 = vpop.f32.mrf.mxu0 }
 0x1c1   : > { %v10243_v26 = vpop.f32.mrf.mxu1 }
 0x1c2   : > { %12316 = vst [vmem:[#allocation44_spill] sm:$0xff] %v10243_v26  ;;  %v7684_v5 = vpop.f32.mrf.mxu0  ;;  %v1713_v26 = vadd.f32 %v9993_v46, %v1530_v59  ;;  %v850_v46 = vadd.f32 %v9843_v18, %v9841_v17  ;;  %v2884_v59 = vadd.f32 %v7678_v8, %v7652_v10  ;;  %v2894_v8 = vadd.f32 %v7681_v3, %v10213_v53 }
 0x1c3   : > { %v10245_v32 = vpop.f32.mrf.mxu1  ;;  %v2904_v29 = vadd.f32 %v7684_v5, %v10221_v4  ;;  %v12321_v3 = vmax.f32 %v9928_v50, %v10089_v51 }
 0x1c4   : > { %12317 = vst [vmem:[#allocation45_spill] sm:$0xff] %v10245_v32  ;;  %v10251_v2 = vpop.f32.mrf.mxu0 }
 0x1c5   : > { %v10253_v9 = vpop.f32.mrf.mxu1 }
 0x1c6   : > { %12318 = vst [vmem:[#allocation46_spill] sm:$0xff] %v10253_v9  ;;  %v10255_v38 = vpop.f32.mrf.mxu0  ;;  %v1858_v9 = vadd.f32 %v10104_v33, %v1713_v26  ;;  %v1154_v33 = vadd.f32 %v9881_v47, %v1006_v57 }
 0x1c7   : > { %12319 = vst [vmem:[#allocation47_spill] sm:$0xff] %v10255_v38  ;;  %v10257_v30 = vpop.f32.mrf.mxu1  ;;  %v12325_v5 = vld [vmem:[#allocation43_spill] sm:$0xff] }
 0x1c8   : > { %12320 = vst [vmem:[#allocation48_spill] sm:$0xff] %v10257_v30  ;;  %v10261_v48 = vpop.f32.mrf.mxu0  ;;  %v1302_v47 = vadd.f32 %v9936_v6, %v1154_v33  ;;  %v3054_v6 = vadd.f32 %v3003_v19, %v2879_v23  ;;  %v3057_v15 = vadd.f32 %v12325_v5, %v2894_v8  ;;  %v12341_v5 = vld [vmem:[#allocation10_spill] sm:$0xff] }
 0x1c9   : > { %v10263_v32 = vpop.f32.mrf.mxu1 }
 0x1ca   : > { %v7690_v30 = vpop.f32.mrf.mxu0 }
 0x1cb   : > { %v7716_v38 = vpop.f32.mrf.mxu1  ;;  %v2924_v58 = vadd.f32 %v7690_v30, %v7664_v62  ;;  %v10283_v62 = vadd.f32 %v10106_v25, %v1858_v9  ;;  %v2666_v9 = vadd.f32 %v10201_v40, %v10185_v7  ;;  %v3055_v25 = vadd.f32 %v7704_v27, %v2884_v59  ;;  %v12327_v59 = vld [vmem:[#allocation44_spill] sm:$0xff]  ;;  %v12328_v37 = vld [vmem:[#allocation45_spill] sm:$0xff] }
 0x1cc   : > { %v2918_v63 = vpop.f32.mrf.mxu0  ;;  %v2668_v7 = vadd.f32 %v10205_v11, %v10189_v36  ;;  %v2667_v40 = vadd.f32 %v10207_v13, %v10191_v44  ;;  %v2889_v27 = vadd.f32 %v10241_v41, %v10217_v34  ;;  %v12322_v44 = vld [vmem:[#allocation32_spill] sm:$0xff]  ;;  %v12323_v34 = vld [vmem:[#allocation29_spill] sm:$0xff]  ;;  %v3059_v33 = vadd.f32 %v12328_v37, %v2904_v29 }
 0x1cd   : > { %v3043_v35 = vpop.f32.mrf.mxu1  ;;  %v10277_v49 = vadd.f32 %v7716_v38, %v2924_v58  ;;  %v2919_v45 = vadd.f32 %v2918_v63, %v2793_v31  ;;  %v10289_v38 = vadd.f32 %v9916_v0, %v850_v46  ;;  %v3340_v21 = vmax.f32 %v1302_v47, %v10283_v62  ;;  %v12324_v41 = vld [vmem:[#allocation33_spill] sm:$0xff] }
 0x1ce   : > { %v7727_v17 = vpop.f32.mrf.mxu0  ;;  %v2665_v0 = vadd.f32 %v10203_v14, %v10187_v28  ;;  %v10309_v28 = vld [vmem:[%s12105_s2] ss:$0 sm:$0xff]  ;;  %v2670_v13 = vadd.f32 %v12322_v44, %v10193_v52  ;;  %v2669_v4 = vadd.f32 %v12324_v41, %v12323_v34  ;;  %v2899_v58 = vadd.f32 %v10251_v2, %v12326_v60  ;;  %v12329_v52 = vld [vmem:[#allocation37_spill] sm:$0xff]  ;;  %v12330_v24 = vld [vmem:[#allocation47_spill] sm:$0xff] }
 0x1cf   : > { %v7753_v18 = vpop.f32.mrf.mxu1  ;;  %v10286_v12 = vadd.f32 %v3043_v35, %v2919_v45  ;;  %v3190_v61 = vadd.f32 %v7727_v17, %v3053_v42  ;;  %v3056_v45 = vadd.f32 %v12327_v59, %v2889_v27  ;;  %v2914_v62 = vadd.f32 %v12330_v24, %v12329_v52  ;;  %v12338_v27 = vld [vmem:[#allocation48_spill] sm:$0xff]  ;;  %v12340_v44 = vld [vmem:[#allocation35_spill] sm:$0xff] }
 0x1d0   : > { %v3130_v20 = vpop.f32.mrf.mxu0 }
 0x1d1   : > { %v3267_v16 = vpop.f32.mrf.mxu1  ;;  %v3327_v10 = vadd.f32 %v7753_v18, %v3190_v61  ;;  %v3189_v31 = vadd.f32 %v3130_v20, %v3052_v22  ;;  %v12331_v61 = vld [vmem:[#allocation9_spill] sm:$0xff]  ;;  %v3061_v29 = vadd.f32 %v12338_v27, %v2914_v62 }
 0x1d2   : > { %v7730_v55 = vpop.f32.mrf.mxu0  ;;  %v12333_v47 = vmax.f32 %v12331_v61, %v12332_v43  ;;  %v12348_v62 = vld [vmem:[#allocation17_spill] sm:$0xff]  ;;  %v12350_v61 = vld [vmem:[#allocation22_spill] sm:$0xff] }
 0x1d3   : > { %v7756_v30 = vpop.f32.mrf.mxu1  ;;  %v3351_v54 = vmax.f32 %v2666_v9, %v3327_v10  ;;  %v3326_v26 = vadd.f32 %v3267_v16, %v3189_v31  ;;  %v3192_v56 = vadd.f32 %v7730_v55, %v3055_v25  ;;  %v12334_v9 = vld [vmem:[#allocation46_spill] sm:$0xff]  ;;  %v12335_v10 = vld [vmem:[#allocation39_spill] sm:$0xff] }
 0x1d4   : > { %v3140_v14 = vpop.f32.mrf.mxu0  ;;  %v3058_v25 = vadd.f32 %v12334_v9, %v2899_v58  ;;  %v2909_v31 = vadd.f32 %v10261_v48, %v12335_v10  ;;  %v12352_v10 = vld [vmem:[#allocation6_spill] sm:$0xff] }
 0x1d5   : > { %v3277_v53 = vpop.f32.mrf.mxu1  ;;  %v3363_v19 = vmax.f32 %v12321_v3, %v3351_v54  ;;  %v3350_v36 = vmax.f32 %v2665_v0, %v3326_v26  ;;  %v3329_v11 = vadd.f32 %v7756_v30, %v3192_v56  ;;  %v3191_v57 = vadd.f32 %v3140_v14, %v3054_v6  ;;  %v12336_v56 = vld [vmem:[#allocation30_spill] sm:$0xff] }
 0x1d6   : > { %v7733_v46 = vpop.f32.mrf.mxu0  ;;  %v3060_v41 = vadd.f32 %v10263_v32, %v2909_v31  ;;  %v12344_v32 = vld [vmem:[#allocation7_spill] sm:$0xff]  ;;  %v1160_v31 = vadd.f32 %v12352_v10, %v10289_v38 }
 0x1d7   : > { %v7759_v63 = vpop.f32.mrf.mxu1  ;;  %v3382_v35 = vadd.f32 %v10309_v28, %v3363_v19  ;;  %v3362_v50 = vmax.f32 %v3338_v39, %v3350_v36  ;;  %v3353_v51 = vmax.f32 %v2668_v7, %v3329_v11  ;;  %v3328_v42 = vadd.f32 %v3277_v53, %v3191_v57  ;;  %v12337_v7 = vld [vmem:[#allocation34_spill] sm:$0xff] }
 0x1d8   : > { %v3194_v17 = vadd.f32 %v7733_v46, %v3057_v15  ;;  %v3150_v18 = vpop.f32.mrf.mxu0 }
 0x1d9   : > { %v3287_v22 = vpop.f32.mrf.mxu1  ;;  %v10326_v23 = vmax.f32 %v3382_v35, 0.0  ;;  %v10329_v2 = vadd.f32 %v10309_v28, %v3362_v50  ;;  %v3365_v20 = vmax.f32 %v12333_v47, %v3353_v51  ;;  %v3352_v16 = vmax.f32 %v2667_v40, %v3328_v42  ;;  %v6275_v35 = vld [vmem:[%s12106_s3 + $0x248] sm:$0xff] }
 0x1da   : > { %v3193_v39 = vadd.f32 %v3150_v18, %v3056_v45  ;;  %v3331_v0 = vadd.f32 %v7759_v63, %v3194_v17  ;;  %v7736_v8 = vpop.f32.mrf.mxu0  ;;  %v2672_v40 = vadd.f32 %v12337_v7, %v12336_v56  ;;  %v1014_v45 = vadd.f32 %v12344_v32, %v10275_v1  ;;  %v10376_v1 = vld [vmem:[%s12106_s3 + $0x240] sm:$0xff]  ;;  %v12365_v32 = vld [vmem:[#allocation15_spill] sm:$0xff] }
 0x1db   : > { %v7762_v55 = vpop.f32.mrf.mxu1  ;;  %v12133_v30 = vmax.f32 %v10329_v2, 0.0  ;;  %v3384_v6 = vadd.f32 %v10309_v28, %v3365_v20  ;;  %v3364_v54 = vmax.f32 %v3340_v21, %v3352_v16  ;;  %v3196_v26 = vadd.f32 %v7736_v8, %v3059_v33  ;;  %7799 = vmatprep.mubr.msk.f32.mxu0 %vm3436_vm2, %v10326_v23  ;;  %v12339_v21 = vld [vmem:[#allocation31_spill] sm:$0xff]  ;;  %v12346_v33 = vld [vmem:[#allocation21_spill] sm:$0xff] }
 0x1dc   : > { %v3355_v14 = vmax.f32 %v2670_v13, %v3331_v0  ;;  %v3330_v48 = vadd.f32 %v3287_v22, %v3193_v39  ;;  %v3160_v53 = vpop.f32.mrf.mxu0  ;;  %v2671_v34 = vadd.f32 %v12340_v44, %v12339_v21  ;;  %v12342_v13 = vld [vmem:[#allocation19_spill] sm:$0xff] }
 0x1dd   : > { %v3297_v3 = vpop.f32.mrf.mxu1  ;;  %v10344_v19 = vmax.f32 %v3384_v6, 0.0  ;;  %v3383_v36 = vadd.f32 %v10309_v28, %v3364_v54  ;;  %v3195_v11 = vadd.f32 %v3160_v53, %v3058_v25  ;;  %v3333_v57 = vadd.f32 %v7762_v55, %v3196_v26  ;;  %7835 = vmatprep.mubr.msk.f32.mxu1 %vm3436_vm2, %v12133_v30  ;;  %v12349_v22 = vld [vmem:[#allocation11_spill] sm:$0xff]  ;;  %v12354_v26 = vld [vmem:[#allocation24_spill] sm:$0xff] }
 0x1de   : > { %v12343_v15 = vmax.f32 %v12341_v5, %v12342_v13  ;;  %v3354_v58 = vmax.f32 %v2669_v4, %v3330_v48  ;;  %v7739_v46 = vpop.f32.mrf.mxu0  ;;  %v12345_v4 = vld [vmem:[#allocation20_spill] sm:$0xff]  ;;  %v12351_v43 = vmax.f32 %v12349_v22, %v12350_v61  ;;  %v10381_v25 = vld [vmem:[%s12106_s3 + $0x338] sm:$0xff]  ;;  %v12361_v5 = vld [vmem:[#allocation25_spill] sm:$0xff] }
 0x1df   : > { %v7765_v63 = vpop.f32.mrf.mxu1  ;;  %v10359_v50 = vmax.f32 %v3383_v36, 0.0  ;;  %v3357_v51 = vmax.f32 %v2672_v40, %v3333_v57  ;;  %v3198_v42 = vadd.f32 %v7739_v46, %v3061_v29  ;;  %v3332_v59 = vadd.f32 %v3297_v3, %v3195_v11  ;;  %7800 = vmatmul.mubr.msk.f32.vlgmr.msra.gmra.mxu0 %vm3436_vm2, %v10344_v19  ;;  %v12353_v54 = vld [vmem:[#allocation23_spill] sm:$0xff]  ;;  %v12356_v40 = vld [vmem:[#allocation38_spill] sm:$0xff]  ;;  %v12358_v48 = vld [vmem:[#allocation8_spill] sm:$0xff] }
 0x1e0   : > { %v3367_v60 = vmax.f32 %v12343_v15, %v3355_v14  ;;  %v12347_v52 = vmax.f32 %v12345_v4, %v12346_v33  ;;  %7842 = vmatpush3.msra.mxu0 %v12348_v62  ;;  %v3170_v17 = vpop.f32.mrf.mxu0  ;;  %v12355_v56 = vmax.f32 %v12353_v54, %v12354_v26  ;;  %v12357_v29 = vld [vmem:[#allocation18_spill] sm:$0xff]  ;;  %v10400_v14 = vld [vmem:[%s12106_s3 + $0x238] sm:$0xff]  ;;  %v1162_v53 = vadd.f32 %v12358_v48, %v1014_v45  ;;  %v12359_v3 = vld [vmem:[#allocation13_spill] sm:$0xff] }
 0x1e1   : > { %v3307_v18 = vpop.f32.mrf.mxu1  ;;  %v3369_v47 = vmax.f32 %v12351_v43, %v3357_v51  ;;  %v3356_v20 = vmax.f32 %v2671_v34, %v3332_v59  ;;  %v3197_v16 = vadd.f32 %v3170_v17, %v3060_v41  ;;  %v3335_v9 = vadd.f32 %v7765_v63, %v3198_v42  ;;  %7843 = vmatprep.subr.mxu0 %v6275_v35  ;;  %v12360_v41 = vld [vmem:[#allocation12_spill] sm:$0xff]  ;;  %v10432_v59 = vld [vmem:[%s12106_s3 + $0x230] sm:$0xff]  ;;  %v12366_v33 = vld [vmem:[#allocation41_spill] sm:$0xff] }
 0x1e2   : > { %v3386_v37 = vadd.f32 %v10309_v28, %v3367_v60  ;;  %v3366_v24 = vmax.f32 %v12347_v52, %v3354_v58  ;;  %7836 = vmatmul.mubr.msk.f32.vlgmr.msra.gmra.mxu1 %vm3436_vm2, %v10359_v50  ;;  %7844 = vmatpush3.msra.mxu0 %v6275_v35  ;;  %v7742_v8 = vpop.f32.mrf.mxu0  ;;  %v1308_v36 = vadd.f32 %v12359_v3, %v1160_v31  ;;  %v12363_v58 = vld [vmem:[#allocation26_spill] sm:$0xff]  ;;  %v12364_v35 = vld [vmem:[#allocation40_spill] sm:$0xff]  ;;  %v10457_v61 = vld [vmem:[%s12106_s3 + $0x228] sm:$0xff] }
 0x1e3   : > { %v7768_v55 = vpop.f32.mrf.mxu1  ;;  %v3388_v6 = vadd.f32 %v10309_v28, %v3369_v47  ;;  %v3368_v7 = vmax.f32 %v12355_v56, %v3356_v20  ;;  %v3359_v27 = vmax.f32 %v12356_v40, %v3335_v9  ;;  %7878 = vmatpush3.msra.mxu1 %v12357_v29  ;;  %v3200_v38 = vadd.f32 %v7742_v8, %v10277_v49  ;;  %v10411_v49 = vld [vmem:[%s12106_s3 + $0x330] sm:$0xff]  ;;  %v10462_v43 = vld [vmem:[%s12106_s3 + $0x320] sm:$0xff]  ;;  %v12370_v20 = vld [vmem:[#allocation27_spill] sm:$0xff] }
 0x1e4   : > { %v10385_v39 = vmax.f32 %v3386_v37, 0.0  ;;  %v3385_v0 = vadd.f32 %v10309_v28, %v3366_v24  ;;  %v3334_v57 = vadd.f32 %v3307_v18, %v3197_v16  ;;  %7845 = vmatprep.subr.mxu0 %v10376_v1  ;;  %7879 = vmatprep.subr.mxu1 %v10381_v25  ;;  %v3180_v21 = vpop.f32.mrf.mxu0  ;;  %v12362_v13 = vmax.f32 %v12360_v41, %v12361_v5  ;;  %v12367_v24 = vld [vmem:[#allocation28_spill] sm:$0xff]  ;;  %v12368_v18 = vld [vmem:[#allocation42_spill] sm:$0xff]  ;;  %v10486_v8 = vld [vmem:[%s12106_s3 + $0x318] sm:$0xff] }
 0x1e5   : > { %v3317_v44 = vpop.f32.mrf.mxu1  ;;  %v3387_v34 = vadd.f32 %v10309_v28, %v3368_v7  ;;  %7846 = vmatpush3.msra.mxu0 %v10376_v1  ;;  %v3199_v60 = vadd.f32 %v3180_v21, %v10286_v12  ;;  %v3346_v46 = vmax.f32 %v1308_v36, %v12363_v58  ;;  %v10424_v63 = vmax.f32 %v3388_v6, 0.0  ;;  %7880 = vmatpush3.msra.mxu1 %v10381_v25  ;;  %v10437_v12 = vld [vmem:[%s12106_s3 + $0x328] sm:$0xff]  ;;  %v12369_v47 = vld [vmem:[#allocation14_spill] sm:$0xff]  ;;  %v10476_v31 = vld [vmem:[%s12106_s3 + $0x220] sm:$0xff] }
 0x1e6   : > { %v10404_v11 = vmax.f32 %v3385_v0, 0.0  ;;  %v10417_v15 = vmax.f32 %v12362_v13, %v3359_v27  ;;  %7802 = vmatprep.mubr.msk.f32.mxu0 %vm3436_vm2, %v10385_v39  ;;  %v3358_v51 = vmax.f32 %v12364_v35, %v3334_v57  ;;  %v3337_v42 = vadd.f32 %v7768_v55, %v3200_v38  ;;  %7847 = vmatprep.subr.mxu0 %v10400_v14  ;;  %v10499_v6 = vld [vmem:[%s12106_s3 + $0x218] sm:$0xff]  ;;  %v10504_v54 = vld [vmem:[%s12106_s3 + $0x310] sm:$0xff]  ;;  %v10519_v56 = vld [vmem:[%s12106_s3 + $0x308] sm:$0xff] }
 0x1e7   : > { %v1310_v45 = vadd.f32 %v12365_v32, %v1162_v53  ;;  %7881 = vmatprep.subr.mxu1 %v10411_v49  ;;  %v3336_v37 = vadd.f32 %v3317_v44, %v3199_v60  ;;  %7848 = vmatpush3.msra.mxu0 %v10400_v14  ;;  %v10449_v17 = vmax.f32 %v3387_v34, 0.0  ;;  %v12371_v16 = vmax.f32 %v12369_v47, %v12370_v20  ;;  %v10514_v26 = vld [vmem:[%s12106_s3 + $0x210] sm:$0xff]  ;;  %v10528_v7 = vld [vmem:[%s12106_s3 + $0x208] sm:$0xff]  ;;  %v10533_v40 = vld [vmem:[%s12106_s3 + $0x300] sm:$0xff] }
 0x1e8   : > { %7838 = vmatprep.mubr.msk.f32.mxu1 %vm3436_vm2, %v10404_v11  ;;  %v10443_v4 = vmax.f32 %v3346_v46, %v3358_v51  ;;  %v3361_v52 = vmax.f32 %v12366_v33, %v3337_v42  ;;  %7882 = vmatpush3.msra.mxu1 %v10411_v49  ;;  %v10542_v27 = vld [vmem:[%s12106_s3 + $0x200] sm:$0xff]  ;;  %v10547_v29 = vld [vmem:[%s12106_s3 + $0x2f8] sm:$0xff]  ;;  %v10561_v48 = vld [vmem:[%s12106_s3 + $0x2f0] sm:$0xff]  ;;  %v3390_v58 = vadd.f32 %v10309_v28, %v10417_v15 }
 0x1e9   : > { %v3348_v62 = vmax.f32 %v1310_v45, %v12367_v24  ;;  %v3360_v22 = vmax.f32 %v12368_v18, %v3336_v37  ;;  %7849 = vmatprep.subr.mxu0 %v10432_v59  ;;  %7883 = vmatprep.subr.mxu1 %v10437_v12  ;;  %v10556_v38 = vld [vmem:[%s12106_s3 + $0x1f8] sm:$0xff]  ;;  %v10570_v53 = vld [vmem:[%s12106_s3 + $0x1f0] sm:$0xff]  ;;  %v10575_v3 = vld [vmem:[%s12106_s3 + $0x2e8] sm:$0xff] }
 0x1ea   : > { %v3373_v9 = vmax.f32 %v12371_v16, %v3361_v52  ;;  %7803 = vmatmul.mubr.msk.f32.gmra.mxu0 %vm3436_vm2, %v10424_v63  ;;  %7884 = vmatpush3.msra.mxu1 %v10437_v12  ;;  %v10584_v36 = vld [vmem:[%s12106_s3 + $0x1e8] sm:$0xff]  ;;  %v10589_v57 = vld [vmem:[%s12106_s3 + $0x2e0] sm:$0xff]  ;;  %v10603_v44 = vld [vmem:[%s12106_s3 + $0x2d8] sm:$0xff]  ;;  %v3389_v5 = vadd.f32 %v10309_v28, %v10443_v4  ;;  %v10673_v51 = vmax.f32 %v3390_v58, 0.0 }
 0x1eb   : > { %v3372_v10 = vmax.f32 %v3348_v62, %v3360_v22  ;;  %7850 = vmatpush3.msra.mxu0 %v10432_v59  ;;  %7871 = vmatprep.mubr.msk.f32.mxu0 %vm3436_vm2, %v10359_v50  ;;  %v10598_v21 = vld [vmem:[%s12106_s3 + $0x1e0] sm:$0xff]  ;;  %v10612_v34 = vld [vmem:[%s12106_s3 + $0x2d0] sm:$0xff]  ;;  %v10631_v13 = vld [vmem:[%s12106_s3 + $0x428] sm:$0xff] }
 0x1ec   : > { %v10479_v0 = vadd.f32 %v10309_v28, %v3373_v9  ;;  %7851 = vmatprep.subr.mxu0 %v10457_v61  ;;  %7885 = vmatprep.subr.mxu1 %v10462_v43  ;;  %v10619_v41 = vld [vmem:[%s12106_s3 + $0x430] sm:$0xff]  ;;  %v10639_v60 = vld [vmem:[%s12106_s3 + $0x1d8] sm:$0xff]  ;;  %v10651_v46 = vld [vmem:[%s12106_s3 + $0x420] sm:$0xff]  ;;  %v10653_v35 = vmax.f32 %v3389_v5, 0.0 }
 0x1ed   : > { %v10489_v55 = vadd.f32 %v10309_v28, %v3372_v10  ;;  %7839 = vmatmul.mubr.msk.f32.gmra.mxu1 %vm3436_vm2, %v10449_v17  ;;  %7852 = vmatpush3.msra.mxu0 %v10457_v61  ;;  %v10661_v28 = vld [vmem:[%s12106_s3 + $0x1d0] sm:$0xff]  ;;  %v10671_v15 = vld [vmem:[%s12106_s3 + $0x418] sm:$0xff]  ;;  %v10680_v42 = vld [vmem:[%s12106_s3 + $0x1c8] sm:$0xff] }
 0x1ee   : > { %12372 = vst [vmem:[#allocation32_spill] sm:$0xff] %v10479_v0  ;;  %7886 = vmatpush3.msra.mxu1 %v10462_v43  ;;  %7853 = vmatprep.subr.mxu0 %v10476_v31  ;;  %v10691_v32 = vld [vmem:[%s12106_s3 + $0x410] sm:$0xff]  ;;  %v10696_v45 = vld [vmem:[%s12106_s3 + $0x1c0] sm:$0xff]  ;;  %v10706_v37 = vld [vmem:[%s12106_s3 + $0x408] sm:$0xff] }
 0x1ef   : > { %7887 = vmatprep.subr.mxu1 %v10486_v8  ;;  %7907 = vmatprep.mubr.msk.f32.mxu1 %vm3436_vm2, %v10344_v19  ;;  %v10711_v4 = vld [vmem:[%s12106_s3 + $0x1b8] sm:$0xff]  ;;  %v10720_v33 = vld [vmem:[%s12106_s3 + $0x400] sm:$0xff]  ;;  %v10725_v52 = vld [vmem:[%s12106_s3 + $0x1b0] sm:$0xff] }
 0x1f0   : > { %7854 = vmatpush3.msra.mxu0 %v10476_v31  ;;  %7888 = vmatpush3.msra.mxu1 %v10486_v8  ;;  %v10734_v24 = vld [vmem:[%s12106_s3 + $0x3f8] sm:$0xff]  ;;  %v10739_v62 = vld [vmem:[%s12106_s3 + $0x1a8] sm:$0xff]  ;;  %v10748_v18 = vld [vmem:[%s12106_s3 + $0x3f0] sm:$0xff] }
 0x1f1   : > { %7855 = vmatprep.subr.mxu0 %v10499_v6  ;;  %7889 = vmatprep.subr.mxu1 %v10504_v54  ;;  %v10753_v22 = vld [vmem:[%s12106_s3 + $0x1a0] sm:$0xff]  ;;  %v10762_v47 = vld [vmem:[%s12106_s3 + $0x3e8] sm:$0xff]  ;;  %v10767_v20 = vld [vmem:[%s12106_s3 + $0x198] sm:$0xff] }
 0x1f2   : > { %7856 = vmatpush3.msra.mxu0 %v10499_v6  ;;  %7890 = vmatpush3.msra.mxu1 %v10504_v54  ;;  %v10776_v16 = vld [vmem:[%s12106_s3 + $0x3e0] sm:$0xff]  ;;  %v10781_v9 = vld [vmem:[%s12106_s3 + $0x190] sm:$0xff]  ;;  %v10790_v10 = vld [vmem:[%s12106_s3 + $0x3d8] sm:$0xff] }
 0x1f3   : > { %7857 = vmatprep.subr.mxu0 %v10514_v26  ;;  %7891 = vmatprep.subr.mxu1 %v10519_v56  ;;  %12373 = vst [vmem:[#allocation29_spill] sm:$0xff] %v10781_v9  ;;  %12374 = vst [vmem:[#allocation33_spill] sm:$0xff] %v10790_v10  ;;  %v10795_v5 = vld [vmem:[%s12106_s3 + $0x188] sm:$0xff]  ;;  %v10804_v58 = vld [vmem:[%s12106_s3 + $0x3d0] sm:$0xff] }
 0x1f4   : > { %7858 = vmatpush3.msra.mxu0 %v10514_v26  ;;  %7892 = vmatpush3.msra.mxu1 %v10519_v56  ;;  %12375 = vst [vmem:[#allocation43_spill] sm:$0xff] %v10795_v5  ;;  %12376 = vst [vmem:[#allocation36_spill] sm:$0xff] %v10804_v58  ;;  %v10809_v30 = vld [vmem:[%s12106_s3 + $0x180] sm:$0xff]  ;;  %v10818_v0 = vld [vmem:[%s12106_s3 + $0x3c8] sm:$0xff] }
 0x1f5   : > { %7859 = vmatprep.subr.mxu0 %v10528_v7  ;;  %7893 = vmatprep.subr.mxu1 %v10533_v40  ;;  %12377 = vst [vmem:[#allocation44_spill] sm:$0xff] %v10809_v30  ;;  %12378 = vst [vmem:[#allocation45_spill] sm:$0xff] %v10818_v0 }
 0x1f6   : > { %7860 = vmatpush3.msra.mxu0 %v10528_v7  ;;  %7894 = vmatpush3.msra.mxu1 %v10533_v40 }
 0x1f7   : > { %7861 = vmatprep.subr.mxu0 %v10542_v27  ;;  %7895 = vmatprep.subr.mxu1 %v10547_v29 }
 0x1f8   : > { %7862 = vmatpush3.msra.mxu0 %v10542_v27  ;;  %7896 = vmatpush3.msra.mxu1 %v10547_v29 }
 0x1f9   : > { %7863 = vmatprep.subr.mxu0 %v10556_v38  ;;  %7897 = vmatprep.subr.mxu1 %v10561_v48 }
 0x1fa   : > { %7864 = vmatpush3.msra.mxu0 %v10556_v38  ;;  %7898 = vmatpush3.msra.mxu1 %v10561_v48 }
 0x1fb   : > { %7865 = vmatprep.subr.mxu0 %v10570_v53  ;;  %7899 = vmatprep.subr.mxu1 %v10575_v3 }
 0x1fc   : > { %7866 = vmatpush3.msra.mxu0 %v10570_v53  ;;  %7900 = vmatpush3.msra.mxu1 %v10575_v3 }
 0x1fd   : > { %7867 = vmatprep.subr.mxu0 %v10584_v36  ;;  %7901 = vmatprep.subr.mxu1 %v10589_v57 }
 0x1fe   : > { %7868 = vmatpush3.msra.mxu0 %v10584_v36  ;;  %7902 = vmatpush3.msra.mxu1 %v10589_v57 }
 0x1ff   : > { %7869 = vmatprep.subr.mxu0 %v10598_v21  ;;  %7903 = vmatprep.subr.mxu1 %v10603_v44 }
 0x200   : > { %7870 = vmatpush3.msra.mxu0 %v10598_v21  ;;  %7904 = vmatpush3.msra.mxu1 %v10603_v44 }
 0x201   : > { %7872 = vmatmul.mubr.msk.f32.vlgmr.msra.gmra.mxu0 %vm3436_vm2, %v10404_v11  ;;  %7905 = vmatprep.subr.mxu1 %v10612_v34 }
 0x202   : > { %7913 = vmatprep.subr.mxu0 %v10619_v41  ;;  %7874 = vmatprep.mubr.msk.f32.mxu0 %vm3436_vm2, %v10449_v17 }
 0x203   : > { %7906 = vmatpush3.msra.mxu1 %v10612_v34  ;;  %7914 = vmatpush3.msra.mxu0 %v10619_v41 }
 0x204   : > { %7908 = vmatmul.mubr.msk.f32.vlgmr.msra.gmra.mxu1 %vm3436_vm2, %v10385_v39  ;;  %7915 = vmatprep.subr.mxu0 %v10631_v13 }
 0x205   : > { %7949 = vmatprep.subr.mxu1 %v10639_v60  ;;  %7910 = vmatprep.mubr.msk.f32.mxu1 %vm3436_vm2, %v10424_v63 }
 0x206   : > { %7916 = vmatpush3.msra.mxu0 %v10631_v13  ;;  %7950 = vmatpush3.msra.mxu1 %v10639_v60 }
 0x207   : > { %7875 = vmatmul.mubr.msk.f32.gmra.mxu0 %vm3436_vm2, %v10653_v35  ;;  %7917 = vmatprep.subr.mxu0 %v10651_v46 }
 0x208   : > { %7951 = vmatprep.subr.mxu1 %v10661_v28  ;;  %7918 = vmatpush3.msra.mxu0 %v10651_v46 }
 0x209   : > { %7943 = vmatprep.mubr.msk.f32.mxu0 %vm3436_vm2, %v10404_v11  ;;  %7952 = vmatpush3.msra.mxu1 %v10661_v28 }
 0x20a   : > { %7911 = vmatmul.mubr.msk.f32.gmra.mxu1 %vm3436_vm2, %v10673_v51  ;;  %7919 = vmatprep.subr.mxu0 %v10671_v15 }
 0x20b   : > { %7953 = vmatprep.subr.mxu1 %v10680_v42  ;;  %7920 = vmatpush3.msra.mxu0 %v10671_v15 }
 0x20c   : > { %7954 = vmatpush3.msra.mxu1 %v10680_v42  ;;  %7979 = vmatprep.mubr.msk.f32.mxu1 %vm3436_vm2, %v10326_v23 }
 0x20d   : > { %7921 = vmatprep.subr.mxu0 %v10691_v32  ;;  %7955 = vmatprep.subr.mxu1 %v10696_v45 }
 0x20e   : > { %7922 = vmatpush3.msra.mxu0 %v10691_v32  ;;  %7956 = vmatpush3.msra.mxu1 %v10696_v45 }
 0x20f   : > { %7923 = vmatprep.subr.mxu0 %v10706_v37  ;;  %7957 = vmatprep.subr.mxu1 %v10711_v4 }
 0x210   : > { %7924 = vmatpush3.msra.mxu0 %v10706_v37  ;;  %7958 = vmatpush3.msra.mxu1 %v10711_v4 }
 0x211   : > { %7925 = vmatprep.subr.mxu0 %v10720_v33  ;;  %7959 = vmatprep.subr.mxu1 %v10725_v52 }
 0x212   : > { %7926 = vmatpush3.msra.mxu0 %v10720_v33  ;;  %7960 = vmatpush3.msra.mxu1 %v10725_v52 }
 0x213   : > { %7927 = vmatprep.subr.mxu0 %v10734_v24  ;;  %7961 = vmatprep.subr.mxu1 %v10739_v62 }
 0x214   : > { %7928 = vmatpush3.msra.mxu0 %v10734_v24  ;;  %7962 = vmatpush3.msra.mxu1 %v10739_v62 }
 0x215   : > { %7929 = vmatprep.subr.mxu0 %v10748_v18  ;;  %7963 = vmatprep.subr.mxu1 %v10753_v22 }
 0x216   : > { %7930 = vmatpush3.msra.mxu0 %v10748_v18  ;;  %7964 = vmatpush3.msra.mxu1 %v10753_v22 }
 0x217   : > { %7931 = vmatprep.subr.mxu0 %v10762_v47  ;;  %7965 = vmatprep.subr.mxu1 %v10767_v20 }
 0x218   : > { %7932 = vmatpush3.msra.mxu0 %v10762_v47  ;;  %7966 = vmatpush3.msra.mxu1 %v10767_v20 }
 0x219   : > { %7933 = vmatprep.subr.mxu0 %v10776_v16  ;;  %7967 = vmatprep.subr.mxu1 %v10781_v9 }
 0x21a   : > { %7934 = vmatpush3.msra.mxu0 %v10776_v16  ;;  %7968 = vmatpush3.msra.mxu1 %v10781_v9  ;;  %v10823_v9 = vld [vmem:[%s12106_s3 + $0x178] sm:$0xff] }
 0x21b   : > { %7935 = vmatprep.subr.mxu0 %v10790_v10  ;;  %7969 = vmatprep.subr.mxu1 %v10795_v5  ;;  %12379 = vst [vmem:[#allocation37_spill] sm:$0xff] %v10823_v9 }
 0x21c   : > { %7936 = vmatpush3.msra.mxu0 %v10790_v10  ;;  %7970 = vmatpush3.msra.mxu1 %v10795_v5  ;;  %v10832_v5 = vld [vmem:[%s12106_s3 + $0x3c0] sm:$0xff]  ;;  %v10837_v10 = vld [vmem:[%s12106_s3 + $0x170] sm:$0xff] }
 0x21d   : > { %7937 = vmatprep.subr.mxu0 %v10804_v58  ;;  %7971 = vmatprep.subr.mxu1 %v10809_v30  ;;  %12380 = vst [vmem:[#allocation47_spill] sm:$0xff] %v10832_v5  ;;  %12381 = vst [vmem:[#allocation9_spill] sm:$0xff] %v10837_v10 }
 0x21e   : > { %7938 = vmatpush3.msra.mxu0 %v10804_v58  ;;  %7972 = vmatpush3.msra.mxu1 %v10809_v30  ;;  %v10846_v30 = vld [vmem:[%s12106_s3 + $0x168] sm:$0xff] }
 0x21f   : > { %7939 = vmatprep.subr.mxu0 %v10818_v0  ;;  %7973 = vmatprep.subr.mxu1 %v10823_v9  ;;  %12382 = vst [vmem:[#allocation16_spill] sm:$0xff] %v10846_v30  ;;  %v10853_v58 = vld [vmem:[%s12106_s3 + $0xe8] sm:$0xff] }
 0x220   : > { %7940 = vmatpush3.msra.mxu0 %v10818_v0  ;;  %7974 = vmatpush3.msra.mxu1 %v10823_v9  ;;  %12383 = vst [vmem:[#allocation46_spill] sm:$0xff] %v10853_v58  ;;  %v10863_v9 = vld [vmem:[%s12106_s3 + $0xe0] sm:$0xff]  ;;  %v10884_v0 = vmax.f32 %v10489_v55, 0.0  ;;  %v10902_v55 = vld [vmem:[%s12106_s3 + $0xd0] sm:$0xff] }
 0x221   : > { %7941 = vmatprep.subr.mxu0 %v10832_v5  ;;  %7975 = vmatprep.subr.mxu1 %v10837_v10  ;;  %12384 = vst [vmem:[#allocation39_spill] sm:$0xff] %v10863_v9  ;;  %12387 = vst [vmem:[#allocation48_spill] sm:$0xff] %v10902_v55 }
 0x222   : > { %7942 = vmatpush3.msra.mxu0 %v10832_v5  ;;  %7976 = vmatpush3.msra.mxu1 %v10837_v10  ;;  %v10871_v5 = vld [vmem:[%s12106_s3 + $0x2c8] sm:$0xff]  ;;  %v10881_v10 = vld [vmem:[%s12106_s3 + $0xd8] sm:$0xff] }
 0x223   : > { %7944 = vmatmul.mubr.msk.f32.vlgmr.msra.gmra.mxu0 %vm3436_vm2, %v10449_v17  ;;  %7977 = vmatprep.subr.mxu1 %v10846_v30  ;;  %12385 = vst [vmem:[#allocation30_spill] sm:$0xff] %v10871_v5  ;;  %12386 = vst [vmem:[#allocation34_spill] sm:$0xff] %v10881_v10 }
 0x224   : > { %7985 = vmatprep.subr.mxu0 %v10853_v58  ;;  %7946 = vmatprep.mubr.msk.f32.mxu0 %vm3436_vm2, %v10653_v35 }
 0x225   : > { %7978 = vmatpush3.msra.mxu1 %v10846_v30  ;;  %7986 = vmatpush3.msra.mxu0 %v10853_v58  ;;  %v10892_v58 = vld [vmem:[%s12106_s3 + $0x2c0] sm:$0xff]  ;;  %v10926_v30 = vld [vmem:[%s12106_s3 + $0x2b0] sm:$0xff] }
 0x226   : > { %7980 = vmatmul.mubr.msk.f32.vlgmr.msra.gmra.mxu1 %vm3436_vm2, %v10344_v19  ;;  %7987 = vmatprep.subr.mxu0 %v10863_v9  ;;  %12391 = vst [vmem:[#allocation10_spill] sm:$0xff] %v10926_v30 }
 0x227   : > { %8021 = vmatprep.subr.mxu1 %v10871_v5  ;;  %7982 = vmatprep.mubr.msk.f32.mxu1 %vm3436_vm2, %v10385_v39 }
 0x228   : > { %7988 = vmatpush3.msra.mxu0 %v10863_v9  ;;  %8022 = vmatpush3.msra.mxu1 %v10871_v5  ;;  %v10909_v9 = vld [vmem:[%s12106_s3 + $0x2b8] sm:$0xff]  ;;  %v12389_v5 = vmax.f32 %v10329_v2, 0.0  ;;  %v10936_v2 = vld [vmem:[%s12106_s3 + $0xc0] sm:$0xff] }
 0x229   : > { %7947 = vmatmul.mubr.msk.f32.gmra.mxu0 %vm3436_vm2, %v10884_v0  ;;  %7989 = vmatprep.subr.mxu0 %v10881_v10  ;;  %12388 = vst [vmem:[#allocation31_spill] sm:$0xff] %v10909_v9  ;;  %12392 = vst [vmem:[#allocation19_spill] sm:$0xff] %v10936_v2 }
 0x22a   : > { %8023 = vmatprep.subr.mxu1 %v10892_v58  ;;  %7990 = vmatpush3.msra.mxu0 %v10881_v10  ;;  %v10921_v10 = vld [vmem:[%s12106_s3 + $0xc8] sm:$0xff] }
 0x22b   : > { %8015 = vmatprep.mubr.msk.f32.mxu0 %vm3436_vm2, %v12389_v5  ;;  %8024 = vmatpush3.msra.mxu1 %v10892_v58  ;;  %12390 = vst [vmem:[#allocation35_spill] sm:$0xff] %v10921_v10  ;;  %v10941_v5 = vld [vmem:[%s12106_s3 + $0x2a8] sm:$0xff] }
 0x22c   : > { %7983 = vmatmul.mubr.msk.f32.gmra.mxu1 %vm3436_vm2, %v10424_v63  ;;  %7991 = vmatprep.subr.mxu0 %v10902_v55  ;;  %12393 = vst [vmem:[#allocation7_spill] sm:$0xff] %v10941_v5 }
 0x22d   : > { %8025 = vmatprep.subr.mxu1 %v10909_v9  ;;  %7992 = vmatpush3.msra.mxu0 %v10902_v55  ;;  %v10955_v55 = vld [vmem:[%s12106_s3 + $0x2a0] sm:$0xff] }
 0x22e   : > { %8026 = vmatpush3.msra.mxu1 %v10909_v9  ;;  %8051 = vmatprep.mubr.msk.f32.mxu1 %vm3436_vm2, %v10359_v50  ;;  %v10950_v9 = vld [vmem:[%s12106_s3 + $0xb8] sm:$0xff]  ;;  %12395 = vst [vmem:[#allocation21_spill] sm:$0xff] %v10955_v55 }
 0x22f   : > { %7993 = vmatprep.subr.mxu0 %v10921_v10  ;;  %8027 = vmatprep.subr.mxu1 %v10926_v30  ;;  %12394 = vst [vmem:[#allocation20_spill] sm:$0xff] %v10950_v9 }
 0x230   : > { %7994 = vmatpush3.msra.mxu0 %v10921_v10  ;;  %8028 = vmatpush3.msra.mxu1 %v10926_v30  ;;  %v10964_v30 = vld [vmem:[%s12106_s3 + $0xb0] sm:$0xff]  ;;  %v10969_v10 = vld [vmem:[%s12106_s3 + $0x298] sm:$0xff] }
 0x231   : > { %7995 = vmatprep.subr.mxu0 %v10936_v2  ;;  %8029 = vmatprep.subr.mxu1 %v10941_v5  ;;  %12396 = vst [vmem:[#allocation17_spill] sm:$0xff] %v10964_v30  ;;  %12397 = vst [vmem:[#allocation11_spill] sm:$0xff] %v10969_v10 }
 0x232   : > { %7996 = vmatpush3.msra.mxu0 %v10936_v2  ;;  %8030 = vmatpush3.msra.mxu1 %v10941_v5  ;;  %v10978_v5 = vld [vmem:[%s12106_s3 + $0xa8] sm:$0xff]  ;;  %v10983_v2 = vld [vmem:[%s12106_s3 + $0x290] sm:$0xff] }
 0x233   : > { %7997 = vmatprep.subr.mxu0 %v10950_v9  ;;  %8031 = vmatprep.subr.mxu1 %v10955_v55  ;;  %12398 = vst [vmem:[#allocation22_spill] sm:$0xff] %v10978_v5  ;;  %12399 = vst [vmem:[#allocation6_spill] sm:$0xff] %v10983_v2 }
 0x234   : > { %7998 = vmatpush3.msra.mxu0 %v10950_v9  ;;  %8032 = vmatpush3.msra.mxu1 %v10955_v55  ;;  %v10992_v55 = vld [vmem:[%s12106_s3 + $0xa0] sm:$0xff]  ;;  %v10997_v9 = vld [vmem:[%s12106_s3 + $0x288] sm:$0xff] }
 0x235   : > { %7999 = vmatprep.subr.mxu0 %v10964_v30  ;;  %8033 = vmatprep.subr.mxu1 %v10969_v10  ;;  %12400 = vst [vmem:[#allocation23_spill] sm:$0xff] %v10992_v55  ;;  %12401 = vst [vmem:[#allocation24_spill] sm:$0xff] %v10997_v9 }
 0x236   : > { %8000 = vmatpush3.msra.mxu0 %v10964_v30  ;;  %8034 = vmatpush3.msra.mxu1 %v10969_v10  ;;  %v11006_v10 = vld [vmem:[%s12106_s3 + $0x98] sm:$0xff]  ;;  %v11011_v30 = vld [vmem:[%s12106_s3 + $0x280] sm:$0xff] }
 0x237   : > { %8001 = vmatprep.subr.mxu0 %v10978_v5  ;;  %8035 = vmatprep.subr.mxu1 %v10983_v2  ;;  %12402 = vst [vmem:[#allocation38_spill] sm:$0xff] %v11006_v10  ;;  %12403 = vst [vmem:[#allocation18_spill] sm:$0xff] %v11011_v30 }
 0x238   : > { %8002 = vmatpush3.msra.mxu0 %v10978_v5  ;;  %8036 = vmatpush3.msra.mxu1 %v10983_v2  ;;  %v11020_v2 = vld [vmem:[%s12106_s3 + $0x90] sm:$0xff]  ;;  %v11025_v5 = vld [vmem:[%s12106_s3 + $0x278] sm:$0xff] }
 0x239   : > { %8003 = vmatprep.subr.mxu0 %v10992_v55  ;;  %8037 = vmatprep.subr.mxu1 %v10997_v9  ;;  %12404 = vst [vmem:[#allocation8_spill] sm:$0xff] %v11020_v2  ;;  %12405 = vst [vmem:[#allocation13_spill] sm:$0xff] %v11025_v5 }
 0x23a   : > { %8004 = vmatpush3.msra.mxu0 %v10992_v55  ;;  %8038 = vmatpush3.msra.mxu1 %v10997_v9  ;;  %v11034_v9 = vld [vmem:[%s12106_s3 + $0x88] sm:$0xff]  ;;  %v11039_v55 = vld [vmem:[%s12106_s3 + $0x270] sm:$0xff] }
 0x23b   : > { %8005 = vmatprep.subr.mxu0 %v11006_v10  ;;  %8039 = vmatprep.subr.mxu1 %v11011_v30  ;;  %12406 = vst [vmem:[#allocation12_spill] sm:$0xff] %v11034_v9  ;;  %12407 = vst [vmem:[#allocation25_spill] sm:$0xff] %v11039_v55 }
 0x23c   : > { %8006 = vmatpush3.msra.mxu0 %v11006_v10  ;;  %8040 = vmatpush3.msra.mxu1 %v11011_v30  ;;  %v11048_v30 = vld [vmem:[%s12106_s3 + $0x80] sm:$0xff]  ;;  %v11053_v10 = vld [vmem:[%s12106_s3 + $0x268] sm:$0xff] }
 0x23d   : > { %8007 = vmatprep.subr.mxu0 %v11020_v2  ;;  %8041 = vmatprep.subr.mxu1 %v11025_v5  ;;  %12408 = vst [vmem:[#allocation26_spill] sm:$0xff] %v11048_v30  ;;  %12409 = vst [vmem:[#allocation40_spill] sm:$0xff] %v11053_v10 }
 0x23e   : > { %8008 = vmatpush3.msra.mxu0 %v11020_v2  ;;  %8042 = vmatpush3.msra.mxu1 %v11025_v5  ;;  %v11062_v5 = vld [vmem:[%s12106_s3 + $0x78] sm:$0xff]  ;;  %v11067_v2 = vld [vmem:[%s12106_s3 + $0x260] sm:$0xff] }
 0x23f   : > { %8009 = vmatprep.subr.mxu0 %v11034_v9  ;;  %8043 = vmatprep.subr.mxu1 %v11039_v55  ;;  %12410 = vst [vmem:[#allocation15_spill] sm:$0xff] %v11062_v5  ;;  %12411 = vst [vmem:[#allocation41_spill] sm:$0xff] %v11067_v2 }
 0x240   : > { %8010 = vmatpush3.msra.mxu0 %v11034_v9  ;;  %8044 = vmatpush3.msra.mxu1 %v11039_v55  ;;  %v11076_v55 = vld [vmem:[%s12106_s3 + $0x258] sm:$0xff] }
 0x241   : > { %8011 = vmatprep.subr.mxu0 %v11048_v30  ;;  %8045 = vmatprep.subr.mxu1 %v11053_v10  ;;  %12412 = vst [vmem:[#allocation28_spill] sm:$0xff] %v11076_v55  ;;  %v11083_v9 = vld [vmem:[%s12106_s3 + $0x3b8] sm:$0xff] }
 0x242   : > { %8012 = vmatpush3.msra.mxu0 %v11048_v30  ;;  %8046 = vmatpush3.msra.mxu1 %v11053_v10  ;;  %12413 = vst [vmem:[#allocation42_spill] sm:$0xff] %v11083_v9  ;;  %v11093_v10 = vld [vmem:[%s12106_s3 + $0x3b0] sm:$0xff]  ;;  %v11167_v30 = vld [vmem:[%s12106_s3 + $0x488] sm:$0xff] }
 0x243   : > { %8013 = vmatprep.subr.mxu0 %v11062_v5  ;;  %8047 = vmatprep.subr.mxu1 %v11067_v2  ;;  %12414 = vst [vmem:[#allocation14_spill] sm:$0xff] %v11093_v10  ;;  %12423 = vst [vmem:[#allocation56_spill] sm:$0xff] %v11167_v30 }
 0x244   : > { %8014 = vmatpush3.msra.mxu0 %v11062_v5  ;;  %8048 = vmatpush3.msra.mxu1 %v11067_v2  ;;  %v11101_v5 = vld [vmem:[%s12106_s3 + $0x4a8] sm:$0xff] }
 0x245   : > { %8016 = vmatmul.mubr.msk.f32.vlgmr.msra.gmra.mxu0 %vm3436_vm2, %v10359_v50  ;;  %8049 = vmatprep.subr.mxu1 %v11076_v55  ;;  %12415 = vst [vmem:[#allocation27_spill] sm:$0xff] %v11101_v5  ;;  %v11111_v2 = vld [vmem:[%s12106_s3 + $0x3a8] sm:$0xff] }
 0x246   : > { %8057 = vmatprep.subr.mxu0 %v11083_v9  ;;  %8018 = vmatprep.mubr.msk.f32.mxu0 %vm3436_vm2, %v10404_v11  ;;  %12416 = vst [vmem:[#allocation49_spill] sm:$0xff] %v11111_v2 }
 0x247   : > { %8050 = vmatpush3.msra.mxu1 %v11076_v55  ;;  %8058 = vmatpush3.msra.mxu0 %v11083_v9  ;;  %v11119_v55 = vld [vmem:[%s12106_s3 + $0x4a0] sm:$0xff] }
 0x248   : > { %8052 = vmatmul.mubr.msk.f32.vlgmr.msra.gmra.mxu1 %vm3436_vm2, %v10404_v11  ;;  %8059 = vmatprep.subr.mxu0 %v11093_v10  ;;  %12417 = vst [vmem:[#allocation50_spill] sm:$0xff] %v11119_v55  ;;  %v11129_v9 = vld [vmem:[%s12106_s3 + $0x3a0] sm:$0xff] }
 0x249   : > { %8093 = vmatprep.subr.mxu1 %v11101_v5  ;;  %8054 = vmatprep.mubr.msk.f32.mxu1 %vm3436_vm2, %v10449_v17  ;;  %12418 = vst [vmem:[#allocation51_spill] sm:$0xff] %v11129_v9 }
 0x24a   : > { %8060 = vmatpush3.msra.mxu0 %v11093_v10  ;;  %8094 = vmatpush3.msra.mxu1 %v11101_v5  ;;  %v11136_v10 = vld [vmem:[%s12106_s3 + $0x498] sm:$0xff] }
 0x24b   : > { %8019 = vmatmul.mubr.msk.f32.gmra.mxu0 %vm3436_vm2, %v10449_v17  ;;  %8061 = vmatprep.subr.mxu0 %v11111_v2  ;;  %12419 = vst [vmem:[#allocation52_spill] sm:$0xff] %v11136_v10  ;;  %v11147_v5 = vld [vmem:[%s12106_s3 + $0x398] sm:$0xff] }
 0x24c   : > { %8095 = vmatprep.subr.mxu1 %v11119_v55  ;;  %8062 = vmatpush3.msra.mxu0 %v11111_v2  ;;  %12420 = vst [vmem:[#allocation53_spill] sm:$0xff] %v11147_v5  ;;  %v11152_v2 = vld [vmem:[%s12106_s3 + $0x490] sm:$0xff] }
 0x24d   : > { %8087 = vmatprep.mubr.msk.f32.mxu0 %vm3436_vm2, %v10344_v19  ;;  %8096 = vmatpush3.msra.mxu1 %v11119_v55  ;;  %12421 = vst [vmem:[#allocation54_spill] sm:$0xff] %v11152_v2  ;;  %v11162_v55 = vld [vmem:[%s12106_s3 + $0x390] sm:$0xff] }
 0x24e   : > { %8055 = vmatmul.mubr.msk.f32.gmra.mxu1 %vm3436_vm2, %v10653_v35  ;;  %8063 = vmatprep.subr.mxu0 %v11129_v9  ;;  %12422 = vst [vmem:[#allocation55_spill] sm:$0xff] %v11162_v55 }
 0x24f   : > { %8097 = vmatprep.subr.mxu1 %v11136_v10  ;;  %8064 = vmatpush3.msra.mxu0 %v11129_v9  ;;  %v11181_v9 = vld [vmem:[%s12106_s3 + $0x480] sm:$0xff] }
 0x250   : > { %8098 = vmatpush3.msra.mxu1 %v11136_v10  ;;  %8123 = vmatprep.mubr.msk.f32.mxu1 %vm3436_vm2, %v10404_v11  ;;  %v11176_v10 = vld [vmem:[%s12106_s3 + $0x388] sm:$0xff]  ;;  %12425 = vst [vmem:[#allocation58_spill] sm:$0xff] %v11181_v9 }
 0x251   : > { %8065 = vmatprep.subr.mxu0 %v11147_v5  ;;  %8099 = vmatprep.subr.mxu1 %v11152_v2  ;;  %12424 = vst [vmem:[#allocation57_spill] sm:$0xff] %v11176_v10 }
 0x252   : > { %8066 = vmatpush3.msra.mxu0 %v11147_v5  ;;  %8100 = vmatpush3.msra.mxu1 %v11152_v2  ;;  %v11190_v2 = vld [vmem:[%s12106_s3 + $0x380] sm:$0xff]  ;;  %v11195_v5 = vld [vmem:[%s12106_s3 + $0x478] sm:$0xff] }
 0x253   : > { %8067 = vmatprep.subr.mxu0 %v11162_v55  ;;  %8101 = vmatprep.subr.mxu1 %v11167_v30  ;;  %12426 = vst [vmem:[#allocation59_spill] sm:$0xff] %v11190_v2  ;;  %12427 = vst [vmem:[#allocation60_spill] sm:$0xff] %v11195_v5 }
 0x254   : > { %8068 = vmatpush3.msra.mxu0 %v11162_v55  ;;  %8102 = vmatpush3.msra.mxu1 %v11167_v30  ;;  %v11204_v30 = vld [vmem:[%s12106_s3 + $0x378] sm:$0xff]  ;;  %v11209_v55 = vld [vmem:[%s12106_s3 + $0x470] sm:$0xff] }
 0x255   : > { %8069 = vmatprep.subr.mxu0 %v11176_v10  ;;  %8103 = vmatprep.subr.mxu1 %v11181_v9  ;;  %12428 = vst [vmem:[#allocation61_spill] sm:$0xff] %v11204_v30  ;;  %12429 = vst [vmem:[#allocation62_spill] sm:$0xff] %v11209_v55 }
 0x256   : > { %8070 = vmatpush3.msra.mxu0 %v11176_v10  ;;  %8104 = vmatpush3.msra.mxu1 %v11181_v9  ;;  %v11218_v9 = vld [vmem:[%s12106_s3 + $0x370] sm:$0xff]  ;;  %v11223_v10 = vld [vmem:[%s12106_s3 + $0x468] sm:$0xff] }
 0x257   : > { %8071 = vmatprep.subr.mxu0 %v11190_v2  ;;  %8105 = vmatprep.subr.mxu1 %v11195_v5  ;;  %12430 = vst [vmem:[#allocation63_spill] sm:$0xff] %v11218_v9  ;;  %12431 = vst [vmem:[#allocation64_spill] sm:$0xff] %v11223_v10 }
 0x258   : > { %8072 = vmatpush3.msra.mxu0 %v11190_v2  ;;  %8106 = vmatpush3.msra.mxu1 %v11195_v5  ;;  %v11232_v5 = vld [vmem:[%s12106_s3 + $0x368] sm:$0xff]  ;;  %v11237_v2 = vld [vmem:[%s12106_s3 + $0x460] sm:$0xff] }
 0x259   : > { %8073 = vmatprep.subr.mxu0 %v11204_v30  ;;  %8107 = vmatprep.subr.mxu1 %v11209_v55  ;;  %12432 = vst [vmem:[#allocation65_spill] sm:$0xff] %v11232_v5  ;;  %12433 = vst [vmem:[#allocation66_spill] sm:$0xff] %v11237_v2 }
 0x25a   : > { %8074 = vmatpush3.msra.mxu0 %v11204_v30  ;;  %8108 = vmatpush3.msra.mxu1 %v11209_v55  ;;  %v11246_v55 = vld [vmem:[%s12106_s3 + $0x360] sm:$0xff]  ;;  %v11251_v30 = vld [vmem:[%s12106_s3 + $0x458] sm:$0xff] }
 0x25b   : > { %8075 = vmatprep.subr.mxu0 %v11218_v9  ;;  %8109 = vmatprep.subr.mxu1 %v11223_v10  ;;  %12434 = vst [vmem:[#allocation67_spill] sm:$0xff] %v11246_v55  ;;  %12435 = vst [vmem:[#allocation68_spill] sm:$0xff] %v11251_v30 }
 0x25c   : > { %8076 = vmatpush3.msra.mxu0 %v11218_v9  ;;  %8110 = vmatpush3.msra.mxu1 %v11223_v10  ;;  %v11260_v10 = vld [vmem:[%s12106_s3 + $0x358] sm:$0xff]  ;;  %v11265_v9 = vld [vmem:[%s12106_s3 + $0x450] sm:$0xff] }
 0x25d   : > { %8077 = vmatprep.subr.mxu0 %v11232_v5  ;;  %8111 = vmatprep.subr.mxu1 %v11237_v2  ;;  %12436 = vst [vmem:[#allocation69_spill] sm:$0xff] %v11265_v9 }
 0x25e   : > { %8078 = vmatpush3.msra.mxu0 %v11232_v5  ;;  %8112 = vmatpush3.msra.mxu1 %v11237_v2  ;;  %v11274_v2 = vld [vmem:[%s12106_s3 + $0x350] sm:$0xff]  ;;  %v11279_v5 = vld [vmem:[%s12106_s3 + $0x448] sm:$0xff] }
 0x25f   : > { %8079 = vmatprep.subr.mxu0 %v11246_v55  ;;  %8113 = vmatprep.subr.mxu1 %v11251_v30  ;;  %12437 = vst [vmem:[#allocation70_spill] sm:$0xff] %v11274_v2  ;;  %12438 = vst [vmem:[#allocation71_spill] sm:$0xff] %v11279_v5 }
 0x260   : > { %8080 = vmatpush3.msra.mxu0 %v11246_v55  ;;  %8114 = vmatpush3.msra.mxu1 %v11251_v30  ;;  %v11288_v30 = vld [vmem:[%s12106_s3 + $0x348] sm:$0xff]  ;;  %v11293_v55 = vld [vmem:[%s12106_s3 + $0x440] sm:$0xff] }
 0x261   : > { %8081 = vmatprep.subr.mxu0 %v11260_v10  ;;  %8115 = vmatprep.subr.mxu1 %v11265_v9  ;;  %12439 = vst [vmem:[#allocation72_spill] sm:$0xff] %v11288_v30  ;;  %12440 = vst [vmem:[#allocation73_spill] sm:$0xff] %v11293_v55 }
 0x262   : > { %8082 = vmatpush3.msra.mxu0 %v11260_v10  ;;  %8116 = vmatpush3.msra.mxu1 %v11265_v9  ;;  %v11302_v9 = vld [vmem:[%s12106_s3 + $0x438] sm:$0xff] }
 0x263   : > { %8083 = vmatprep.subr.mxu0 %v11274_v2  ;;  %8117 = vmatprep.subr.mxu1 %v11279_v5  ;;  %12441 = vst [vmem:[#allocation74_spill] sm:$0xff] %v11302_v9 }
 0x264   : > { %8084 = vmatpush3.msra.mxu0 %v11274_v2  ;;  %8118 = vmatpush3.msra.mxu1 %v11279_v5  ;;  %v8645_v5 = vld [vmem:[%s12106_s3 + $0x160] sm:$0xff]  ;;  %v8656_v2 = vld [vmem:[%s12106_s3 + $0x130] sm:$0xff] }
 0x265   : > { %8085 = vmatprep.subr.mxu0 %v11288_v30  ;;  %8119 = vmatprep.subr.mxu1 %v11293_v55 }
 0x266   : > { %8086 = vmatpush3.msra.mxu0 %v11288_v30  ;;  %8120 = vmatpush3.msra.mxu1 %v11293_v55  ;;  %v8646_v55 = vld [vmem:[%s12106_s3 + $0x158] sm:$0xff]  ;;  %v8647_v30 = vld [vmem:[%s12106_s3 + $0x70] sm:$0xff] }
 0x267   : > { %8088 = vmatmul.mubr.msk.f32.vlgmr.msra.gmra.mxu0 %vm3436_vm2, %v10385_v39  ;;  %8121 = vmatprep.subr.mxu1 %v11302_v9 }
 0x268   : > { %8129 = vmatprep.subr.mxu0 %v8645_v5  ;;  %8090 = vmatprep.mubr.msk.f32.mxu0 %vm3436_vm2, %v10424_v63 }
 0x269   : > { %8122 = vmatpush3.msra.mxu1 %v11302_v9  ;;  %8130 = vmatpush3.msra.mxu0 %v8645_v5  ;;  %v8648_v5 = vld [vmem:[%s12106_s3 + $0x150] sm:$0xff]  ;;  %v8649_v9 = vld [vmem:[%s12106_s3 + $0x68] sm:$0xff] }
 0x26a   : > { %8124 = vmatmul.mubr.msk.f32.vlgmr.msra.gmra.mxu1 %vm3436_vm2, %v10449_v17  ;;  %8131 = vmatprep.subr.mxu0 %v8646_v55 }
 0x26b   : > { %8165 = vmatprep.subr.mxu1 %v8647_v30  ;;  %8126 = vmatprep.mubr.msk.f32.mxu1 %vm3436_vm2, %v10653_v35 }
 0x26c   : > { %8132 = vmatpush3.msra.mxu0 %v8646_v55  ;;  %8166 = vmatpush3.msra.mxu1 %v8647_v30  ;;  %v8650_v30 = vld [vmem:[%s12106_s3 + $0x148] sm:$0xff]  ;;  %v8651_v55 = vld [vmem:[%s12106_s3 + $0x60] sm:$0xff] }
 0x26d   : > { %8091 = vmatmul.mubr.msk.f32.gmra.mxu0 %vm3436_vm2, %v10673_v51  ;;  %8133 = vmatprep.subr.mxu0 %v8648_v5 }
 0x26e   : > { %8167 = vmatprep.subr.mxu1 %v8649_v9  ;;  %8134 = vmatpush3.msra.mxu0 %v8648_v5  ;;  %v8653_v5 = vld [vmem:[%s12106_s3 + $0x58] sm:$0xff] }
 0x26f   : > { %8159 = vmatprep.mubr.msk.f32.mxu0 %vm3436_vm2, %v10359_v50  ;;  %8168 = vmatpush3.msra.mxu1 %v8649_v9  ;;  %v8652_v9 = vld [vmem:[%s12106_s3 + $0x140] sm:$0xff] }
 0x270   : > { %8127 = vmatmul.mubr.msk.f32.gmra.mxu1 %vm3436_vm2, %v10884_v0  ;;  %8135 = vmatprep.subr.mxu0 %v8650_v30 }
 0x271   : > { %8169 = vmatprep.subr.mxu1 %v8651_v55  ;;  %8136 = vmatpush3.msra.mxu0 %v8650_v30  ;;  %v8654_v30 = vld [vmem:[%s12106_s3 + $0x138] sm:$0xff] }
 0x272   : > { %8170 = vmatpush3.msra.mxu1 %v8651_v55  ;;  %8195 = vmatprep.mubr.msk.f32.mxu1 %vm3436_vm2, %v10326_v23  ;;  %v8655_v55 = vld [vmem:[%s12106_s3 + $0x50] sm:$0xff] }
 0x273   : > { %8137 = vmatprep.subr.mxu0 %v8652_v9  ;;  %8171 = vmatprep.subr.mxu1 %v8653_v5 }
 0x274   : > { %8138 = vmatpush3.msra.mxu0 %v8652_v9  ;;  %8172 = vmatpush3.msra.mxu1 %v8653_v5  ;;  %v8657_v9 = vld [vmem:[%s12106_s3 + $0x48] sm:$0xff] }
 0x275   : > { %8139 = vmatprep.subr.mxu0 %v8654_v30  ;;  %8173 = vmatprep.subr.mxu1 %v8655_v55  ;;  %v8658_v5 = vld [vmem:[%s12106_s3 + $0x128] sm:$0xff] }
 0x276   : > { %8140 = vmatpush3.msra.mxu0 %v8654_v30  ;;  %8174 = vmatpush3.msra.mxu1 %v8655_v55  ;;  %v8659_v30 = vld [vmem:[%s12106_s3 + $0x40] sm:$0xff] }
 0x277   : > { %8141 = vmatprep.subr.mxu0 %v8656_v2  ;;  %8175 = vmatprep.subr.mxu1 %v8657_v9  ;;  %v8660_v55 = vld [vmem:[%s12106_s3 + $0x120] sm:$0xff] }
 0x278   : > { %8142 = vmatpush3.msra.mxu0 %v8656_v2  ;;  %8176 = vmatpush3.msra.mxu1 %v8657_v9  ;;  %v8661_v2 = vld [vmem:[%s12106_s3 + $0x38] sm:$0xff] }
 0x279   : > { %8143 = vmatprep.subr.mxu0 %v8658_v5  ;;  %8177 = vmatprep.subr.mxu1 %v8659_v30  ;;  %v8662_v9 = vld [vmem:[%s12106_s3 + $0x118] sm:$0xff] }
 0x27a   : > { %8144 = vmatpush3.msra.mxu0 %v8658_v5  ;;  %8178 = vmatpush3.msra.mxu1 %v8659_v30  ;;  %v8663_v5 = vld [vmem:[%s12106_s3 + $0x30] sm:$0xff] }
 0x27b   : > { %8145 = vmatprep.subr.mxu0 %v8660_v55  ;;  %8179 = vmatprep.subr.mxu1 %v8661_v2  ;;  %v8664_v30 = vld [vmem:[%s12106_s3 + $0x110] sm:$0xff] }
 0x27c   : > { %8146 = vmatpush3.msra.mxu0 %v8660_v55  ;;  %8180 = vmatpush3.msra.mxu1 %v8661_v2  ;;  %v8665_v55 = vld [vmem:[%s12106_s3 + $0x28] sm:$0xff] }
 0x27d   : > { %8147 = vmatprep.subr.mxu0 %v8662_v9  ;;  %8181 = vmatprep.subr.mxu1 %v8663_v5  ;;  %v8666_v2 = vld [vmem:[%s12106_s3 + $0x108] sm:$0xff] }
 0x27e   : > { %8148 = vmatpush3.msra.mxu0 %v8662_v9  ;;  %8182 = vmatpush3.msra.mxu1 %v8663_v5  ;;  %v8667_v9 = vld [vmem:[%s12106_s3 + $0x20] sm:$0xff] }
 0x27f   : > { %8149 = vmatprep.subr.mxu0 %v8664_v30  ;;  %8183 = vmatprep.subr.mxu1 %v8665_v55  ;;  %v8668_v5 = vld [vmem:[%s12106_s3 + $0x100] sm:$0xff] }
 0x280   : > { %8150 = vmatpush3.msra.mxu0 %v8664_v30  ;;  %8184 = vmatpush3.msra.mxu1 %v8665_v55  ;;  %v8669_v30 = vld [vmem:[%s12106_s3 + $0x18] sm:$0xff] }
 0x281   : > { %8151 = vmatprep.subr.mxu0 %v8666_v2  ;;  %8185 = vmatprep.subr.mxu1 %v8667_v9  ;;  %v8670_v55 = vld [vmem:[%s12106_s3 + $0xf8] sm:$0xff] }
 0x282   : > { %8152 = vmatpush3.msra.mxu0 %v8666_v2  ;;  %8186 = vmatpush3.msra.mxu1 %v8667_v9  ;;  %v8671_v2 = vld [vmem:[%s12106_s3 + $0x10] sm:$0xff] }
 0x283   : > { %8153 = vmatprep.subr.mxu0 %v8668_v5  ;;  %8187 = vmatprep.subr.mxu1 %v8669_v30  ;;  %v8672_v9 = vld [vmem:[%s12106_s3 + $0xf0] sm:$0xff] }
 0x284   : > { %8154 = vmatpush3.msra.mxu0 %v8668_v5  ;;  %8188 = vmatpush3.msra.mxu1 %v8669_v30  ;;  %v8673_v5 = vld [vmem:[%s12106_s3 + $0x8] sm:$0xff]  ;;  %v8674_v30 = vld [vmem:[%s12106_s3] sm:$0xff] }
 0x285   : > { %8155 = vmatprep.subr.mxu0 %v8670_v55  ;;  %8189 = vmatprep.subr.mxu1 %v8671_v2 }
 0x286   : > { %8156 = vmatpush3.msra.mxu0 %v8670_v55  ;;  %8190 = vmatpush3.msra.mxu1 %v8671_v2  ;;  %v8675_v55 = vld [vmem:[%s12106_s3 + $0x250] sm:$0xff]  ;;  %v8676_v2 = vld [vmem:[%s12106_s3 + $0x248] sm:$0xff] }
 0x287   : > { %8157 = vmatprep.subr.mxu0 %v8672_v9  ;;  %8191 = vmatprep.subr.mxu1 %v8673_v5 }
 0x288   : > { %8158 = vmatpush3.msra.mxu0 %v8672_v9  ;;  %8192 = vmatpush3.msra.mxu1 %v8673_v5  ;;  %v8677_v9 = vld [vmem:[%s12106_s3 + $0x340] sm:$0xff]  ;;  %v12467_v5 = vld [vmem:[#allocation22_spill] sm:$0xff] }
 0x289   : > { %8160 = vmatmul.mubr.msk.f32.vlgmr.msra.gmra.mxu0 %vm3436_vm2, %v10404_v11  ;;  %8193 = vmatprep.subr.mxu1 %v8674_v30 }
 0x28a   : > { %8201 = vmatprep.subr.mxu0 %v8675_v55  ;;  %8162 = vmatprep.mubr.msk.f32.mxu0 %vm3436_vm2, %v10449_v17 }
 0x28b   : > { %8194 = vmatpush3.msra.mxu1 %v8674_v30  ;;  %8202 = vmatpush3.msra.mxu0 %v8675_v55  ;;  %v12468_v30 = vld [vmem:[#allocation6_spill] sm:$0xff]  ;;  %v12469_v55 = vld [vmem:[#allocation23_spill] sm:$0xff] }
 0x28c   : > { %8196 = vmatmul.mubr.msk.f32.vlgmr.msra.gmra.mxu1 %vm3436_vm2, %v10344_v19  ;;  %8203 = vmatprep.subr.mxu0 %v8676_v2 }
 0x28d   : > { %8237 = vmatprep.subr.mxu1 %v8677_v9  ;;  %8198 = vmatprep.mubr.msk.f32.mxu1 %vm3436_vm2, %v10385_v39 }
 0x28e   : > { %8204 = vmatpush3.msra.mxu0 %v8676_v2  ;;  %8238 = vmatpush3.msra.mxu1 %v8677_v9  ;;  %v12470_v2 = vld [vmem:[#allocation24_spill] sm:$0xff] }
 0x28f   : > { %8163 = vmatmul.mubr.msk.f32.gmra.mxu0 %vm3436_vm2, %v10653_v35  ;;  %8205 = vmatprep.subr.mxu0 %v10376_v1 }
 0x290   : > { %8239 = vmatprep.subr.mxu1 %v10381_v25  ;;  %8206 = vmatpush3.msra.mxu0 %v10376_v1 }
 0x291   : > { %8231 = vmatprep.mubr.msk.f32.mxu0 %vm3436_vm2, %v10344_v19  ;;  %8240 = vmatpush3.msra.mxu1 %v10381_v25 }
 0x292   : > { %8199 = vmatmul.mubr.msk.f32.gmra.mxu1 %vm3436_vm2, %v10424_v63  ;;  %8207 = vmatprep.subr.mxu0 %v10400_v14 }
 0x293   : > { %8241 = vmatprep.subr.mxu1 %v10411_v49  ;;  %8208 = vmatpush3.msra.mxu0 %v10400_v14 }
 0x294   : > { %8242 = vmatpush3.msra.mxu1 %v10411_v49  ;;  %8267 = vmatprep.mubr.msk.f32.mxu1 %vm3436_vm2, %v10404_v11 }
 0x295   : > { %8209 = vmatprep.subr.mxu0 %v10432_v59  ;;  %8243 = vmatprep.subr.mxu1 %v10437_v12 }
 0x296   : > { %8210 = vmatpush3.msra.mxu0 %v10432_v59  ;;  %8244 = vmatpush3.msra.mxu1 %v10437_v12 }
 0x297   : > { %8211 = vmatprep.subr.mxu0 %v10457_v61  ;;  %8245 = vmatprep.subr.mxu1 %v10462_v43 }
 0x298   : > { %8212 = vmatpush3.msra.mxu0 %v10457_v61  ;;  %8246 = vmatpush3.msra.mxu1 %v10462_v43 }
 0x299   : > { %8213 = vmatprep.subr.mxu0 %v10476_v31  ;;  %8247 = vmatprep.subr.mxu1 %v10486_v8 }
 0x29a   : > { %8214 = vmatpush3.msra.mxu0 %v10476_v31  ;;  %8248 = vmatpush3.msra.mxu1 %v10486_v8 }
 0x29b   : > { %8215 = vmatprep.subr.mxu0 %v10499_v6  ;;  %8249 = vmatprep.subr.mxu1 %v10504_v54 }
 0x29c   : > { %8216 = vmatpush3.msra.mxu0 %v10499_v6  ;;  %8250 = vmatpush3.msra.mxu1 %v10504_v54 }
 0x29d   : > { %8217 = vmatprep.subr.mxu0 %v10514_v26  ;;  %8251 = vmatprep.subr.mxu1 %v10519_v56 }
 0x29e   : > { %8218 = vmatpush3.msra.mxu0 %v10514_v26  ;;  %8252 = vmatpush3.msra.mxu1 %v10519_v56  ;;  %v12442_v26 = vld [vmem:[#allocation29_spill] sm:$0xff] }
 0x29f   : > { %8219 = vmatprep.subr.mxu0 %v10528_v7  ;;  %8253 = vmatprep.subr.mxu1 %v10533_v40  ;;  %v7801_v1 = vpop.f32.mrf.mxu0 }
 0x2a0   : > { %8220 = vmatpush3.msra.mxu0 %v10528_v7  ;;  %8254 = vmatpush3.msra.mxu1 %v10533_v40  ;;  %v12443_v40 = vld [vmem:[#allocation33_spill] sm:$0xff] }
 0x2a1   : > { %8221 = vmatprep.subr.mxu0 %v10542_v27  ;;  %8255 = vmatprep.subr.mxu1 %v10547_v29  ;;  %v3515_v49 = vpop.f32.mrf.mxu0 }
 0x2a2   : > { %8222 = vmatpush3.msra.mxu0 %v10542_v27  ;;  %8256 = vmatpush3.msra.mxu1 %v10547_v29  ;;  %v7837_v25 = vpop.f32.mrf.mxu1  ;;  %v12444_v27 = vld [vmem:[#allocation43_spill] sm:$0xff] }
 0x2a3   : > { %8223 = vmatprep.subr.mxu0 %v10556_v38  ;;  %8257 = vmatprep.subr.mxu1 %v10561_v48  ;;  %v11479_v14 = vadd.f32 %v7837_v25, %v7801_v1  ;;  %v12471_v1 = vld [vmem:[#allocation38_spill] sm:$0xff] }
 0x2a4   : > { %8224 = vmatpush3.msra.mxu0 %v10556_v38  ;;  %8258 = vmatpush3.msra.mxu1 %v10561_v48  ;;  %v3612_v59 = vpop.f32.mrf.mxu1  ;;  %v12445_v38 = vld [vmem:[#allocation36_spill] sm:$0xff]  ;;  %v12472_v25 = vld [vmem:[#allocation18_spill] sm:$0xff] }
 0x2a5   : > { %8225 = vmatprep.subr.mxu0 %v10570_v53  ;;  %8259 = vmatprep.subr.mxu1 %v10575_v3  ;;  %v11485_v12 = vadd.f32 %v3612_v59, %v3515_v49  ;;  %v12446_v48 = vld [vmem:[#allocation44_spill] sm:$0xff] }
 0x2a6   : > { %8226 = vmatpush3.msra.mxu0 %v10570_v53  ;;  %8260 = vmatpush3.msra.mxu1 %v10575_v3  ;;  %v12473_v59 = vld [vmem:[#allocation8_spill] sm:$0xff] }
 0x2a7   : > { %8227 = vmatprep.subr.mxu0 %v10584_v36  ;;  %8261 = vmatprep.subr.mxu1 %v10589_v57 }
 0x2a8   : > { %8228 = vmatpush3.msra.mxu0 %v10584_v36  ;;  %8262 = vmatpush3.msra.mxu1 %v10589_v57  ;;  %v12447_v36 = vld [vmem:[#allocation45_spill] sm:$0xff] }
 0x2a9   : > { %8229 = vmatprep.subr.mxu0 %v10598_v21  ;;  %8263 = vmatprep.subr.mxu1 %v10603_v44  ;;  %v12448_v57 = vld [vmem:[#allocation37_spill] sm:$0xff] }
 0x2aa   : > { %8230 = vmatpush3.msra.mxu0 %v10598_v21  ;;  %8264 = vmatpush3.msra.mxu1 %v10603_v44  ;;  %v7804_v61 = vpop.f32.mrf.mxu0 }
 0x2ab   : > { %8232 = vmatmul.mubr.msk.f32.vlgmr.msra.gmra.mxu0 %vm3436_vm2, %v10385_v39  ;;  %8265 = vmatprep.subr.mxu1 %v10612_v34 }
 0x2ac   : > { %8273 = vmatprep.subr.mxu0 %v10619_v41  ;;  %8234 = vmatprep.mubr.msk.f32.mxu0 %vm3436_vm2, %v10424_v63  ;;  %v3525_v8 = vpop.f32.mrf.mxu0 }
 0x2ad   : > { %8266 = vmatpush3.msra.mxu1 %v10612_v34  ;;  %8274 = vmatpush3.msra.mxu0 %v10619_v41  ;;  %v7840_v43 = vpop.f32.mrf.mxu1  ;;  %v12449_v41 = vld [vmem:[#allocation47_spill] sm:$0xff] }
 0x2ae   : > { %8268 = vmatmul.mubr.msk.f32.vlgmr.msra.gmra.mxu1 %vm3436_vm2, %v10449_v17  ;;  %8275 = vmatprep.subr.mxu0 %v10631_v13  ;;  %v3628_v31 = vadd.f32 %v7840_v43, %v7804_v61  ;;  %v12474_v61 = vld [vmem:[#allocation13_spill] sm:$0xff]  ;;  %v12475_v43 = vld [vmem:[#allocation12_spill] sm:$0xff] }
 0x2af   : > { %8309 = vmatprep.subr.mxu1 %v10639_v60  ;;  %8270 = vmatprep.mubr.msk.f32.mxu1 %vm3436_vm2, %v10653_v35  ;;  %v3622_v6 = vpop.f32.mrf.mxu1 }
 0x2b0   : > { %8276 = vmatpush3.msra.mxu0 %v10631_v13  ;;  %8310 = vmatpush3.msra.mxu1 %v10639_v60  ;;  %v3623_v54 = vadd.f32 %v3622_v6, %v3525_v8  ;;  %v12450_v13 = vld [vmem:[#allocation9_spill] sm:$0xff] }
 0x2b1   : > { %8235 = vmatmul.mubr.msk.f32.gmra.mxu0 %vm3436_vm2, %v10673_v51  ;;  %8277 = vmatprep.subr.mxu0 %v10651_v46 }
 0x2b2   : > { %8311 = vmatprep.subr.mxu1 %v10661_v28  ;;  %8278 = vmatpush3.msra.mxu0 %v10651_v46 }
 0x2b3   : > { %8303 = vmatprep.mubr.msk.f32.mxu0 %vm3436_vm2, %v10385_v39  ;;  %8312 = vmatpush3.msra.mxu1 %v10661_v28  ;;  %v12451_v28 = vld [vmem:[#allocation16_spill] sm:$0xff] }
 0x2b4   : > { %8271 = vmatmul.mubr.msk.f32.gmra.mxu1 %vm3436_vm2, %v10884_v0  ;;  %8279 = vmatprep.subr.mxu0 %v10671_v15 }
 0x2b5   : > { %8313 = vmatprep.subr.mxu1 %v10680_v42  ;;  %8280 = vmatpush3.msra.mxu0 %v10671_v15 }
 0x2b6   : > { %8314 = vmatpush3.msra.mxu1 %v10680_v42  ;;  %8339 = vmatprep.mubr.msk.f32.mxu1 %vm3436_vm2, %v10359_v50  ;;  %v12452_v42 = vld [vmem:[#allocation46_spill] sm:$0xff] }
 0x2b7   : > { %8281 = vmatprep.subr.mxu0 %v10691_v32  ;;  %8315 = vmatprep.subr.mxu1 %v10696_v45 }
 0x2b8   : > { %8282 = vmatpush3.msra.mxu0 %v10691_v32  ;;  %8316 = vmatpush3.msra.mxu1 %v10696_v45  ;;  %v12453_v32 = vld [vmem:[#allocation39_spill] sm:$0xff]  ;;  %v12454_v45 = vld [vmem:[#allocation32_spill] sm:$0xff] }
 0x2b9   : > { %8283 = vmatprep.subr.mxu0 %v10706_v37  ;;  %8317 = vmatprep.subr.mxu1 %v10711_v4 }
 0x2ba   : > { %8284 = vmatpush3.msra.mxu0 %v10706_v37  ;;  %8318 = vmatpush3.msra.mxu1 %v10711_v4  ;;  %v3404_v37 = vmax.f32 %v12454_v45, 0.0  ;;  %v12455_v4 = vld [vmem:[#allocation30_spill] sm:$0xff] }
 0x2bb   : > { %8285 = vmatprep.subr.mxu0 %v10720_v33  ;;  %8319 = vmatprep.subr.mxu1 %v10725_v52 }
 0x2bc   : > { %8286 = vmatpush3.msra.mxu0 %v10720_v33  ;;  %8320 = vmatpush3.msra.mxu1 %v10725_v52  ;;  %v12456_v33 = vld [vmem:[#allocation34_spill] sm:$0xff]  ;;  %v12457_v52 = vld [vmem:[#allocation48_spill] sm:$0xff] }
 0x2bd   : > { %8287 = vmatprep.subr.mxu0 %v10734_v24  ;;  %8321 = vmatprep.subr.mxu1 %v10739_v62 }
 0x2be   : > { %8288 = vmatpush3.msra.mxu0 %v10734_v24  ;;  %8322 = vmatpush3.msra.mxu1 %v10739_v62  ;;  %v12458_v24 = vld [vmem:[#allocation31_spill] sm:$0xff] }
 0x2bf   : > { %8289 = vmatprep.subr.mxu0 %v10748_v18  ;;  %8323 = vmatprep.subr.mxu1 %v10753_v22  ;;  %v12459_v62 = vld [vmem:[#allocation35_spill] sm:$0xff] }
 0x2c0   : > { %8290 = vmatpush3.msra.mxu0 %v10748_v18  ;;  %8324 = vmatpush3.msra.mxu1 %v10753_v22  ;;  %v12460_v18 = vld [vmem:[#allocation10_spill] sm:$0xff]  ;;  %v12462_v22 = vld [vmem:[#allocation7_spill] sm:$0xff] }
 0x2c1   : > { %8291 = vmatprep.subr.mxu0 %v10762_v47  ;;  %8325 = vmatprep.subr.mxu1 %v10767_v20  ;;  %v11551_v50 = vpop.f32.mrf.mxu0 }
 0x2c2   : > { %8292 = vmatpush3.msra.mxu0 %v10762_v47  ;;  %8326 = vmatpush3.msra.mxu1 %v10767_v20  ;;  %v12463_v47 = vld [vmem:[#allocation20_spill] sm:$0xff]  ;;  %v12464_v20 = vld [vmem:[#allocation21_spill] sm:$0xff] }
 0x2c3   : > { %8293 = vmatprep.subr.mxu0 %v10776_v16  ;;  %8327 = vmatprep.subr.mxu1 %v12442_v26  ;;  %v11557_v56 = vpop.f32.mrf.mxu0 }
 0x2c4   : > { %8294 = vmatpush3.msra.mxu0 %v10776_v16  ;;  %8328 = vmatpush3.msra.mxu1 %v12442_v26  ;;  %v11561_v7 = vpop.f32.mrf.mxu1  ;;  %v12465_v16 = vld [vmem:[#allocation17_spill] sm:$0xff]  ;;  %v12478_v26 = vld [vmem:[#allocation40_spill] sm:$0xff] }
 0x2c5   : > { %8295 = vmatprep.subr.mxu0 %v12443_v40  ;;  %8329 = vmatprep.subr.mxu1 %v12444_v27 }
 0x2c6   : > { %8296 = vmatpush3.msra.mxu0 %v12443_v40  ;;  %8330 = vmatpush3.msra.mxu1 %v12444_v27  ;;  %v11567_v29 = vpop.f32.mrf.mxu1 }
 0x2c7   : > { %8297 = vmatprep.subr.mxu0 %v12445_v38  ;;  %8331 = vmatprep.subr.mxu1 %v12446_v48  ;;  %v7876_v53 = vpop.f32.mrf.mxu0 }
 0x2c8   : > { %8298 = vmatpush3.msra.mxu0 %v12445_v38  ;;  %8332 = vmatpush3.msra.mxu1 %v12446_v48  ;;  %v3738_v3 = vadd.f32 %v7876_v53, %v3628_v31  ;;  %v12476_v31 = vld [vmem:[#allocation25_spill] sm:$0xff]  ;;  %v12479_v38 = vld [vmem:[#allocation15_spill] sm:$0xff]  ;;  %v12481_v53 = vld [vmem:[#allocation28_spill] sm:$0xff] }
 0x2c9   : > { %8299 = vmatprep.subr.mxu0 %v12447_v36  ;;  %8333 = vmatprep.subr.mxu1 %v12448_v57  ;;  %v3726_v21 = vpop.f32.mrf.mxu0  ;;  %v12480_v48 = vld [vmem:[#allocation41_spill] sm:$0xff] }
 0x2ca   : > { %8300 = vmatpush3.msra.mxu0 %v12447_v36  ;;  %8334 = vmatpush3.msra.mxu1 %v12448_v57  ;;  %v3737_v44 = vadd.f32 %v3726_v21, %v3623_v54  ;;  %v7912_v34 = vpop.f32.mrf.mxu1  ;;  %v12477_v54 = vld [vmem:[#allocation26_spill] sm:$0xff]  ;;  %v12484_v57 = vld [vmem:[#allocation27_spill] sm:$0xff] }
 0x2cb   : > { %8301 = vmatprep.subr.mxu0 %v12449_v41  ;;  %8335 = vmatprep.subr.mxu1 %v12450_v13  ;;  %v11579_v60 = vadd.f32 %v7912_v34, %v3738_v3  ;;  %v12482_v3 = vld [vmem:[#allocation42_spill] sm:$0xff]  ;;  %v12488_v34 = vld [vmem:[#allocation52_spill] sm:$0xff] }
 0x2cc   : > { %8302 = vmatpush3.msra.mxu0 %v12449_v41  ;;  %8336 = vmatpush3.msra.mxu1 %v12450_v13  ;;  %v3834_v46 = vpop.f32.mrf.mxu1  ;;  %v12483_v36 = vld [vmem:[#allocation14_spill] sm:$0xff]  ;;  %v12489_v41 = vld [vmem:[#allocation53_spill] sm:$0xff] }
 0x2cd   : > { %8304 = vmatmul.mubr.msk.f32.vlgmr.msra.gmra.mxu0 %vm3436_vm2, %v10424_v63  ;;  %8337 = vmatprep.subr.mxu1 %v12451_v28  ;;  %v11586_v15 = vadd.f32 %v3834_v46, %v3737_v44  ;;  %v12486_v21 = vld [vmem:[#allocation50_spill] sm:$0xff]  ;;  %v12487_v44 = vld [vmem:[#allocation51_spill] sm:$0xff]  ;;  %v12493_v46 = vld [vmem:[#allocation57_spill] sm:$0xff] }
 0x2ce   : > { %8345 = vmatprep.subr.mxu0 %v12452_v42  ;;  %8306 = vmatprep.mubr.msk.f32.mxu0 %vm3436_vm2, %v10673_v51  ;;  %v12490_v13 = vld [vmem:[#allocation54_spill] sm:$0xff] }
 0x2cf   : > { %8338 = vmatpush3.msra.mxu1 %v12451_v28  ;;  %8346 = vmatpush3.msra.mxu0 %v12452_v42  ;;  %v12494_v28 = vld [vmem:[#allocation58_spill] sm:$0xff]  ;;  %v12497_v42 = vld [vmem:[#allocation61_spill] sm:$0xff] }
 0x2d0   : > { %8340 = vmatmul.mubr.msk.f32.vlgmr.msra.gmra.mxu1 %vm3436_vm2, %v10404_v11  ;;  %8347 = vmatprep.subr.mxu0 %v12453_v32 }
 0x2d1   : > { %8381 = vmatprep.subr.mxu1 %v12455_v4  ;;  %8342 = vmatprep.mubr.msk.f32.mxu1 %vm3436_vm2, %v10449_v17 }
 0x2d2   : > { %8348 = vmatpush3.msra.mxu0 %v12453_v32  ;;  %8382 = vmatpush3.msra.mxu1 %v12455_v4  ;;  %v12498_v32 = vld [vmem:[#allocation62_spill] sm:$0xff]  ;;  %v12499_v4 = vld [vmem:[#allocation63_spill] sm:$0xff] }
 0x2d3   : > { %8307 = vmatmul.mubr.msk.f32.gmra.mxu0 %vm3436_vm2, %v3404_v37  ;;  %8349 = vmatprep.subr.mxu0 %v12456_v33 }
 0x2d4   : > { %8383 = vmatprep.subr.mxu1 %v10892_v58  ;;  %8350 = vmatpush3.msra.mxu0 %v12456_v33  ;;  %v12500_v33 = vld [vmem:[#allocation64_spill] sm:$0xff] }
 0x2d5   : > { %8375 = vmatprep.mubr.msk.f32.mxu0 %vm3436_vm2, %v10326_v23  ;;  %8384 = vmatpush3.msra.mxu1 %v10892_v58  ;;  %v12461_v23 = vld [vmem:[#allocation19_spill] sm:$0xff] }
 0x2d6   : > { %8343 = vmatmul.mubr.msk.f32.gmra.mxu1 %vm3436_vm2, %v10653_v35  ;;  %8351 = vmatprep.subr.mxu0 %v12457_v52  ;;  %v12466_v58 = vld [vmem:[#allocation11_spill] sm:$0xff] }
 0x2d7   : > { %8385 = vmatprep.subr.mxu1 %v12458_v24  ;;  %8352 = vmatpush3.msra.mxu0 %v12457_v52  ;;  %v12501_v52 = vld [vmem:[#allocation65_spill] sm:$0xff] }
 0x2d8   : > { %8386 = vmatpush3.msra.mxu1 %v12458_v24  ;;  %8411 = vmatprep.mubr.msk.f32.mxu1 %vm3436_vm2, %v10344_v19  ;;  %v12502_v24 = vld [vmem:[#allocation66_spill] sm:$0xff] }
 0x2d9   : > { %8353 = vmatprep.subr.mxu0 %v12459_v62  ;;  %8387 = vmatprep.subr.mxu1 %v12460_v18 }
 0x2da   : > { %8354 = vmatpush3.msra.mxu0 %v12459_v62  ;;  %8388 = vmatpush3.msra.mxu1 %v12460_v18  ;;  %v12503_v62 = vld [vmem:[#allocation67_spill] sm:$0xff]  ;;  %v12504_v18 = vld [vmem:[#allocation68_spill] sm:$0xff] }
 0x2db   : > { %8355 = vmatprep.subr.mxu0 %v12461_v23  ;;  %8389 = vmatprep.subr.mxu1 %v12462_v22 }
 0x2dc   : > { %8356 = vmatpush3.msra.mxu0 %v12461_v23  ;;  %8390 = vmatpush3.msra.mxu1 %v12462_v22  ;;  %v12505_v23 = vld [vmem:[#allocation69_spill] sm:$0xff]  ;;  %v12506_v22 = vld [vmem:[#allocation70_spill] sm:$0xff] }
 0x2dd   : > { %8357 = vmatprep.subr.mxu0 %v12463_v47  ;;  %8391 = vmatprep.subr.mxu1 %v12464_v20 }
 0x2de   : > { %8358 = vmatpush3.msra.mxu0 %v12463_v47  ;;  %8392 = vmatpush3.msra.mxu1 %v12464_v20  ;;  %v12507_v47 = vld [vmem:[#allocation71_spill] sm:$0xff] }
 0x2df   : > { %8359 = vmatprep.subr.mxu0 %v12465_v16  ;;  %8393 = vmatprep.subr.mxu1 %v12466_v58 }
 0x2e0   : > { %8360 = vmatpush3.msra.mxu0 %v12465_v16  ;;  %8394 = vmatpush3.msra.mxu1 %v12466_v58  ;;  %v12508_v16 = vld [vmem:[#allocation72_spill] sm:$0xff]  ;;  %v12509_v58 = vld [vmem:[#allocation73_spill] sm:$0xff] }
 0x2e1   : > { %8361 = vmatprep.subr.mxu0 %v12467_v5  ;;  %8395 = vmatprep.subr.mxu1 %v12468_v30 }
 0x2e2   : > { %8362 = vmatpush3.msra.mxu0 %v12467_v5  ;;  %8396 = vmatpush3.msra.mxu1 %v12468_v30 }
 0x2e3   : > { %8363 = vmatprep.subr.mxu0 %v12469_v55  ;;  %8397 = vmatprep.subr.mxu1 %v12470_v2  ;;  %v11641_v9 = vpop.f32.mrf.mxu0 }
 0x2e4   : > { %8364 = vmatpush3.msra.mxu0 %v12469_v55  ;;  %8398 = vmatpush3.msra.mxu1 %v12470_v2 }
 0x2e5   : > { %8365 = vmatprep.subr.mxu0 %v12471_v1  ;;  %8399 = vmatprep.subr.mxu1 %v12472_v25  ;;  %v11647_v49 = vpop.f32.mrf.mxu0 }
 0x2e6   : > { %8366 = vmatpush3.msra.mxu0 %v12471_v1  ;;  %8400 = vmatpush3.msra.mxu1 %v12472_v25  ;;  %v11743_v20 = vpop.f32.mrf.mxu1 }
 0x2e7   : > { %8367 = vmatprep.subr.mxu0 %v12473_v59  ;;  %8401 = vmatprep.subr.mxu1 %v12474_v61 }
 0x2e8   : > { %8368 = vmatpush3.msra.mxu0 %v12473_v59  ;;  %8402 = vmatpush3.msra.mxu1 %v12474_v61  ;;  %v11754_v5 = vpop.f32.mrf.mxu1 }
 0x2e9   : > { %8369 = vmatprep.subr.mxu0 %v12475_v43  ;;  %8403 = vmatprep.subr.mxu1 %v12476_v31  ;;  %v7948_v8 = vpop.f32.mrf.mxu0 }
 0x2ea   : > { %8370 = vmatpush3.msra.mxu0 %v12475_v43  ;;  %8404 = vmatpush3.msra.mxu1 %v12476_v31  ;;  %v11660_v6 = vadd.f32 %v7948_v8, %v11579_v60  ;;  %v12492_v60 = vld [vmem:[#allocation56_spill] sm:$0xff] }
 0x2eb   : > { %8371 = vmatprep.subr.mxu0 %v12477_v54  ;;  %8405 = vmatprep.subr.mxu1 %v12478_v26  ;;  %v3942_v40 = vpop.f32.mrf.mxu0 }
 0x2ec   : > { %8372 = vmatpush3.msra.mxu0 %v12477_v54  ;;  %8406 = vmatpush3.msra.mxu1 %v12478_v26  ;;  %v11667_v27 = vadd.f32 %v3942_v40, %v11586_v15  ;;  %v12496_v15 = vld [vmem:[#allocation60_spill] sm:$0xff]  ;;  %v7984_v30 = vpop.f32.mrf.mxu1 }
 0x2ed   : > { %8373 = vmatprep.subr.mxu0 %v12479_v38  ;;  %8407 = vmatprep.subr.mxu1 %v12480_v48 }
 0x2ee   : > { %8374 = vmatpush3.msra.mxu0 %v12479_v38  ;;  %8408 = vmatpush3.msra.mxu1 %v12480_v48  ;;  %v4063_v55 = vpop.f32.mrf.mxu1 }
 0x2ef   : > { %8376 = vmatmul.mubr.msk.f32.vlgmr.msra.gmra.mxu0 %vm3436_vm2, %v10344_v19  ;;  %8409 = vmatprep.subr.mxu1 %v12481_v53  ;;  %v12485_v19 = vld [vmem:[#allocation49_spill] sm:$0xff] }
 0x2f0   : > { %8417 = vmatprep.subr.mxu0 %v12482_v3  ;;  %8378 = vmatprep.mubr.msk.f32.mxu0 %vm3436_vm2, %v10385_v39 }
 0x2f1   : > { %8410 = vmatpush3.msra.mxu1 %v12481_v53  ;;  %8418 = vmatpush3.msra.mxu0 %v12482_v3 }
 0x2f2   : > { %8412 = vmatmul.mubr.msk.f32.vlgmr.msra.gmra.mxu1 %vm3436_vm2, %v10385_v39  ;;  %8419 = vmatprep.subr.mxu0 %v12483_v36 }
 0x2f3   : > { %8453 = vmatprep.subr.mxu1 %v12484_v57  ;;  %8414 = vmatprep.mubr.msk.f32.mxu1 %vm3436_vm2, %v10424_v63 }
 0x2f4   : > { %8420 = vmatpush3.msra.mxu0 %v12483_v36  ;;  %8454 = vmatpush3.msra.mxu1 %v12484_v57 }
 0x2f5   : > { %8379 = vmatmul.mubr.msk.f32.gmra.mxu0 %vm3436_vm2, %v10424_v63  ;;  %8421 = vmatprep.subr.mxu0 %v12485_v19 }
 0x2f6   : > { %8455 = vmatprep.subr.mxu1 %v12486_v21  ;;  %8422 = vmatpush3.msra.mxu0 %v12485_v19 }
 0x2f7   : > { %8447 = vmatprep.mubr.msk.f32.mxu0 %vm3436_vm2, %v10404_v11  ;;  %8456 = vmatpush3.msra.mxu1 %v12486_v21  ;;  %v12491_v11 = vld [vmem:[#allocation55_spill] sm:$0xff] }
 0x2f8   : > { %8415 = vmatmul.mubr.msk.f32.gmra.mxu1 %vm3436_vm2, %v10673_v51  ;;  %8423 = vmatprep.subr.mxu0 %v12487_v44 }
 0x2f9   : > { %8457 = vmatprep.subr.mxu1 %v12488_v34  ;;  %8424 = vmatpush3.msra.mxu0 %v12487_v44  ;;  %v6464_v44 = vld [vmem:[%s12108_s5 + $0x98] sm:$0xff] }
 0x2fa   : > { %8458 = vmatpush3.msra.mxu1 %v12488_v34  ;;  %8483 = vmatprep.mubr.msk.f32.mxu1 %vm3436_vm2, %v10385_v39  ;;  %v12495_v39 = vld [vmem:[#allocation59_spill] sm:$0xff]  ;;  %v5385_v34 = vld [vmem:[%s12108_s5 + $0x48] sm:$0xff] }
 0x2fb   : > { %8425 = vmatprep.subr.mxu0 %v12489_v41  ;;  %8459 = vmatprep.subr.mxu1 %v12490_v13 }
 0x2fc   : > { %8426 = vmatpush3.msra.mxu0 %v12489_v41  ;;  %8460 = vmatpush3.msra.mxu1 %v12490_v13  ;;  %v8740_v41 = vmov 0.0   ;;  %v6463_v13 = vld [vmem:[%s12108_s5 + $0x90] sm:$0xff] }
 0x2fd   : > { %8427 = vmatprep.subr.mxu0 %v12491_v11  ;;  %8461 = vmatprep.subr.mxu1 %v12492_v60 }
 0x2fe   : > { %8428 = vmatpush3.msra.mxu0 %v12491_v11  ;;  %8462 = vmatpush3.msra.mxu1 %v12492_v60  ;;  %v5384_v11 = vld [vmem:[%s12108_s5 + $0x40] sm:$0xff]  ;;  %v6462_v60 = vld [vmem:[%s12108_s5 + $0x88] sm:$0xff] }
 0x2ff   : > { %8429 = vmatprep.subr.mxu0 %v12493_v46  ;;  %8463 = vmatprep.subr.mxu1 %v12494_v28 }
 0x300   : > { %8430 = vmatpush3.msra.mxu0 %v12493_v46  ;;  %8464 = vmatpush3.msra.mxu1 %v12494_v28  ;;  %v5383_v46 = vld [vmem:[%s12108_s5 + $0x38] sm:$0xff]  ;;  %v6461_v28 = vld [vmem:[%s12108_s5 + $0x80] sm:$0xff] }
 0x301   : > { %8431 = vmatprep.subr.mxu0 %v12495_v39  ;;  %8465 = vmatprep.subr.mxu1 %v12496_v15 }
 0x302   : > { %8432 = vmatpush3.msra.mxu0 %v12495_v39  ;;  %8466 = vmatpush3.msra.mxu1 %v12496_v15  ;;  %v6460_v39 = vld [vmem:[%s12108_s5 + $0x78] sm:$0xff]  ;;  %v5382_v15 = vld [vmem:[%s12108_s5 + $0x30] sm:$0xff] }
 0x303   : > { %8433 = vmatprep.subr.mxu0 %v12497_v42  ;;  %8467 = vmatprep.subr.mxu1 %v12498_v32 }
 0x304   : > { %8434 = vmatpush3.msra.mxu0 %v12497_v42  ;;  %8468 = vmatpush3.msra.mxu1 %v12498_v32  ;;  %v6459_v42 = vld [vmem:[%s12108_s5 + $0x70] sm:$0xff]  ;;  %v5381_v32 = vld [vmem:[%s12108_s5 + $0x28] sm:$0xff] }
 0x305   : > { %8435 = vmatprep.subr.mxu0 %v12499_v4  ;;  %8469 = vmatprep.subr.mxu1 %v12500_v33 }
 0x306   : > { %8436 = vmatpush3.msra.mxu0 %v12499_v4  ;;  %8470 = vmatpush3.msra.mxu1 %v12500_v33  ;;  %v6458_v4 = vld [vmem:[%s12108_s5 + $0x68] sm:$0xff]  ;;  %v5380_v33 = vld [vmem:[%s12108_s5 + $0x20] sm:$0xff] }
 0x307   : > { %8437 = vmatprep.subr.mxu0 %v12501_v52  ;;  %8471 = vmatprep.subr.mxu1 %v12502_v24 }
 0x308   : > { %8438 = vmatpush3.msra.mxu0 %v12501_v52  ;;  %8472 = vmatpush3.msra.mxu1 %v12502_v24  ;;  %v6457_v52 = vld [vmem:[%s12108_s5 + $0x60] sm:$0xff]  ;;  %v5379_v24 = vld [vmem:[%s12108_s5 + $0x18] sm:$0xff] }
 0x309   : > { %8439 = vmatprep.subr.mxu0 %v12503_v62  ;;  %8473 = vmatprep.subr.mxu1 %v12504_v18 }
 0x30a   : > { %8440 = vmatpush3.msra.mxu0 %v12503_v62  ;;  %8474 = vmatpush3.msra.mxu1 %v12504_v18  ;;  %v6456_v62 = vld [vmem:[%s12108_s5 + $0x58] sm:$0xff]  ;;  %v5378_v18 = vld [vmem:[%s12108_s5 + $0x10] sm:$0xff] }
 0x30b   : > { %8441 = vmatprep.subr.mxu0 %v11260_v10  ;;  %8475 = vmatprep.subr.mxu1 %v12505_v23 }
 0x30c   : > { %8442 = vmatpush3.msra.mxu0 %v11260_v10  ;;  %8476 = vmatpush3.msra.mxu1 %v12505_v23  ;;  %v12510_v10 = vld [vmem:[#allocation74_spill] sm:$0xff] }
 0x30d   : > { %8443 = vmatprep.subr.mxu0 %v12506_v22  ;;  %8477 = vmatprep.subr.mxu1 %v12507_v47  ;;  %v6455_v23 = vld [vmem:[%s12108_s5 + $0x50] sm:$0xff] }
 0x30e   : > { %8444 = vmatpush3.msra.mxu0 %v12506_v22  ;;  %8478 = vmatpush3.msra.mxu1 %v12507_v47  ;;  %v5377_v22 = vld [vmem:[%s12108_s5 + $0x8] sm:$0xff]  ;;  %v5376_v47 = vld [vmem:[%s12108_s5] sm:$0xff] }
 0x30f   : > { %8445 = vmatprep.subr.mxu0 %v12508_v16  ;;  %8479 = vmatprep.subr.mxu1 %v12509_v58 }
 0x310   : > { %8446 = vmatpush3.msra.mxu0 %v12508_v16  ;;  %8480 = vmatpush3.msra.mxu1 %v12509_v58 }
 0x311   : > { %8448 = vmatmul.mubr.msk.f32.vlgmr.msra.gmra.mxu0 %vm3436_vm2, %v10449_v17  ;;  %8481 = vmatprep.subr.mxu1 %v12510_v10  ;;  %v11768_v17 = vpop.f32.mrf.mxu0 }
 0x312   : > { %8450 = vmatprep.mubr.msk.f32.mxu0 %vm3436_vm2, %v10653_v35  ;;  %8482 = vmatpush3.msra.mxu1 %v12510_v10  ;;  %v11770_v35 = vpop.f32.mrf.mxu1 }
 0x313   : > { %8484 = vmatmul.mubr.msk.f32.vlgmr.msra.gmra.mxu1 %vm3436_vm2, %v10424_v63  ;;  %v11772_v2 = vpop.f32.mrf.mxu0  ;;  %8489 = vmatprep.subr.mxu0 %v8740_v41 }
 0x314   : > { %8486 = vmatprep.mubr.msk.f32.mxu1 %vm3436_vm2, %v10673_v51  ;;  %v11774_v1 = vpop.f32.mrf.mxu1  ;;  %8512 = vmatprep.subr.mxu1 %v8740_v41 }
 0x315   : > { %8451 = vmatmul.mubr.msk.f32.gmra.mxu0 %vm3436_vm2, %v10884_v0  ;;  %v8020_v63 = vpop.f32.mrf.mxu0  ;;  %8513 = vmatpush3.msra.mxu1 %v5385_v34 }
 0x316   : > { %v8056_v25 = vpop.f32.mrf.mxu1  ;;  %v4154_v0 = vadd.f32 %v8020_v63, %v7984_v30  ;;  %8490 = vmatpush3.msra.mxu0 %v6464_v44  ;;  %8514 = vmatprep.subr.mxu1 %v8740_v41 }
 0x317   : > { %8487 = vmatmul.mubr.msk.f32.gmra.mxu1 %vm3436_vm2, %v3404_v37  ;;  %v4148_v51 = vpop.f32.mrf.mxu0  ;;  %8491 = vmatprep.subr.mxu0 %v8740_v41 }
 0x318   : > { %v4249_v61 = vpop.f32.mrf.mxu1  ;;  %v4149_v45 = vadd.f32 %v4148_v51, %v4063_v55  ;;  %v4261_v31 = vadd.f32 %v8056_v25, %v4154_v0  ;;  %8492 = vmatpush3.msra.mxu0 %v6463_v13  ;;  %8515 = vmatpush3.msra.mxu1 %v5384_v11 }
 0x319   : > { %8493 = vmatprep.subr.mxu0 %v8740_v41  ;;  %8516 = vmatprep.subr.mxu1 %v8740_v41 }
 0x31a   : > { %v4260_v26 = vadd.f32 %v4249_v61, %v4149_v45  ;;  %8494 = vmatpush3.msra.mxu0 %v6462_v60  ;;  %8517 = vmatpush3.msra.mxu1 %v5383_v46 }
 0x31b   : > { %8495 = vmatprep.subr.mxu0 %v8740_v41  ;;  %8518 = vmatprep.subr.mxu1 %v8740_v41 }
 0x31c   : > { %8496 = vmatpush3.msra.mxu0 %v6461_v28  ;;  %8519 = vmatpush3.msra.mxu1 %v5382_v15 }
 0x31d   : > { %8497 = vmatprep.subr.mxu0 %v8740_v41  ;;  %8520 = vmatprep.subr.mxu1 %v8740_v41 }
 0x31e   : > { %8498 = vmatpush3.msra.mxu0 %v6460_v39  ;;  %8521 = vmatpush3.msra.mxu1 %v5381_v32  ;;  %v4144_v39 = vadd.f32 %v11768_v17, %v11743_v20 }
 0x31f   : > { %8499 = vmatprep.subr.mxu0 %v8740_v41  ;;  %8522 = vmatprep.subr.mxu1 %v8740_v41 }
 0x320   : > { %8500 = vmatpush3.msra.mxu0 %v6459_v42  ;;  %8523 = vmatpush3.msra.mxu1 %v5380_v33  ;;  %v4139_v42 = vadd.f32 %v11772_v2, %v11754_v5  ;;  %v3735_v5 = vadd.f32 %v11557_v56, %v11485_v12 }
 0x321   : > { %8501 = vmatprep.subr.mxu0 %v8740_v41  ;;  %8524 = vmatprep.subr.mxu1 %v8740_v41 }
 0x322   : > { %8502 = vmatpush3.msra.mxu0 %v6458_v4  ;;  %8525 = vmatpush3.msra.mxu1 %v5379_v24  ;;  %v4259_v4 = vadd.f32 %v11770_v35, %v4144_v39 }
 0x323   : > { %8503 = vmatprep.subr.mxu0 %v8740_v41  ;;  %8526 = vmatprep.subr.mxu1 %v8740_v41 }
 0x324   : > { %8504 = vmatpush3.msra.mxu0 %v6457_v52  ;;  %8527 = vmatpush3.msra.mxu1 %v5378_v18  ;;  %v4258_v18 = vadd.f32 %v11774_v1, %v4139_v42 }
 0x325   : > { %8505 = vmatprep.subr.mxu0 %v8740_v41  ;;  %8528 = vmatprep.subr.mxu1 %v8740_v41 }
 0x326   : > { %8506 = vmatpush3.msra.mxu0 %v6456_v62  ;;  %8529 = vmatpush3.msra.mxu1 %v5377_v22  ;;  %v3736_v62 = vadd.f32 %v11551_v50, %v11479_v14 }
 0x327   : > { %v11776_v59 = vpop.f32.mrf.mxu0  ;;  %8507 = vmatprep.subr.mxu0 %v8740_v41  ;;  %8509 = vmatprep.mubr.msk.f32.mxu0 %vm8741_vm3, %v8740_v41 }
 0x328   : > { %8508 = vmatpush3.msra.mxu0 %v6455_v23  ;;  %8530 = vmatprep.subr.mxu1 %v8740_v41  ;;  %v4364_v23 = vadd.f32 %v11776_v59, %v4259_v4 }
 0x329   : > { %v11778_v43 = vpop.f32.mrf.mxu0  ;;  %8535 = vmatprep.subr.mxu0 %v8740_v41  ;;  %8531 = vmatpush3.msra.mxu1 %v5376_v47 }
 0x32a   : > { %v11780_v37 = vpop.f32.mrf.mxu1  ;;  %8532 = vmatprep.mubr.msk.f32.mxu1 %vm8741_vm3, %v8740_v41  ;;  %8558 = vmatprep.subr.mxu1 %v8740_v41  ;;  %v4363_v2 = vadd.f32 %v11778_v43, %v4258_v18 }
 0x32b   : > { %v4469_v14 = vadd.f32 %v11780_v37, %v4364_v23 }
 0x32c   : > { %v11782_v8 = vpop.f32.mrf.mxu1 }
 0x32d   : > { %v8092_v54 = vpop.f32.mrf.mxu0  ;;  %v4468_v12 = vadd.f32 %v11782_v8, %v4363_v2 }
 0x32e   : > { %v4366_v40 = vadd.f32 %v8092_v54, %v4261_v31 }
 0x32f   : > { %v4354_v38 = vpop.f32.mrf.mxu0 }
 0x330   : > { %v4365_v48 = vadd.f32 %v4354_v38, %v4260_v26  ;;  %v8128_v53 = vpop.f32.mrf.mxu1 }
 0x331   : > { %v11784_v3 = vadd.f32 %v8128_v53, %v4366_v40 }
 0x332   : > { %v4459_v36 = vpop.f32.mrf.mxu1 }
 0x333   : > { %v5352_v57 = vmax.f32 %v11660_v6, %v11784_v3  ;;  %v11788_v19 = vadd.f32 %v4459_v36, %v4365_v48  ;;  %v6468_v6 = vld [vmem:[%s12108_s5 + $0xa8] sm:$0xff]  ;;  %v6480_v3 = vld [vmem:[%s12108_s5 + $0x100] sm:$0xff] }
 0x335   : > { %v5351_v21 = vmax.f32 %v11667_v27, %v11788_v19  ;;  %v6469_v27 = vld [vmem:[%s12108_s5 + $0xb0] sm:$0xff]  ;;  %v6481_v19 = vld [vmem:[%s12108_s5 + $0x108] sm:$0xff] }
 0x349   : > { %v8161_v16 = vpop.f32.mrf.mxu0 }
 0x34b   : > { %v4538_v10 = vpop.f32.mrf.mxu0 }
 0x34c   : > { %v8197_v58 = vpop.f32.mrf.mxu1 }
 0x34d   : > { %v4629_v52 = vadd.f32 %v8197_v58, %v8161_v16  ;;  %v3844_v58 = vadd.f32 %v11561_v7, %v3736_v62 }
 0x34e   : > { %v4623_v30 = vpop.f32.mrf.mxu1 }
 0x34f   : > { %v11878_v55 = vpop.f32.mrf.mxu0  ;;  %v4624_v47 = vadd.f32 %v4623_v30, %v4538_v10  ;;  %v3843_v10 = vadd.f32 %v11567_v29, %v3735_v5  ;;  %v3952_v30 = vadd.f32 %v11641_v9, %v3844_v58  ;;  %v11919_v29 = vld [vmem:[%s12107_s4] ss:$0 sm:$0xff] }
 0x351   : > { %v11882_v25 = vpop.f32.mrf.mxu0  ;;  %v3951_v7 = vadd.f32 %v11647_v49, %v3843_v10  ;;  %v5350_v37 = vmax.f32 %v3952_v30, %v4469_v14  ;;  %v6473_v14 = vld [vmem:[%s12108_s5 + $0xd0] sm:$0xff]  ;;  %v6470_v30 = vld [vmem:[%s12108_s5 + $0xb8] sm:$0xff] }
 0x352   : > { %v11880_v63 = vpop.f32.mrf.mxu1 }
 0x353   : > { %v5349_v9 = vmax.f32 %v3951_v7, %v4468_v12  ;;  %v4639_v23 = vadd.f32 %v11880_v63, %v11878_v55  ;;  %v6475_v55 = vld [vmem:[%s12108_s5 + $0xe0] sm:$0xff]  ;;  %v6487_v63 = vld [vmem:[%s12108_s5 + $0x138] sm:$0xff]  ;;  %v6482_v12 = vld [vmem:[%s12108_s5 + $0x110] sm:$0xff] }
 0x354   : > { %v11884_v51 = vpop.f32.mrf.mxu1  ;;  %v5729_v7 = vld [vmem:[%s12110_s7 + $0x30] sm:$0x3] }
 0x36b   : > { %v8233_v0 = vpop.f32.mrf.mxu0 }
 0x36c   : > { %v4728_v20 = vadd.f32 %v8233_v0, %v4629_v52 }
 0x36d   : > { %v4708_v45 = vpop.f32.mrf.mxu0 }
 0x36e   : > { %v8269_v61 = vpop.f32.mrf.mxu1  ;;  %v4727_v39 = vadd.f32 %v4708_v45, %v4624_v47 }
 0x370   : > { %v4797_v31 = vpop.f32.mrf.mxu1 }
 0x371   : > { %v11886_v54 = vpop.f32.mrf.mxu0  ;;  %v4816_v0 = vadd.f32 %v4797_v31, %v4727_v39  ;;  %v6486_v39 = vld [vmem:[%s12108_s5 + $0x130] sm:$0xff] }
 0x372   : > { %v4730_v5 = vadd.f32 %v11886_v54, %v4639_v23  ;;  %v6474_v54 = vld [vmem:[%s12108_s5 + $0xd8] sm:$0xff] }
 0x373   : > { %v11890_v40 = vpop.f32.mrf.mxu0 }
 0x374   : > { %v11888_v26 = vpop.f32.mrf.mxu1 }
 0x376   : > { %v11892_v38 = vpop.f32.mrf.mxu1 }
 0x38d   : > { %v8305_v48 = vpop.f32.mrf.mxu0 }
 0x38f   : > { %v4889_v36 = vpop.f32.mrf.mxu0 }
 0x390   : > { %v8341_v53 = vpop.f32.mrf.mxu1 }
 0x392   : > { %v4978_v44 = vpop.f32.mrf.mxu1 }
 0x393   : > { %v11894_v34 = vpop.f32.mrf.mxu0 }
 0x395   : > { %v11896_v11 = vpop.f32.mrf.mxu0 }
 0x396   : > { %v8344_v13 = vpop.f32.mrf.mxu1 }
 0x398   : > { %v4988_v60 = vpop.f32.mrf.mxu1 }
 0x3af   : > { %v8377_v46 = vpop.f32.mrf.mxu0 }
 0x3b0   : > { %v5069_v24 = vadd.f32 %v8377_v46, %v8341_v53  ;;  %v4817_v53 = vadd.f32 %v8269_v61, %v4728_v20  ;;  %v4908_v61 = vadd.f32 %v4889_v36, %v4816_v0  ;;  %v6479_v0 = vld [vmem:[%s12108_s5 + $0xf8] sm:$0xff] }
 0x3b1   : > { %v5063_v15 = vpop.f32.mrf.mxu0 }
 0x3b2   : > { %v8413_v28 = vpop.f32.mrf.mxu1  ;;  %v5064_v17 = vadd.f32 %v5063_v15, %v4978_v44  ;;  %v4909_v45 = vadd.f32 %v8305_v48, %v4817_v53  ;;  %v6484_v53 = vld [vmem:[%s12108_s5 + $0x120] sm:$0xff] }
 0x3b3   : > { %v5168_v16 = vadd.f32 %v8413_v28, %v5069_v24  ;;  %v4634_v24 = vadd.f32 %v11884_v51, %v11882_v25  ;;  %v6476_v25 = vld [vmem:[%s12108_s5 + $0xe8] sm:$0xff] }
 0x3b4   : > { %v5148_v32 = vpop.f32.mrf.mxu1 }
 0x3b5   : > { %v8380_v33 = vpop.f32.mrf.mxu0  ;;  %v5167_v59 = vadd.f32 %v5148_v32, %v5064_v17  ;;  %v4729_v47 = vadd.f32 %v11890_v40, %v4634_v24 }
 0x3b6   : > { %v5079_v8 = vadd.f32 %v8380_v33, %v8344_v13 }
 0x3b7   : > { %v5073_v35 = vpop.f32.mrf.mxu0  ;;  %v4818_v40 = vadd.f32 %v11892_v38, %v4729_v47  ;;  %v6490_v47 = vld [vmem:[%s12111_s8] ss:$0 sm:$0xff] }
 0x3b8   : > { %v8416_v22 = vpop.f32.mrf.mxu1  ;;  %v5074_v32 = vadd.f32 %v5073_v35, %v4988_v60 }
 0x3b9   : > { %v5170_v20 = vadd.f32 %v8416_v22, %v5079_v8  ;;  %v4910_v58 = vadd.f32 %v11896_v11, %v4818_v40  ;;  %v6472_v11 = vld [vmem:[%s12108_s5 + $0xc8] sm:$0xff] }
 0x3ba   : > { %v5158_v50 = vpop.f32.mrf.mxu1 }
 0x3bb   : > { %v5169_v18 = vadd.f32 %v5158_v50, %v5074_v32  ;;  %v6485_v50 = vld [vmem:[%s12108_s5 + $0x128] sm:$0xff] }
 0x3bc   : > { %v5724_v32 = vld [vmem:[%s12110_s7 + $0x8] sm:$0xff] }
 0x3d1   : > { %v8449_v1 = vpop.f32.mrf.mxu0 }
 0x3d2   : > { %v5257_v46 = vadd.f32 %v8449_v1, %v5168_v16  ;;  %v4819_v16 = vadd.f32 %v11888_v26, %v4730_v5 }
 0x3d3   : > { %v5237_v56 = vpop.f32.mrf.mxu0  ;;  %v8485_v43 = vpop.f32.mrf.mxu1 }
 0x3d4   : > { %v5256_v44 = vadd.f32 %v5237_v56, %v5167_v59  ;;  %v5346_v28 = vadd.f32 %v8485_v43, %v5257_v46  ;;  %v4911_v1 = vadd.f32 %v11894_v34, %v4819_v16  ;;  %v6471_v34 = vld [vmem:[%s12108_s5 + $0xc0] sm:$0xff]  ;;  %v6483_v46 = vld [vmem:[%s12108_s5 + $0x118] sm:$0xff] }
 0x3d5   : > { %v8452_v15 = vpop.f32.mrf.mxu0  ;;  %v5326_v42 = vpop.f32.mrf.mxu1  ;;  %v6467_v43 = vld [vmem:[%s12108_s5 + $0xa0] sm:$0xff] }
 0x3d6   : > { %v5354_v4 = vmax.f32 %v4909_v45, %v5346_v28  ;;  %v5345_v52 = vadd.f32 %v5326_v42, %v5256_v44  ;;  %v5259_v2 = vadd.f32 %v8452_v15, %v5170_v20  ;;  %v6478_v44 = vld [vmem:[%s12108_s5 + $0xf0] sm:$0xff]  ;;  %v5727_v15 = vld [vmem:[%s12110_s7 + $0x20] sm:$0xff]  ;;  %v5726_v42 = vld [vmem:[%s12110_s7 + $0x18] sm:$0xff] }
 0x3d7   : > { %v5247_v49 = vpop.f32.mrf.mxu0  ;;  %v8488_v62 = vpop.f32.mrf.mxu1 }
 0x3d8   : > { %v5358_v31 = vmax.f32 %v5350_v37, %v5354_v4  ;;  %v5353_v48 = vmax.f32 %v4908_v61, %v5345_v52  ;;  %v5258_v33 = vadd.f32 %v5247_v49, %v5169_v18  ;;  %v5348_v38 = vadd.f32 %v8488_v62, %v5259_v2  ;;  %v5728_v37 = vld [vmem:[%s12110_s7 + $0x28] sm:$0xff]  ;;  %v5725_v61 = vld [vmem:[%s12110_s7 + $0x10] sm:$0xff]  ;;  %v5723_v4 = vld [vmem:[%s12110_s7] sm:$0xff] }
 0x3d9   : > { %v5336_v51 = vpop.f32.mrf.mxu1  ;;  %v6489_v18 = vld [vmem:[%s12109_s6] ss:$0 sm:$0xff] }
 0x3da   : > { %v5369_v36 = vadd.f32 %v11919_v29, %v5358_v31  ;;  %v5357_v60 = vmax.f32 %v5349_v9, %v5353_v48  ;;  %v5347_v22 = vadd.f32 %v5336_v51, %v5258_v33  ;;  %v5356_v59 = vmax.f32 %v4911_v1, %v5348_v38 }
 0x3dc   : > { %v5373_v17 = vmax.f32 %v5369_v36, 0.0  ;;  %v5368_v13 = vadd.f32 %v11919_v29, %v5357_v60  ;;  %v5355_v26 = vmax.f32 %v4910_v58, %v5347_v22  ;;  %v5360_v56 = vmax.f32 %v5352_v57, %v5356_v59 }
 0x3de   : > { %v5372_v35 = vmax.f32 %v5368_v13, 0.0  ;;  %8510 = vmatmul.mubr.msk.f32.vlgmr.msra.gmra.mxu0 %vm5397_vm4, %v5373_v17  ;;  %v5359_v10 = vmax.f32 %v5351_v21, %v5355_v26  ;;  %v5371_v57 = vadd.f32 %v11919_v29, %v5360_v56 }
 0x3df   : > { %8536 = vmatpush3.msra.mxu0 %v6476_v25  ;;  %8555 = vmatprep.mubr.msk.f32.mxu0 %vm8741_vm3, %v8740_v41 }
 0x3e0   : > { %8537 = vmatprep.subr.mxu0 %v8740_v41  ;;  %8533 = vmatmul.mubr.msk.f32.vlgmr.msra.gmra.mxu1 %vm5397_vm4, %v5372_v35  ;;  %v5370_v21 = vadd.f32 %v11919_v29, %v5359_v10  ;;  %v5375_v28 = vmax.f32 %v5371_v57, 0.0 }
 0x3e1   : > { %8538 = vmatpush3.msra.mxu0 %v6475_v55  ;;  %8559 = vmatpush3.msra.mxu1 %v6487_v63 }
 0x3e2   : > { %8539 = vmatprep.subr.mxu0 %v8740_v41  ;;  %8560 = vmatprep.subr.mxu1 %v8740_v41  ;;  %v5374_v45 = vmax.f32 %v5370_v21, 0.0 }
 0x3e3   : > { %8540 = vmatpush3.msra.mxu0 %v6474_v54  ;;  %8561 = vmatpush3.msra.mxu1 %v6486_v39 }
 0x3e4   : > { %8541 = vmatprep.subr.mxu0 %v8740_v41  ;;  %8562 = vmatprep.subr.mxu1 %v8740_v41 }
 0x3e5   : > { %8542 = vmatpush3.msra.mxu0 %v6473_v14  ;;  %8563 = vmatpush3.msra.mxu1 %v6485_v50 }
 0x3e6   : > { %8543 = vmatprep.subr.mxu0 %v8740_v41  ;;  %8564 = vmatprep.subr.mxu1 %v8740_v41 }
 0x3e7   : > { %8544 = vmatpush3.msra.mxu0 %v6472_v11  ;;  %8565 = vmatpush3.msra.mxu1 %v6484_v53 }
 0x3e8   : > { %8545 = vmatprep.subr.mxu0 %v8740_v41  ;;  %8566 = vmatprep.subr.mxu1 %v8740_v41 }
 0x3e9   : > { %8546 = vmatpush3.msra.mxu0 %v6471_v34  ;;  %8567 = vmatpush3.msra.mxu1 %v6483_v46 }
 0x3ea   : > { %8547 = vmatprep.subr.mxu0 %v8740_v41  ;;  %8568 = vmatprep.subr.mxu1 %v8740_v41 }
 0x3eb   : > { %8548 = vmatpush3.msra.mxu0 %v6470_v30  ;;  %8569 = vmatpush3.msra.mxu1 %v6482_v12 }
 0x3ec   : > { %8549 = vmatprep.subr.mxu0 %v8740_v41  ;;  %8570 = vmatprep.subr.mxu1 %v8740_v41 }
 0x3ed   : > { %8550 = vmatpush3.msra.mxu0 %v6469_v27  ;;  %8571 = vmatpush3.msra.mxu1 %v6481_v19 }
 0x3ee   : > { %8551 = vmatprep.subr.mxu0 %v8740_v41  ;;  %8572 = vmatprep.subr.mxu1 %v8740_v41 }
 0x3ef   : > { %8552 = vmatpush3.msra.mxu0 %v6468_v6  ;;  %8573 = vmatpush3.msra.mxu1 %v6480_v3 }
 0x3f0   : > { %8553 = vmatprep.subr.mxu0 %v8740_v41  ;;  %8574 = vmatprep.subr.mxu1 %v8740_v41 }
 0x3f1   : > { %8554 = vmatpush3.msra.mxu0 %v6467_v43  ;;  %8575 = vmatpush3.msra.mxu1 %v6479_v0 }
 0x3f2   : > { %8556 = vmatmul.mubr.msk.f32.vlgmr.msra.gmra.mxu0 %vm5397_vm4, %v5374_v45  ;;  %8576 = vmatprep.subr.mxu1 %v8740_v41 }
 0x3f3   : > { %8577 = vmatpush3.msra.mxu1 %v6478_v44  ;;  %8578 = vmatprep.mubr.msk.f32.mxu1 %vm8741_vm3, %v8740_v41 }
 0x3f4   : > { %8579 = vmatmul.mubr.msk.f32.vlgmr.msra.gmra.mxu1 %vm5397_vm4, %v5375_v28  ;;  %8581 = vmatprep.subr.mxu0 %v8740_v41 }
 0x3f5   : > { %8595 = vmatprep.mubr.msk.f32.mxu0 %vm8741_vm3, %v8740_v41  ;;  %8582 = vmatpush3.msk.msra.mxu0 %vm5741_vm5, %v5729_v7 }
 0x3f6   : > { %8583 = vmatprep.subr.mxu0 %v8740_v41 }
 0x3f7   : > { %8584 = vmatpush3.msra.mxu0 %v5728_v37 }
 0x3f8   : > { %8585 = vmatprep.subr.mxu0 %v8740_v41 }
 0x3f9   : > { %8586 = vmatpush3.msra.mxu0 %v5727_v15 }
 0x3fa   : > { %8587 = vmatprep.subr.mxu0 %v8740_v41 }
 0x3fb   : > { %8588 = vmatpush3.msra.mxu0 %v5726_v42 }
 0x3fc   : > { %8589 = vmatprep.subr.mxu0 %v8740_v41 }
 0x3fd   : > { %8590 = vmatpush3.msra.mxu0 %v5725_v61 }
 0x3fe   : > { %8591 = vmatprep.subr.mxu0 %v8740_v41 }
 0x3ff   : > { %8592 = vmatpush3.msra.mxu0 %v5724_v32 }
 0x400   : > { %8593 = vmatprep.subr.mxu0 %v8740_v41 }
 0x401   : > { %8594 = vmatpush3.msra.mxu0 %v5723_v4 }
 0x49e   : > { %v5467_v52 = vpop.f32.mrf.mxu0 }
 0x4a0   : > { %v8511_v29 = vpop.f32.mrf.mxu0  ;;  %v5540_v9 = vpop.f32.mrf.mxu1 }
 0x4a1   : > { %v5541_v31 = vadd.f32 %v5540_v9, %v5467_v52 }
 0x4a2   : > { %v8534_v8 = vpop.f32.mrf.mxu1 }
 0x4b2   : > { %v5624_v48 = vpop.f32.mrf.mxu0 }
 0x4b3   : > { %v5628_v24 = vadd.f32 %v5624_v48, %v5541_v31 }
 0x4b4   : > { %v8557_v49 = vpop.f32.mrf.mxu0  ;;  %v5709_v62 = vpop.f32.mrf.mxu1 }
 0x4b5   : > { %v5713_v36 = vadd.f32 %v5709_v62, %v5628_v24 }
 0x4b6   : > { %v8580_v41 = vpop.f32.mrf.mxu1 }
 0x4b7   : > { %v5721_v60 = vadd.f32 %v6489_v18, %v5713_v36 }
 0x4b9   : > { %v5722_v23 = vmax.f32 %v5721_v60, 0.0 }
 0x4bb   : > { %8596 = vmatmul.mubr.msk.f32.vlgmr.msra.gmra.mxu0 %vm5737_vm6, %v5722_v23 }
 0x57b   : > { %v5811_v20 = vpop.f32.mrf.mxu0 }
 0x57c   : > { %v5812_v17 = vadd.f32 %v6490_v47, %v5811_v20 }
 0x57d   : > { %v8597_v13 = vpop.f32.mrf.mxu0 }
 0x57e   : > { %v5816_v33 = vsel %vm5815_vm7, %v5812_v17, -inf }
 0x57f   : > { %5817 = vmax.xlane.f32.xlu0 %v5816_v33 }
 0x608   : > { %v5818_v25 = vpop.xlane.xlu0 %5817 }
 0x609   : > { %v5819_v51 = vsub.f32 %v5812_v17, %v5818_v25 }
 0x60b   : > { %v5820_v5 = vmul.f32 1.442695, %v5819_v51 }
 0x60d   : > { %8641 = vpow2.f32 %v5820_v5 }
 0x61a   : > { %v8642_v2 = vpop.eup %8641 }
 0x61b   : > { %v5822_v35 = vsel %vm5815_vm7, %v8642_v2, 0.0 }
 0x61c   : > { %5823 = vadd.xlane.f32.xlu0 %v5822_v35 }
 0x6a5   : > { %v5824_v55 = vpop.xlane.xlu0 %5823 }
 0x6a6   : > { %8643 = vlog2.f32 %v5824_v55 }
 0x6b3   : > { %v8644_v63 = vpop.eup %8643 }
 0x6b4   : > { %v5826_v40 = vmul.f32 0.6931472, %v8644_v63 }
 0x6b6   : > { %v5827_v22 = vadd.f32 %v5826_v40, %v5818_v25 }
 0x6b8   : > { %v5828_v54 = vsub.f32 %v5812_v17, %v5827_v22 }
 0x6ba   : > { %5829 = vst.msk [vmem:[%s473_s25] sm:$0xff] %vm5815_vm7, %v5828_v54 }
 0x6bb   : > { %8691 = shalt.err (!%p8688_p5)
}
 0x6bc   : > { %s8692_s21 = scalar_lea.hbm %s5842_s28, 128  ;;  %s8696_s25 = scalar_lea.hbm %s12112_s9, 256 }
 0x6bd   : > { %p8693_p7 = scmp.ne.s32.totalorder %s5842_s28, %s8692_s21  ;;  %p8697_p12 = scmp.lt.s32.totalorder %s5842_s28, %s12112_s9 }
 0x6be   : > { %p8698_p13 = scmp.lt.s32.totalorder %s8696_s25, %s8692_s21 }
 0x6bf   : > { %p8694_p10 = pnand %p8693_p7, %p8831_p6 }
 0x6c0   : > { %p8699_p0 = por %p8698_p13, %p8697_p12 }
 0x6c1   : > { %p8695_p11 = pneg %p8694_p10 }
 0x6c3   : > { %p8700_p9 = pnand %p8699_p0, %p8695_p11 }
 0x6c5   : > { %8703 = shalt.err (!%p8700_p9)
}
 0x6c6   : > { %8600 = dma.vmem_to_hbm [thread:$0]  (%p8831_p6), %s5845_s26, 128, %s5842_s28, %s5831_s29  }
 0x6c7 PF: > { %s5856_s14 = sand.u32 1, %s8726_s30   ;;  %p12511_p1 = scmp.ge.s32.totalorder %s8738_s12, 2 }
 0x6c8   : > { %s5857_s16 = scalar_lea.sflag [#allocation4], %s5856_s14 }
 0x6c9   : > { %p8603_p2 = pnand %p12511_p1, %p8835_p8 }
 0x6cb   : > { %p8604_p3 = pneg %p8603_p2 }
 0x6cd   : > { %8721 = dma.done.wait (%p8604_p3), %s5857_s16, 128  }
 0x6ce   : > { %8723 = vsyncadd (%p8604_p3), %s5857_s16, 4294967168  ;;  %p19_p9 = scmp.ge.s32.totalorder %s8816_s15, 4   ;;  %s12512_s30 = smov %s8730_s10 }
 0x6cf   : > { %s12513_s10 = smov %s8734_s11  ;;  %s12514_s11 = smov %s8829_s18 }
 0x6d0   : > { %s12515_s12 = smov %s8816_s15  ;;  %21 = sbr.rel (!%p19_p9) target bundleno = 3 (0x3), region = 182 }
 0x6d5   :  { %5862 = vsyncpa [#allocation4], 1 }
 0x6d6   :  { %5864 = vsyncpa [#allocation4 + $0x1], 1 }

</bundles_post_ra>
